<compile_context>
chip_gen: v5e
topology: v5e:2x2
jax: 0.10.0
libtpu: 0.0.40
codegen_flags: <defaults>
</compile_context>

<pallas_src>
import jax
import jax.numpy as jnp
from jax import lax
from jax.experimental import pallas as pl
from jax.experimental.pallas import tpu as pltpu


def _expand_conv1_weight(w1, *, W, Wo, scale, dtype):
    """Conv3d weight (C1, Cin, 3, 3, 3) -> (9*W*Cin, Wo*C1) banded matmul operand.

    Folds BOTH the kw taps and the nearest-neighbour W-upsample into the contraction, so
    the kernel feeds NON-upsampled (w, c) lanes and gets the upsampled-resolution conv1
    output directly.  Row index = (kd*3+kh)*W*Cin + wi*Cin + ci, col index = wo*C1 + co.
    """
    u = jnp.arange(Wo)[None, :] + jnp.arange(3)[:, None] - 1           # (kw, wo): upsampled col
    valid = (u >= 0) & (u < Wo)                                         # outside -> zero pad
    src = jnp.where(valid, u, 0) // scale                               # original-W source col
    sel = ((src[:, :, None] == jnp.arange(W)[None, None, :])
           & valid[:, :, None]).astype(jnp.float32)                     # (kw, wo, wi)
    bd = jnp.einsum('kqv,oidhk->dhviqo', sel, w1.astype(jnp.float32))   # (3,3,W,Cin,Wo,C1)
    C1, Cin = w1.shape[0], w1.shape[1]
    return bd.reshape(9 * W * Cin, Wo * C1).astype(dtype)


def _expand_conv2_weight(w2, *, Wo, dtype):
    """Conv3d weight (Cout, C1, 3, 3, 3) -> (9*Wo*C1, Wo*Cout) banded (block-Toeplitz)
    operand: kw tap + W zero-padding folded into the band, so each (kd,kh) tap copy in the
    kernel is a single full-lane-width (Wo*C1 = 128) slab at lane offset 0."""
    Cout, C1 = w2.shape[0], w2.shape[1]
    sel = (jnp.arange(Wo)[:, None, None] - jnp.arange(Wo)[None, :, None] + 1
           == jnp.arange(3)[None, None, :]).astype(jnp.float32)         # (wi, wo, kw)
    bd = jnp.einsum('vqk,oidhk->dhviqo', sel, w2.astype(jnp.float32))   # (3,3,Wo,C1,Wo,Cout)
    return bd.reshape(9 * Wo * C1, Wo * Cout).astype(dtype)


def _expand_shortcut_weight(ws, *, Cin, Cout, W, Wo, scale, dtype):
    """Shortcut (1x1x1 conv weight, or identity when ws is None) -> (W*Cin, Wo*Cout)
    operand that also performs the W-upsample; appended as extra contraction columns of
    the conv2 matmul so the shortcut shares that MXU op."""
    wmat = (jnp.eye(Cout, dtype=jnp.float32) if ws is None
            else ws.reshape(Cout, Cin).astype(jnp.float32))              # (co, ci)
    sel = (jnp.arange(Wo)[:, None] // scale
           == jnp.arange(W)[None, :]).astype(jnp.float32)                # (wo, wi)
    bd = jnp.einsum('qv,oi->viqo', sel, wmat)                            # (W, Cin, Wo, Cout)
    return bd.reshape(W * Cin, Wo * Cout).astype(dtype)


def upsample_residual_forward(x, params, *, scale=2, compute_dtype=jnp.bfloat16):
    """UpSample forward: nearest upsample (1, scale, scale) then ResidualBlock.

    x      : (N, Cin, D, H, W) float32 (NCDHW, PyTorch layout)
    params : (w1, b1, w2, b2, ws, bs); ws/bs are None when in_channels == out_channels.
    returns: (N, Cout, D, H*scale, W*scale) float32
    """
    w1, b1, w2, b2, ws, bs = params
    N, Cin, D, H, W = x.shape
    C1 = w1.shape[0]                    # 2 * Cin
    Cout = w2.shape[0]
    Ho, Wo = H * scale, W * scale
    Dp, Hp = D + 2, Ho + 2
    Lx = W * Cin                        # input lane width (w, c) - NOT W-upsampled
    L2 = Wo * C1                        # hidden lane width (w, c)
    Lo = Wo * Cout                      # output lane width (w, c)
    K1 = 9 * Lx                         # conv1 contraction (27 taps folded to 9)
    K2 = 9 * L2 + Lx                    # conv2 contraction + appended shortcut columns
    M = D * Ho                          # all depth slices batched into one matmul
    f32 = jnp.float32
    cdt = compute_dtype

    # Channels-last (lanes = (w, c)) view of the ORIGINAL-size input.  This is the only
    # wrapper-side data pass and it is over the un-upsampled tensor; the 4x blow-up never
    # reaches HBM.
    # TODO(synk): fold this transpose into the kernel as well (needs a Cin->lane-minor
    # in-kernel transpose, XLU-heavy for tiny Cin, so it stays wrapper glue for now).
    xt = jnp.transpose(x, (0, 2, 3, 4, 1)).reshape(N, D, H, Lx)

    bd1 = _expand_conv1_weight(w1, W=W, Wo=Wo, scale=scale, dtype=cdt)       # (K1, L2)
    bd2 = _expand_conv2_weight(w2, Wo=Wo, dtype=cdt)                         # (9*L2, Lo)
    bds = _expand_shortcut_weight(ws, Cin=Cin, Cout=Cout, W=W, Wo=Wo,
                                  scale=scale, dtype=cdt)                    # (Lx, Lo)
    bd2s = jnp.concatenate([bd2, bds], axis=0)                               # (K2, Lo)
    bsv = jnp.zeros((Cout,), f32) if bs is None else bs.astype(f32)
    b1r = jnp.tile(b1.astype(f32), Wo)[None, :]                              # (1, L2)
    b2r = (jnp.tile(b2.astype(f32), Wo) + jnp.tile(bsv, Wo))[None, :]        # (1, Lo)

    def kernel(x_ref, bd1_ref, b1_ref, bd2_ref, b2_ref, o_ref,
               xpad, hpad, col1, col2):
        # (1) Zero ONLY the halo faces; interiors are fully overwritten below.  Must run
        #     every grid step: scratch persists across steps, and a one-time
        #     program_id==0 zero would leave stale halos on v7x's second TensorCore.
        xpad[0:1, :, :] = jnp.zeros((1, Hp, Lx), cdt)
        xpad[Dp - 1:Dp, :, :] = jnp.zeros((1, Hp, Lx), cdt)
        xpad[:, 0:1, :] = jnp.zeros((Dp, 1, Lx), cdt)
        xpad[:, Hp - 1:Hp, :] = jnp.zeros((Dp, 1, Lx), cdt)
        hpad[0:1, :, :] = jnp.zeros((1, Hp, L2), cdt)
        hpad[Dp - 1:Dp, :, :] = jnp.zeros((1, Hp, L2), cdt)
        hpad[:, 0:1, :] = jnp.zeros((Dp, 1, L2), cdt)
        hpad[:, Hp - 1:Hp, :] = jnp.zeros((Dp, 1, L2), cdt)

        # (2) In-kernel nearest upsample: H-repeat = each source row stored to `scale`
        #     adjacent interior sublanes; W-repeat is folded into bd1/bds (no lane dup).
        for h in range(H):                       # TODO(synk): lax.fori_loop for large H
            row = x_ref[0, :, h:h + 1, :].astype(cdt)                 # (D, 1, Lx)
            xpad[1:1 + D, 1 + scale * h:1 + scale * (h + 1), :] = (
                jnp.broadcast_to(row, (D, scale, Lx)))

        # (3) conv1 im2col: 9 taps (kw folded into the weight band), full-buffer-width
        #     slabs, no lane shifting.
        for kd in range(3):
            for kh in range(3):
                t = kd * 3 + kh
                for d in range(D):               # TODO(synk): depth tiling for large D
                    col1[d * Ho:(d + 1) * Ho, t * Lx:(t + 1) * Lx] = (
                        xpad[kd + d, kh:kh + Ho, :])

        # (4) conv1 + bias + ReLU as ONE (M, K1) @ (K1, L2) MXU matmul, f32 accumulate.
        h1 = jnp.dot(col1[...], bd1_ref[...], preferred_element_type=f32)
        h1 = jnp.maximum(h1 + b1_ref[...], 0.0).astype(cdt)           # (M, L2)
        for d in range(D):
            hpad[1 + d, 1:1 + Ho, :] = h1[d * Ho:(d + 1) * Ho, :]     # 128-lane stores

        # (5) conv2 im2col (9 taps, 128-lane aligned) + shortcut columns appended.
        for kd in range(3):
            for kh in range(3):
                t = kd * 3 + kh
                for d in range(D):
                    col2[d * Ho:(d + 1) * Ho, t * L2:(t + 1) * L2] = (
                        hpad[kd + d, kh:kh + Ho, :])
        for d in range(D):                        # shortcut shares the conv2 matmul
            col2[d * Ho:(d + 1) * Ho, 9 * L2:9 * L2 + Lx] = xpad[1 + d, 1:1 + Ho, :]

        # (6) conv2 + shortcut + biases as ONE (M, K2) @ (K2, Lo) MXU matmul.
        y = jnp.dot(col2[...], bd2_ref[...], preferred_element_type=f32) + b2_ref[...]
        o_ref[0] = y.astype(o_ref.dtype)                              # lane-dense store

    out = pl.pallas_call(
        kernel,
        out_shape=jax.ShapeDtypeStruct((N, M, Lo), f32),
        grid=(N,),                                 # one grid step per sample
        in_specs=[
            pl.BlockSpec((1, D, H, Lx), lambda n: (n, 0, 0, 0)),
            # TODO(synk): single-buffer these grid-invariant operands
            # (pipeline_mode=pl.Buffered(1)) to halve their VMEM footprint on v7x.
            pl.BlockSpec((K1, L2), lambda n: (0, 0)),
            pl.BlockSpec((1, L2), lambda n: (0, 0)),
            pl.BlockSpec((K2, Lo), lambda n: (0, 0)),
            pl.BlockSpec((1, Lo), lambda n: (0, 0)),
        ],
        out_specs=pl.BlockSpec((1, M, Lo), lambda n: (n, 0, 0)),
        scratch_shapes=[
            pltpu.VMEM((Dp, Hp, Lx), cdt),         # D/H-padded, H-upsampled input
            pltpu.VMEM((Dp, Hp, L2), cdt),         # D/H-padded hidden activation
            pltpu.VMEM((M, K1), cdt),              # conv1 im2col columns
            pltpu.VMEM((M, K2), cdt),              # conv2 (+shortcut) im2col columns
        ],
        # Total VMEM use is ~1 MiB at these sizes, so the generation-default scoped limit
        # is fine on v5e/v6e/v7x; revisit together with depth tiling at realistic shapes.
        compiler_params=pltpu.CompilerParams(
            dimension_semantics=("parallel",)),    # samples shard across v7x's 2 TCs
    )(xt, bd1, b1r, bd2s, b2r)

    # (N, D*Ho, Wo*Cout) -> NCDHW (wrapper glue: free reshape + one transpose).
    return jnp.transpose(out.reshape(N, D, Ho, Wo, Cout), (0, 4, 1, 2, 3))


def upsample_residual_reference(x, params, *, scale=2):
    """Plain-JAX reference (lax conv, HIGHEST precision) in NCDHW for correctness checks."""
    w1, b1, w2, b2, ws, bs = params
    xu = jnp.repeat(jnp.repeat(x, scale, axis=3), scale, axis=4)
    dn = ('NCDHW', 'OIDHW', 'NCDHW')
    hp = lax.Precision.HIGHEST
    h = jax.nn.relu(
        lax.conv_general_dilated(xu, w1, (1, 1, 1), 'SAME', dimension_numbers=dn,
                                 precision=hp) + b1[None, :, None, None, None])
    y = lax.conv_general_dilated(h, w2, (1, 1, 1), 'SAME', dimension_numbers=dn,
                                 precision=hp) + b2[None, :, None, None, None]
    if ws is None:
        sc = xu
    else:
        sc = lax.conv_general_dilated(xu, ws, (1, 1, 1), 'SAME', dimension_numbers=dn,
                                      precision=hp) + bs[None, :, None, None, None]
    return sc + y


def _make_params(key, Cin, Cout):
    C1 = 2 * Cin
    ks = jax.random.split(key, 6)
    w1 = 0.1 * jax.random.normal(ks[0], (C1, Cin, 3, 3, 3), jnp.float32)
    b1 = 0.1 * jax.random.normal(ks[1], (C1,), jnp.float32)
    w2 = 0.1 * jax.random.normal(ks[2], (Cout, C1, 3, 3, 3), jnp.float32)
    b2 = 0.1 * jax.random.normal(ks[3], (Cout,), jnp.float32)
    if Cin != Cout:
        ws = 0.1 * jax.random.normal(ks[4], (Cout, Cin, 1, 1, 1), jnp.float32)
        bs = 0.1 * jax.random.normal(ks[5], (Cout,), jnp.float32)
    else:
        ws = bs = None                   # identity shortcut
    return w1, b1, w2, b2, ws, bs


if __name__ == "__main__":
    key = jax.random.PRNGKey(0)
    kx1, kx2, kp1, kp2 = jax.random.split(key, 4)
    N, D, H, W, scale = 2, 4, 8, 8, 2

    # ---- Config A: Cin != Cout -> 1x1-conv shortcut path ----
    Cin, Cout = 4, 8
    x = jax.random.normal(kx1, (N, Cin, D, H, W), jnp.float32)
    params = _make_params(kp1, Cin, Cout)
    ref = upsample_residual_reference(x, params, scale=scale)

    # Exact-path check (f32 operands): tight tolerance so layout/indexing bugs show up.
    out_f32 = jax.block_until_ready(
        upsample_residual_forward(x, params, scale=scale, compute_dtype=jnp.float32))
    assert out_f32.shape == (N, Cout, D, scale * H, scale * W), out_f32.shape
    assert jnp.allclose(out_f32, ref, atol=1e-4, rtol=1e-4), \
        float(jnp.max(jnp.abs(out_f32 - ref)))

    # Perf-default check (bf16 operands, f32 MXU accumulation): tolerance sized to the
    # bf16 rounding budget of ~216-term dot products (layout already validated above).
    out_bf16 = jax.block_until_ready(
        upsample_residual_forward(x, params, scale=scale, compute_dtype=jnp.bfloat16))
    assert float(jnp.max(jnp.abs(out_bf16 - ref))) < 1e-1, \
        float(jnp.max(jnp.abs(out_bf16 - ref)))

    # ---- Config B: Cin == Cout -> identity shortcut path (previously untested) ----
    Cin2 = Cout2 = 4
    x2 = jax.random.normal(kx2, (N, Cin2, D, H, W), jnp.float32)
    params2 = _make_params(kp2, Cin2, Cout2)
    ref2 = upsample_residual_reference(x2, params2, scale=scale)
    out2 = jax.block_until_ready(
        upsample_residual_forward(x2, params2, scale=scale, compute_dtype=jnp.float32))
    assert out2.shape == (N, Cout2, D, scale * H, scale * W), out2.shape
    assert jnp.allclose(out2, ref2, atol=1e-4, rtol=1e-4), \
        float(jnp.max(jnp.abs(out2 - ref2)))

    print("KERNEL_OK")
</pallas_src>

<mosaic_0001>
module attributes {stable_mosaic.version = 11 : i64} {
  func.func @kernel(%arg0: i32, %arg1: memref<1x4x8x32xf32, #tpu.memory_space<vmem>>, %arg2: memref<288x128xf32, #tpu.memory_space<vmem>>, %arg3: memref<1x128xf32, #tpu.memory_space<vmem>>, %arg4: memref<1184x128xf32, #tpu.memory_space<vmem>>, %arg5: memref<1x128xf32, #tpu.memory_space<vmem>>, %arg6: memref<1x64x128xf32, #tpu.memory_space<vmem>>, %arg7: memref<6x18x32xf32, #tpu.memory_space<vmem>>, %arg8: memref<6x18x128xf32, #tpu.memory_space<vmem>>, %arg9: memref<64x288xf32, #tpu.memory_space<vmem>>, %arg10: memref<64x1184xf32, #tpu.memory_space<vmem>>) attributes {dimension_semantics = [#tpu.dimension_semantics<parallel>], iteration_bounds = array<i64: 2>, scalar_prefetch = 0 : i64, scratch_operands = 4 : i64, tpu.core_type = #tpu.core_type<tc>, window_params = [{transform_indices = @transform_0, window_bounds = array<i64: 1, 4, 8, 32>}, {pipeline_mode = #tpu.pipeline_mode<synchronous>, transform_indices = @transform_1, window_bounds = array<i64: 288, 128>}, {pipeline_mode = #tpu.pipeline_mode<synchronous>, transform_indices = @transform_2, window_bounds = array<i64: 1, 128>}, {pipeline_mode = #tpu.pipeline_mode<synchronous>, transform_indices = @transform_3, window_bounds = array<i64: 1184, 128>}, {pipeline_mode = #tpu.pipeline_mode<synchronous>, transform_indices = @transform_4, window_bounds = array<i64: 1, 128>}, {transform_indices = @transform_5, window_bounds = array<i64: 1, 64, 128>}]} {
    %cst = arith.constant 0.000000e+00 : f32
    %0 = vector.broadcast %cst : f32 to vector<1x18x32xf32>
    %c0 = arith.constant 0 : index
    %c0_0 = arith.constant 0 : index
    %c0_1 = arith.constant 0 : index
    %1 = vector.load %arg7[%c0, %c0_0, %c0_1] : memref<6x18x32xf32, #tpu.memory_space<vmem>>, vector<1x18x32xf32>
    tpu.vector_store %arg7[%c0, %c0_0, %c0_1], %0 {strides = array<i32>} : memref<6x18x32xf32, #tpu.memory_space<vmem>>, vector<1x18x32xf32>,
    %cst_2 = arith.constant 0.000000e+00 : f32
    %2 = vector.broadcast %cst_2 : f32 to vector<1x18x32xf32>
    %c5 = arith.constant 5 : index
    %c0_3 = arith.constant 0 : index
    %c0_4 = arith.constant 0 : index
    %3 = vector.load %arg7[%c5, %c0_3, %c0_4] : memref<6x18x32xf32, #tpu.memory_space<vmem>>, vector<1x18x32xf32>
    tpu.vector_store %arg7[%c5, %c0_3, %c0_4], %2 {strides = array<i32>} : memref<6x18x32xf32, #tpu.memory_space<vmem>>, vector<1x18x32xf32>,
    %cst_5 = arith.constant 0.000000e+00 : f32
    %4 = vector.broadcast %cst_5 : f32 to vector<6x1x32xf32>
    %c0_6 = arith.constant 0 : index
    %c0_7 = arith.constant 0 : index
    %c0_8 = arith.constant 0 : index
    %5 = vector.load %arg7[%c0_6, %c0_7, %c0_8] : memref<6x18x32xf32, #tpu.memory_space<vmem>>, vector<6x1x32xf32>
    tpu.vector_store %arg7[%c0_6, %c0_7, %c0_8], %4 {strides = array<i32>} : memref<6x18x32xf32, #tpu.memory_space<vmem>>, vector<6x1x32xf32>,
    %cst_9 = arith.constant 0.000000e+00 : f32
    %6 = vector.broadcast %cst_9 : f32 to vector<6x1x32xf32>
    %c0_10 = arith.constant 0 : index
    %c17 = arith.constant 17 : index
    %c0_11 = arith.constant 0 : index
    %7 = vector.load %arg7[%c0_10, %c17, %c0_11] : memref<6x18x32xf32, #tpu.memory_space<vmem>>, vector<6x1x32xf32>
    tpu.vector_store %arg7[%c0_10, %c17, %c0_11], %6 {strides = array<i32>} : memref<6x18x32xf32, #tpu.memory_space<vmem>>, vector<6x1x32xf32>,
    %cst_12 = arith.constant 0.000000e+00 : f32
    %8 = vector.broadcast %cst_12 : f32 to vector<1x18x128xf32>
    %c0_13 = arith.constant 0 : index
    %c0_14 = arith.constant 0 : index
    %c0_15 = arith.constant 0 : index
    %9 = vector.load %arg8[%c0_13, %c0_14, %c0_15] : memref<6x18x128xf32, #tpu.memory_space<vmem>>, vector<1x18x128xf32>
    tpu.vector_store %arg8[%c0_13, %c0_14, %c0_15], %8 {strides = array<i32>} : memref<6x18x128xf32, #tpu.memory_space<vmem>>, vector<1x18x128xf32>,
    %cst_16 = arith.constant 0.000000e+00 : f32
    %10 = vector.broadcast %cst_16 : f32 to vector<1x18x128xf32>
    %c5_17 = arith.constant 5 : index
    %c0_18 = arith.constant 0 : index
    %c0_19 = arith.constant 0 : index
    %11 = vector.load %arg8[%c5_17, %c0_18, %c0_19] : memref<6x18x128xf32, #tpu.memory_space<vmem>>, vector<1x18x128xf32>
    tpu.vector_store %arg8[%c5_17, %c0_18, %c0_19], %10 {strides = array<i32>} : memref<6x18x128xf32, #tpu.memory_space<vmem>>, vector<1x18x128xf32>,
    %cst_20 = arith.constant 0.000000e+00 : f32
    %12 = vector.broadcast %cst_20 : f32 to vector<6x1x128xf32>
    %c0_21 = arith.constant 0 : index
    %c0_22 = arith.constant 0 : index
    %c0_23 = arith.constant 0 : index
    %13 = vector.load %arg8[%c0_21, %c0_22, %c0_23] : memref<6x18x128xf32, #tpu.memory_space<vmem>>, vector<6x1x128xf32>
    tpu.vector_store %arg8[%c0_21, %c0_22, %c0_23], %12 {strides = array<i32>} : memref<6x18x128xf32, #tpu.memory_space<vmem>>, vector<6x1x128xf32>,
    %cst_24 = arith.constant 0.000000e+00 : f32
    %14 = vector.broadcast %cst_24 : f32 to vector<6x1x128xf32>
    %c0_25 = arith.constant 0 : index
    %c17_26 = arith.constant 17 : index
    %c0_27 = arith.constant 0 : index
    %15 = vector.load %arg8[%c0_25, %c17_26, %c0_27] : memref<6x18x128xf32, #tpu.memory_space<vmem>>, vector<6x1x128xf32>
    tpu.vector_store %arg8[%c0_25, %c17_26, %c0_27], %14 {strides = array<i32>} : memref<6x18x128xf32, #tpu.memory_space<vmem>>, vector<6x1x128xf32>,
    %c0_28 = arith.constant 0 : index
    %c0_29 = arith.constant 0 : index
    %c0_30 = arith.constant 0 : index
    %c0_31 = arith.constant 0 : index
    %16 = vector.load %arg1[%c0_28, %c0_29, %c0_30, %c0_31] : memref<1x4x8x32xf32, #tpu.memory_space<vmem>>, vector<1x4x1x32xf32>
    %17 = vector.shape_cast %16 : vector<1x4x1x32xf32> to vector<4x1x32xf32>
    %18 = vector.shape_cast %17 : vector<4x1x32xf32> to vector<4x1x32xf32>
    %19 = vector.broadcast %18 : vector<4x1x32xf32> to vector<4x2x32xf32>
    %c1 = arith.constant 1 : index
    %c1_32 = arith.constant 1 : index
    %c0_33 = arith.constant 0 : index
    %20 = vector.load %arg7[%c1, %c1_32, %c0_33] : memref<6x18x32xf32, #tpu.memory_space<vmem>>, vector<4x2x32xf32>
    tpu.vector_store %arg7[%c1, %c1_32, %c0_33], %19 {strides = array<i32>} : memref<6x18x32xf32, #tpu.memory_space<vmem>>, vector<4x2x32xf32>,
    %c0_34 = arith.constant 0 : index
    %c0_35 = arith.constant 0 : index
    %c1_36 = arith.constant 1 : index
    %c0_37 = arith.constant 0 : index
    %21 = vector.load %arg1[%c0_34, %c0_35, %c1_36, %c0_37] : memref<1x4x8x32xf32, #tpu.memory_space<vmem>>, vector<1x4x1x32xf32>
    %22 = vector.shape_cast %21 : vector<1x4x1x32xf32> to vector<4x1x32xf32>
    %23 = vector.shape_cast %22 : vector<4x1x32xf32> to vector<4x1x32xf32>
    %24 = vector.broadcast %23 : vector<4x1x32xf32> to vector<4x2x32xf32>
    %c1_38 = arith.constant 1 : index
    %c3 = arith.constant 3 : index
    %c0_39 = arith.constant 0 : index
    %25 = vector.load %arg7[%c1_38, %c3, %c0_39] : memref<6x18x32xf32, #tpu.memory_space<vmem>>, vector<4x2x32xf32>
    tpu.vector_store %arg7[%c1_38, %c3, %c0_39], %24 {strides = array<i32>} : memref<6x18x32xf32, #tpu.memory_space<vmem>>, vector<4x2x32xf32>,
    %c0_40 = arith.constant 0 : index
    %c0_41 = arith.constant 0 : index
    %c2 = arith.constant 2 : index
    %c0_42 = arith.constant 0 : index
    %26 = vector.load %arg1[%c0_40, %c0_41, %c2, %c0_42] : memref<1x4x8x32xf32, #tpu.memory_space<vmem>>, vector<1x4x1x32xf32>
    %27 = vector.shape_cast %26 : vector<1x4x1x32xf32> to vector<4x1x32xf32>
    %28 = vector.shape_cast %27 : vector<4x1x32xf32> to vector<4x1x32xf32>
    %29 = vector.broadcast %28 : vector<4x1x32xf32> to vector<4x2x32xf32>
    %c1_43 = arith.constant 1 : index
    %c5_44 = arith.constant 5 : index
    %c0_45 = arith.constant 0 : index
    %30 = vector.load %arg7[%c1_43, %c5_44, %c0_45] : memref<6x18x32xf32, #tpu.memory_space<vmem>>, vector<4x2x32xf32>
    tpu.vector_store %arg7[%c1_43, %c5_44, %c0_45], %29 {strides = array<i32>} : memref<6x18x32xf32, #tpu.memory_space<vmem>>, vector<4x2x32xf32>,
    %c0_46 = arith.constant 0 : index
    %c0_47 = arith.constant 0 : index
    %c3_48 = arith.constant 3 : index
    %c0_49 = arith.constant 0 : index
    %31 = vector.load %arg1[%c0_46, %c0_47, %c3_48, %c0_49] : memref<1x4x8x32xf32, #tpu.memory_space<vmem>>, vector<1x4x1x32xf32>
    %32 = vector.shape_cast %31 : vector<1x4x1x32xf32> to vector<4x1x32xf32>
    %33 = vector.shape_cast %32 : vector<4x1x32xf32> to vector<4x1x32xf32>
    %34 = vector.broadcast %33 : vector<4x1x32xf32> to vector<4x2x32xf32>
    %c1_50 = arith.constant 1 : index
    %c7 = arith.constant 7 : index
    %c0_51 = arith.constant 0 : index
    %35 = vector.load %arg7[%c1_50, %c7, %c0_51] : memref<6x18x32xf32, #tpu.memory_space<vmem>>, vector<4x2x32xf32>
    tpu.vector_store %arg7[%c1_50, %c7, %c0_51], %34 {strides = array<i32>} : memref<6x18x32xf32, #tpu.memory_space<vmem>>, vector<4x2x32xf32>,
    %c0_52 = arith.constant 0 : index
    %c0_53 = arith.constant 0 : index
    %c4 = arith.constant 4 : index
    %c0_54 = arith.constant 0 : index
    %36 = vector.load %arg1[%c0_52, %c0_53, %c4, %c0_54] : memref<1x4x8x32xf32, #tpu.memory_space<vmem>>, vector<1x4x1x32xf32>
    %37 = vector.shape_cast %36 : vector<1x4x1x32xf32> to vector<4x1x32xf32>
    %38 = vector.shape_cast %37 : vector<4x1x32xf32> to vector<4x1x32xf32>
    %39 = vector.broadcast %38 : vector<4x1x32xf32> to vector<4x2x32xf32>
    %c1_55 = arith.constant 1 : index
    %c9 = arith.constant 9 : index
    %c0_56 = arith.constant 0 : index
    %40 = vector.load %arg7[%c1_55, %c9, %c0_56] : memref<6x18x32xf32, #tpu.memory_space<vmem>>, vector<4x2x32xf32>
    tpu.vector_store %arg7[%c1_55, %c9, %c0_56], %39 {strides = array<i32>} : memref<6x18x32xf32, #tpu.memory_space<vmem>>, vector<4x2x32xf32>,
    %c0_57 = arith.constant 0 : index
    %c0_58 = arith.constant 0 : index
    %c5_59 = arith.constant 5 : index
    %c0_60 = arith.constant 0 : index
    %41 = vector.load %arg1[%c0_57, %c0_58, %c5_59, %c0_60] : memref<1x4x8x32xf32, #tpu.memory_space<vmem>>, vector<1x4x1x32xf32>
    %42 = vector.shape_cast %41 : vector<1x4x1x32xf32> to vector<4x1x32xf32>
    %43 = vector.shape_cast %42 : vector<4x1x32xf32> to vector<4x1x32xf32>
    %44 = vector.broadcast %43 : vector<4x1x32xf32> to vector<4x2x32xf32>
    %c1_61 = arith.constant 1 : index
    %c11 = arith.constant 11 : index
    %c0_62 = arith.constant 0 : index
    %45 = vector.load %arg7[%c1_61, %c11, %c0_62] : memref<6x18x32xf32, #tpu.memory_space<vmem>>, vector<4x2x32xf32>
    tpu.vector_store %arg7[%c1_61, %c11, %c0_62], %44 {strides = array<i32>} : memref<6x18x32xf32, #tpu.memory_space<vmem>>, vector<4x2x32xf32>,
    %c0_63 = arith.constant 0 : index
    %c0_64 = arith.constant 0 : index
    %c6 = arith.constant 6 : index
    %c0_65 = arith.constant 0 : index
    %46 = vector.load %arg1[%c0_63, %c0_64, %c6, %c0_65] : memref<1x4x8x32xf32, #tpu.memory_space<vmem>>, vector<1x4x1x32xf32>
    %47 = vector.shape_cast %46 : vector<1x4x1x32xf32> to vector<4x1x32xf32>
    %48 = vector.shape_cast %47 : vector<4x1x32xf32> to vector<4x1x32xf32>
    %49 = vector.broadcast %48 : vector<4x1x32xf32> to vector<4x2x32xf32>
    %c1_66 = arith.constant 1 : index
    %c13 = arith.constant 13 : index
    %c0_67 = arith.constant 0 : index
    %50 = vector.load %arg7[%c1_66, %c13, %c0_67] : memref<6x18x32xf32, #tpu.memory_space<vmem>>, vector<4x2x32xf32>
    tpu.vector_store %arg7[%c1_66, %c13, %c0_67], %49 {strides = array<i32>} : memref<6x18x32xf32, #tpu.memory_space<vmem>>, vector<4x2x32xf32>,
    %c0_68 = arith.constant 0 : index
    %c0_69 = arith.constant 0 : index
    %c7_70 = arith.constant 7 : index
    %c0_71 = arith.constant 0 : index
    %51 = vector.load %arg1[%c0_68, %c0_69, %c7_70, %c0_71] : memref<1x4x8x32xf32, #tpu.memory_space<vmem>>, vector<1x4x1x32xf32>
    %52 = vector.shape_cast %51 : vector<1x4x1x32xf32> to vector<4x1x32xf32>
    %53 = vector.shape_cast %52 : vector<4x1x32xf32> to vector<4x1x32xf32>
    %54 = vector.broadcast %53 : vector<4x1x32xf32> to vector<4x2x32xf32>
    %c1_72 = arith.constant 1 : index
    %c15 = arith.constant 15 : index
    %c0_73 = arith.constant 0 : index
    %55 = vector.load %arg7[%c1_72, %c15, %c0_73] : memref<6x18x32xf32, #tpu.memory_space<vmem>>, vector<4x2x32xf32>
    tpu.vector_store %arg7[%c1_72, %c15, %c0_73], %54 {strides = array<i32>} : memref<6x18x32xf32, #tpu.memory_space<vmem>>, vector<4x2x32xf32>,
    %c0_74 = arith.constant 0 : index
    %c0_75 = arith.constant 0 : index
    %c0_76 = arith.constant 0 : index
    %56 = vector.load %arg7[%c0_74, %c0_75, %c0_76] : memref<6x18x32xf32, #tpu.memory_space<vmem>>, vector<1x16x32xf32>
    %57 = vector.shape_cast %56 : vector<1x16x32xf32> to vector<16x32xf32>
    %c0_77 = arith.constant 0 : index
    %c0_78 = arith.constant 0 : index
    %58 = vector.load %arg9[%c0_77, %c0_78] : memref<64x288xf32, #tpu.memory_space<vmem>>, vector<16x32xf32>
    tpu.vector_store %arg9[%c0_77, %c0_78], %57 {strides = array<i32>} : memref<64x288xf32, #tpu.memory_space<vmem>>, vector<16x32xf32>,
    %c1_79 = arith.constant 1 : index
    %c0_80 = arith.constant 0 : index
    %c0_81 = arith.constant 0 : index
    %59 = vector.load %arg7[%c1_79, %c0_80, %c0_81] : memref<6x18x32xf32, #tpu.memory_space<vmem>>, vector<1x16x32xf32>
    %60 = vector.shape_cast %59 : vector<1x16x32xf32> to vector<16x32xf32>
    %c16 = arith.constant 16 : index
    %c0_82 = arith.constant 0 : index
    %61 = vector.load %arg9[%c16, %c0_82] : memref<64x288xf32, #tpu.memory_space<vmem>>, vector<16x32xf32>
    tpu.vector_store %arg9[%c16, %c0_82], %60 {strides = array<i32>} : memref<64x288xf32, #tpu.memory_space<vmem>>, vector<16x32xf32>,
    %c2_83 = arith.constant 2 : index
    %c0_84 = arith.constant 0 : index
    %c0_85 = arith.constant 0 : index
    %62 = vector.load %arg7[%c2_83, %c0_84, %c0_85] : memref<6x18x32xf32, #tpu.memory_space<vmem>>, vector<1x16x32xf32>
    %63 = vector.shape_cast %62 : vector<1x16x32xf32> to vector<16x32xf32>
    %c32 = arith.constant 32 : index
    %c0_86 = arith.constant 0 : index
    %64 = vector.load %arg9[%c32, %c0_86] : memref<64x288xf32, #tpu.memory_space<vmem>>, vector<16x32xf32>
    tpu.vector_store %arg9[%c32, %c0_86], %63 {strides = array<i32>} : memref<64x288xf32, #tpu.memory_space<vmem>>, vector<16x32xf32>,
    %c3_87 = arith.constant 3 : index
    %c0_88 = arith.constant 0 : index
    %c0_89 = arith.constant 0 : index
    %65 = vector.load %arg7[%c3_87, %c0_88, %c0_89] : memref<6x18x32xf32, #tpu.memory_space<vmem>>, vector<1x16x32xf32>
    %66 = vector.shape_cast %65 : vector<1x16x32xf32> to vector<16x32xf32>
    %c48 = arith.constant 48 : index
    %c0_90 = arith.constant 0 : index
    %67 = vector.load %arg9[%c48, %c0_90] : memref<64x288xf32, #tpu.memory_space<vmem>>, vector<16x32xf32>
    tpu.vector_store %arg9[%c48, %c0_90], %66 {strides = array<i32>} : memref<64x288xf32, #tpu.memory_space<vmem>>, vector<16x32xf32>,
    %c0_91 = arith.constant 0 : index
    %c1_92 = arith.constant 1 : index
    %c0_93 = arith.constant 0 : index
    %68 = vector.load %arg7[%c0_91, %c1_92, %c0_93] : memref<6x18x32xf32, #tpu.memory_space<vmem>>, vector<1x16x32xf32>
    %69 = vector.shape_cast %68 : vector<1x16x32xf32> to vector<16x32xf32>
    %c0_94 = arith.constant 0 : index
    %c32_95 = arith.constant 32 : index
    %70 = vector.load %arg9[%c0_94, %c32_95] : memref<64x288xf32, #tpu.memory_space<vmem>>, vector<16x32xf32>
    tpu.vector_store %arg9[%c0_94, %c32_95], %69 {strides = array<i32>} : memref<64x288xf32, #tpu.memory_space<vmem>>, vector<16x32xf32>,
    %c1_96 = arith.constant 1 : index
    %c1_97 = arith.constant 1 : index
    %c0_98 = arith.constant 0 : index
    %71 = vector.load %arg7[%c1_96, %c1_97, %c0_98] : memref<6x18x32xf32, #tpu.memory_space<vmem>>, vector<1x16x32xf32>
    %72 = vector.shape_cast %71 : vector<1x16x32xf32> to vector<16x32xf32>
    %c16_99 = arith.constant 16 : index
    %c32_100 = arith.constant 32 : index
    %73 = vector.load %arg9[%c16_99, %c32_100] : memref<64x288xf32, #tpu.memory_space<vmem>>, vector<16x32xf32>
    tpu.vector_store %arg9[%c16_99, %c32_100], %72 {strides = array<i32>} : memref<64x288xf32, #tpu.memory_space<vmem>>, vector<16x32xf32>,
    %c2_101 = arith.constant 2 : index
    %c1_102 = arith.constant 1 : index
    %c0_103 = arith.constant 0 : index
    %74 = vector.load %arg7[%c2_101, %c1_102, %c0_103] : memref<6x18x32xf32, #tpu.memory_space<vmem>>, vector<1x16x32xf32>
    %75 = vector.shape_cast %74 : vector<1x16x32xf32> to vector<16x32xf32>
    %c32_104 = arith.constant 32 : index
    %c32_105 = arith.constant 32 : index
    %76 = vector.load %arg9[%c32_104, %c32_105] : memref<64x288xf32, #tpu.memory_space<vmem>>, vector<16x32xf32>
    tpu.vector_store %arg9[%c32_104, %c32_105], %75 {strides = array<i32>} : memref<64x288xf32, #tpu.memory_space<vmem>>, vector<16x32xf32>,
    %c3_106 = arith.constant 3 : index
    %c1_107 = arith.constant 1 : index
    %c0_108 = arith.constant 0 : index
    %77 = vector.load %arg7[%c3_106, %c1_107, %c0_108] : memref<6x18x32xf32, #tpu.memory_space<vmem>>, vector<1x16x32xf32>
    %78 = vector.shape_cast %77 : vector<1x16x32xf32> to vector<16x32xf32>
    %c48_109 = arith.constant 48 : index
    %c32_110 = arith.constant 32 : index
    %79 = vector.load %arg9[%c48_109, %c32_110] : memref<64x288xf32, #tpu.memory_space<vmem>>, vector<16x32xf32>
    tpu.vector_store %arg9[%c48_109, %c32_110], %78 {strides = array<i32>} : memref<64x288xf32, #tpu.memory_space<vmem>>, vector<16x32xf32>,
    %c0_111 = arith.constant 0 : index
    %c2_112 = arith.constant 2 : index
    %c0_113 = arith.constant 0 : index
    %80 = vector.load %arg7[%c0_111, %c2_112, %c0_113] : memref<6x18x32xf32, #tpu.memory_space<vmem>>, vector<1x16x32xf32>
    %81 = vector.shape_cast %80 : vector<1x16x32xf32> to vector<16x32xf32>
    %c0_114 = arith.constant 0 : index
    %c64 = arith.constant 64 : index
    %82 = vector.load %arg9[%c0_114, %c64] : memref<64x288xf32, #tpu.memory_space<vmem>>, vector<16x32xf32>
    tpu.vector_store %arg9[%c0_114, %c64], %81 {strides = array<i32>} : memref<64x288xf32, #tpu.memory_space<vmem>>, vector<16x32xf32>,
    %c1_115 = arith.constant 1 : index
    %c2_116 = arith.constant 2 : index
    %c0_117 = arith.constant 0 : index
    %83 = vector.load %arg7[%c1_115, %c2_116, %c0_117] : memref<6x18x32xf32, #tpu.memory_space<vmem>>, vector<1x16x32xf32>
    %84 = vector.shape_cast %83 : vector<1x16x32xf32> to vector<16x32xf32>
    %c16_118 = arith.constant 16 : index
    %c64_119 = arith.constant 64 : index
    %85 = vector.load %arg9[%c16_118, %c64_119] : memref<64x288xf32, #tpu.memory_space<vmem>>, vector<16x32xf32>
    tpu.vector_store %arg9[%c16_118, %c64_119], %84 {strides = array<i32>} : memref<64x288xf32, #tpu.memory_space<vmem>>, vector<16x32xf32>,
    %c2_120 = arith.constant 2 : index
    %c2_121 = arith.constant 2 : index
    %c0_122 = arith.constant 0 : index
    %86 = vector.load %arg7[%c2_120, %c2_121, %c0_122] : memref<6x18x32xf32, #tpu.memory_space<vmem>>, vector<1x16x32xf32>
    %87 = vector.shape_cast %86 : vector<1x16x32xf32> to vector<16x32xf32>
    %c32_123 = arith.constant 32 : index
    %c64_124 = arith.constant 64 : index
    %88 = vector.load %arg9[%c32_123, %c64_124] : memref<64x288xf32, #tpu.memory_space<vmem>>, vector<16x32xf32>
    tpu.vector_store %arg9[%c32_123, %c64_124], %87 {strides = array<i32>} : memref<64x288xf32, #tpu.memory_space<vmem>>, vector<16x32xf32>,
    %c3_125 = arith.constant 3 : index
    %c2_126 = arith.constant 2 : index
    %c0_127 = arith.constant 0 : index
    %89 = vector.load %arg7[%c3_125, %c2_126, %c0_127] : memref<6x18x32xf32, #tpu.memory_space<vmem>>, vector<1x16x32xf32>
    %90 = vector.shape_cast %89 : vector<1x16x32xf32> to vector<16x32xf32>
    %c48_128 = arith.constant 48 : index
    %c64_129 = arith.constant 64 : index
    %91 = vector.load %arg9[%c48_128, %c64_129] : memref<64x288xf32, #tpu.memory_space<vmem>>, vector<16x32xf32>
    tpu.vector_store %arg9[%c48_128, %c64_129], %90 {strides = array<i32>} : memref<64x288xf32, #tpu.memory_space<vmem>>, vector<16x32xf32>,
    %c1_130 = arith.constant 1 : index
    %c0_131 = arith.constant 0 : index
    %c0_132 = arith.constant 0 : index
    %92 = vector.load %arg7[%c1_130, %c0_131, %c0_132] : memref<6x18x32xf32, #tpu.memory_space<vmem>>, vector<1x16x32xf32>
    %93 = vector.shape_cast %92 : vector<1x16x32xf32> to vector<16x32xf32>
    %c0_133 = arith.constant 0 : index
    %c96 = arith.constant 96 : index
    %94 = vector.load %arg9[%c0_133, %c96] : memref<64x288xf32, #tpu.memory_space<vmem>>, vector<16x32xf32>
    tpu.vector_store %arg9[%c0_133, %c96], %93 {strides = array<i32>} : memref<64x288xf32, #tpu.memory_space<vmem>>, vector<16x32xf32>,
    %c2_134 = arith.constant 2 : index
    %c0_135 = arith.constant 0 : index
    %c0_136 = arith.constant 0 : index
    %95 = vector.load %arg7[%c2_134, %c0_135, %c0_136] : memref<6x18x32xf32, #tpu.memory_space<vmem>>, vector<1x16x32xf32>
    %96 = vector.shape_cast %95 : vector<1x16x32xf32> to vector<16x32xf32>
    %c16_137 = arith.constant 16 : index
    %c96_138 = arith.constant 96 : index
    %97 = vector.load %arg9[%c16_137, %c96_138] : memref<64x288xf32, #tpu.memory_space<vmem>>, vector<16x32xf32>
    tpu.vector_store %arg9[%c16_137, %c96_138], %96 {strides = array<i32>} : memref<64x288xf32, #tpu.memory_space<vmem>>, vector<16x32xf32>,
    %c3_139 = arith.constant 3 : index
    %c0_140 = arith.constant 0 : index
    %c0_141 = arith.constant 0 : index
    %98 = vector.load %arg7[%c3_139, %c0_140, %c0_141] : memref<6x18x32xf32, #tpu.memory_space<vmem>>, vector<1x16x32xf32>
    %99 = vector.shape_cast %98 : vector<1x16x32xf32> to vector<16x32xf32>
    %c32_142 = arith.constant 32 : index
    %c96_143 = arith.constant 96 : index
    %100 = vector.load %arg9[%c32_142, %c96_143] : memref<64x288xf32, #tpu.memory_space<vmem>>, vector<16x32xf32>
    tpu.vector_store %arg9[%c32_142, %c96_143], %99 {strides = array<i32>} : memref<64x288xf32, #tpu.memory_space<vmem>>, vector<16x32xf32>,
    %c4_144 = arith.constant 4 : index
    %c0_145 = arith.constant 0 : index
    %c0_146 = arith.constant 0 : index
    %101 = vector.load %arg7[%c4_144, %c0_145, %c0_146] : memref<6x18x32xf32, #tpu.memory_space<vmem>>, vector<1x16x32xf32>
    %102 = vector.shape_cast %101 : vector<1x16x32xf32> to vector<16x32xf32>
    %c48_147 = arith.constant 48 : index
    %c96_148 = arith.constant 96 : index
    %103 = vector.load %arg9[%c48_147, %c96_148] : memref<64x288xf32, #tpu.memory_space<vmem>>, vector<16x32xf32>
    tpu.vector_store %arg9[%c48_147, %c96_148], %102 {strides = array<i32>} : memref<64x288xf32, #tpu.memory_space<vmem>>, vector<16x32xf32>,
    %c1_149 = arith.constant 1 : index
    %c1_150 = arith.constant 1 : index
    %c0_151 = arith.constant 0 : index
    %104 = vector.load %arg7[%c1_149, %c1_150, %c0_151] : memref<6x18x32xf32, #tpu.memory_space<vmem>>, vector<1x16x32xf32>
    %105 = vector.shape_cast %104 : vector<1x16x32xf32> to vector<16x32xf32>
    %c0_152 = arith.constant 0 : index
    %c128 = arith.constant 128 : index
    %106 = vector.load %arg9[%c0_152, %c128] : memref<64x288xf32, #tpu.memory_space<vmem>>, vector<16x32xf32>
    tpu.vector_store %arg9[%c0_152, %c128], %105 {strides = array<i32>} : memref<64x288xf32, #tpu.memory_space<vmem>>, vector<16x32xf32>,
    %c2_153 = arith.constant 2 : index
    %c1_154 = arith.constant 1 : index
    %c0_155 = arith.constant 0 : index
    %107 = vector.load %arg7[%c2_153, %c1_154, %c0_155] : memref<6x18x32xf32, #tpu.memory_space<vmem>>, vector<1x16x32xf32>
    %108 = vector.shape_cast %107 : vector<1x16x32xf32> to vector<16x32xf32>
    %c16_156 = arith.constant 16 : index
    %c128_157 = arith.constant 128 : index
    %109 = vector.load %arg9[%c16_156, %c128_157] : memref<64x288xf32, #tpu.memory_space<vmem>>, vector<16x32xf32>
    tpu.vector_store %arg9[%c16_156, %c128_157], %108 {strides = array<i32>} : memref<64x288xf32, #tpu.memory_space<vmem>>, vector<16x32xf32>,
    %c3_158 = arith.constant 3 : index
    %c1_159 = arith.constant 1 : index
    %c0_160 = arith.constant 0 : index
    %110 = vector.load %arg7[%c3_158, %c1_159, %c0_160] : memref<6x18x32xf32, #tpu.memory_space<vmem>>, vector<1x16x32xf32>
    %111 = vector.shape_cast %110 : vector<1x16x32xf32> to vector<16x32xf32>
    %c32_161 = arith.constant 32 : index
    %c128_162 = arith.constant 128 : index
    %112 = vector.load %arg9[%c32_161, %c128_162] : memref<64x288xf32, #tpu.memory_space<vmem>>, vector<16x32xf32>
    tpu.vector_store %arg9[%c32_161, %c128_162], %111 {strides = array<i32>} : memref<64x288xf32, #tpu.memory_space<vmem>>, vector<16x32xf32>,
    %c4_163 = arith.constant 4 : index
    %c1_164 = arith.constant 1 : index
    %c0_165 = arith.constant 0 : index
    %113 = vector.load %arg7[%c4_163, %c1_164, %c0_165] : memref<6x18x32xf32, #tpu.memory_space<vmem>>, vector<1x16x32xf32>
    %114 = vector.shape_cast %113 : vector<1x16x32xf32> to vector<16x32xf32>
    %c48_166 = arith.constant 48 : index
    %c128_167 = arith.constant 128 : index
    %115 = vector.load %arg9[%c48_166, %c128_167] : memref<64x288xf32, #tpu.memory_space<vmem>>, vector<16x32xf32>
    tpu.vector_store %arg9[%c48_166, %c128_167], %114 {strides = array<i32>} : memref<64x288xf32, #tpu.memory_space<vmem>>, vector<16x32xf32>,
    %c1_168 = arith.constant 1 : index
    %c2_169 = arith.constant 2 : index
    %c0_170 = arith.constant 0 : index
    %116 = vector.load %arg7[%c1_168, %c2_169, %c0_170] : memref<6x18x32xf32, #tpu.memory_space<vmem>>, vector<1x16x32xf32>
    %117 = vector.shape_cast %116 : vector<1x16x32xf32> to vector<16x32xf32>
    %c0_171 = arith.constant 0 : index
    %c160 = arith.constant 160 : index
    %118 = vector.load %arg9[%c0_171, %c160] : memref<64x288xf32, #tpu.memory_space<vmem>>, vector<16x32xf32>
    tpu.vector_store %arg9[%c0_171, %c160], %117 {strides = array<i32>} : memref<64x288xf32, #tpu.memory_space<vmem>>, vector<16x32xf32>,
    %c2_172 = arith.constant 2 : index
    %c2_173 = arith.constant 2 : index
    %c0_174 = arith.constant 0 : index
    %119 = vector.load %arg7[%c2_172, %c2_173, %c0_174] : memref<6x18x32xf32, #tpu.memory_space<vmem>>, vector<1x16x32xf32>
    %120 = vector.shape_cast %119 : vector<1x16x32xf32> to vector<16x32xf32>
    %c16_175 = arith.constant 16 : index
    %c160_176 = arith.constant 160 : index
    %121 = vector.load %arg9[%c16_175, %c160_176] : memref<64x288xf32, #tpu.memory_space<vmem>>, vector<16x32xf32>
    tpu.vector_store %arg9[%c16_175, %c160_176], %120 {strides = array<i32>} : memref<64x288xf32, #tpu.memory_space<vmem>>, vector<16x32xf32>,
    %c3_177 = arith.constant 3 : index
    %c2_178 = arith.constant 2 : index
    %c0_179 = arith.constant 0 : index
    %122 = vector.load %arg7[%c3_177, %c2_178, %c0_179] : memref<6x18x32xf32, #tpu.memory_space<vmem>>, vector<1x16x32xf32>
    %123 = vector.shape_cast %122 : vector<1x16x32xf32> to vector<16x32xf32>
    %c32_180 = arith.constant 32 : index
    %c160_181 = arith.constant 160 : index
    %124 = vector.load %arg9[%c32_180, %c160_181] : memref<64x288xf32, #tpu.memory_space<vmem>>, vector<16x32xf32>
    tpu.vector_store %arg9[%c32_180, %c160_181], %123 {strides = array<i32>} : memref<64x288xf32, #tpu.memory_space<vmem>>, vector<16x32xf32>,
    %c4_182 = arith.constant 4 : index
    %c2_183 = arith.constant 2 : index
    %c0_184 = arith.constant 0 : index
    %125 = vector.load %arg7[%c4_182, %c2_183, %c0_184] : memref<6x18x32xf32, #tpu.memory_space<vmem>>, vector<1x16x32xf32>
    %126 = vector.shape_cast %125 : vector<1x16x32xf32> to vector<16x32xf32>
    %c48_185 = arith.constant 48 : index
    %c160_186 = arith.constant 160 : index
    %127 = vector.load %arg9[%c48_185, %c160_186] : memref<64x288xf32, #tpu.memory_space<vmem>>, vector<16x32xf32>
    tpu.vector_store %arg9[%c48_185, %c160_186], %126 {strides = array<i32>} : memref<64x288xf32, #tpu.memory_space<vmem>>, vector<16x32xf32>,
    %c2_187 = arith.constant 2 : index
    %c0_188 = arith.constant 0 : index
    %c0_189 = arith.constant 0 : index
    %128 = vector.load %arg7[%c2_187, %c0_188, %c0_189] : memref<6x18x32xf32, #tpu.memory_space<vmem>>, vector<1x16x32xf32>
    %129 = vector.shape_cast %128 : vector<1x16x32xf32> to vector<16x32xf32>
    %c0_190 = arith.constant 0 : index
    %c192 = arith.constant 192 : index
    %130 = vector.load %arg9[%c0_190, %c192] : memref<64x288xf32, #tpu.memory_space<vmem>>, vector<16x32xf32>
    tpu.vector_store %arg9[%c0_190, %c192], %129 {strides = array<i32>} : memref<64x288xf32, #tpu.memory_space<vmem>>, vector<16x32xf32>,
    %c3_191 = arith.constant 3 : index
    %c0_192 = arith.constant 0 : index
    %c0_193 = arith.constant 0 : index
    %131 = vector.load %arg7[%c3_191, %c0_192, %c0_193] : memref<6x18x32xf32, #tpu.memory_space<vmem>>, vector<1x16x32xf32>
    %132 = vector.shape_cast %131 : vector<1x16x32xf32> to vector<16x32xf32>
    %c16_194 = arith.constant 16 : index
    %c192_195 = arith.constant 192 : index
    %133 = vector.load %arg9[%c16_194, %c192_195] : memref<64x288xf32, #tpu.memory_space<vmem>>, vector<16x32xf32>
    tpu.vector_store %arg9[%c16_194, %c192_195], %132 {strides = array<i32>} : memref<64x288xf32, #tpu.memory_space<vmem>>, vector<16x32xf32>,
    %c4_196 = arith.constant 4 : index
    %c0_197 = arith.constant 0 : index
    %c0_198 = arith.constant 0 : index
    %134 = vector.load %arg7[%c4_196, %c0_197, %c0_198] : memref<6x18x32xf32, #tpu.memory_space<vmem>>, vector<1x16x32xf32>
    %135 = vector.shape_cast %134 : vector<1x16x32xf32> to vector<16x32xf32>
    %c32_199 = arith.constant 32 : index
    %c192_200 = arith.constant 192 : index
    %136 = vector.load %arg9[%c32_199, %c192_200] : memref<64x288xf32, #tpu.memory_space<vmem>>, vector<16x32xf32>
    tpu.vector_store %arg9[%c32_199, %c192_200], %135 {strides = array<i32>} : memref<64x288xf32, #tpu.memory_space<vmem>>, vector<16x32xf32>,
    %c5_201 = arith.constant 5 : index
    %c0_202 = arith.constant 0 : index
    %c0_203 = arith.constant 0 : index
    %137 = vector.load %arg7[%c5_201, %c0_202, %c0_203] : memref<6x18x32xf32, #tpu.memory_space<vmem>>, vector<1x16x32xf32>
    %138 = vector.shape_cast %137 : vector<1x16x32xf32> to vector<16x32xf32>
    %c48_204 = arith.constant 48 : index
    %c192_205 = arith.constant 192 : index
    %139 = vector.load %arg9[%c48_204, %c192_205] : memref<64x288xf32, #tpu.memory_space<vmem>>, vector<16x32xf32>
    tpu.vector_store %arg9[%c48_204, %c192_205], %138 {strides = array<i32>} : memref<64x288xf32, #tpu.memory_space<vmem>>, vector<16x32xf32>,
    %c2_206 = arith.constant 2 : index
    %c1_207 = arith.constant 1 : index
    %c0_208 = arith.constant 0 : index
    %140 = vector.load %arg7[%c2_206, %c1_207, %c0_208] : memref<6x18x32xf32, #tpu.memory_space<vmem>>, vector<1x16x32xf32>
    %141 = vector.shape_cast %140 : vector<1x16x32xf32> to vector<16x32xf32>
    %c0_209 = arith.constant 0 : index
    %c224 = arith.constant 224 : index
    %142 = vector.load %arg9[%c0_209, %c224] : memref<64x288xf32, #tpu.memory_space<vmem>>, vector<16x32xf32>
    tpu.vector_store %arg9[%c0_209, %c224], %141 {strides = array<i32>} : memref<64x288xf32, #tpu.memory_space<vmem>>, vector<16x32xf32>,
    %c3_210 = arith.constant 3 : index
    %c1_211 = arith.constant 1 : index
    %c0_212 = arith.constant 0 : index
    %143 = vector.load %arg7[%c3_210, %c1_211, %c0_212] : memref<6x18x32xf32, #tpu.memory_space<vmem>>, vector<1x16x32xf32>
    %144 = vector.shape_cast %143 : vector<1x16x32xf32> to vector<16x32xf32>
    %c16_213 = arith.constant 16 : index
    %c224_214 = arith.constant 224 : index
    %145 = vector.load %arg9[%c16_213, %c224_214] : memref<64x288xf32, #tpu.memory_space<vmem>>, vector<16x32xf32>
    tpu.vector_store %arg9[%c16_213, %c224_214], %144 {strides = array<i32>} : memref<64x288xf32, #tpu.memory_space<vmem>>, vector<16x32xf32>,
    %c4_215 = arith.constant 4 : index
    %c1_216 = arith.constant 1 : index
    %c0_217 = arith.constant 0 : index
    %146 = vector.load %arg7[%c4_215, %c1_216, %c0_217] : memref<6x18x32xf32, #tpu.memory_space<vmem>>, vector<1x16x32xf32>
    %147 = vector.shape_cast %146 : vector<1x16x32xf32> to vector<16x32xf32>
    %c32_218 = arith.constant 32 : index
    %c224_219 = arith.constant 224 : index
    %148 = vector.load %arg9[%c32_218, %c224_219] : memref<64x288xf32, #tpu.memory_space<vmem>>, vector<16x32xf32>
    tpu.vector_store %arg9[%c32_218, %c224_219], %147 {strides = array<i32>} : memref<64x288xf32, #tpu.memory_space<vmem>>, vector<16x32xf32>,
    %c5_220 = arith.constant 5 : index
    %c1_221 = arith.constant 1 : index
    %c0_222 = arith.constant 0 : index
    %149 = vector.load %arg7[%c5_220, %c1_221, %c0_222] : memref<6x18x32xf32, #tpu.memory_space<vmem>>, vector<1x16x32xf32>
    %150 = vector.shape_cast %149 : vector<1x16x32xf32> to vector<16x32xf32>
    %c48_223 = arith.constant 48 : index
    %c224_224 = arith.constant 224 : index
    %151 = vector.load %arg9[%c48_223, %c224_224] : memref<64x288xf32, #tpu.memory_space<vmem>>, vector<16x32xf32>
    tpu.vector_store %arg9[%c48_223, %c224_224], %150 {strides = array<i32>} : memref<64x288xf32, #tpu.memory_space<vmem>>, vector<16x32xf32>,
    %c2_225 = arith.constant 2 : index
    %c2_226 = arith.constant 2 : index
    %c0_227 = arith.constant 0 : index
    %152 = vector.load %arg7[%c2_225, %c2_226, %c0_227] : memref<6x18x32xf32, #tpu.memory_space<vmem>>, vector<1x16x32xf32>
    %153 = vector.shape_cast %152 : vector<1x16x32xf32> to vector<16x32xf32>
    %c0_228 = arith.constant 0 : index
    %c256 = arith.constant 256 : index
    %154 = vector.load %arg9[%c0_228, %c256] : memref<64x288xf32, #tpu.memory_space<vmem>>, vector<16x32xf32>
    tpu.vector_store %arg9[%c0_228, %c256], %153 {strides = array<i32>} : memref<64x288xf32, #tpu.memory_space<vmem>>, vector<16x32xf32>,
    %c3_229 = arith.constant 3 : index
    %c2_230 = arith.constant 2 : index
    %c0_231 = arith.constant 0 : index
    %155 = vector.load %arg7[%c3_229, %c2_230, %c0_231] : memref<6x18x32xf32, #tpu.memory_space<vmem>>, vector<1x16x32xf32>
    %156 = vector.shape_cast %155 : vector<1x16x32xf32> to vector<16x32xf32>
    %c16_232 = arith.constant 16 : index
    %c256_233 = arith.constant 256 : index
    %157 = vector.load %arg9[%c16_232, %c256_233] : memref<64x288xf32, #tpu.memory_space<vmem>>, vector<16x32xf32>
    tpu.vector_store %arg9[%c16_232, %c256_233], %156 {strides = array<i32>} : memref<64x288xf32, #tpu.memory_space<vmem>>, vector<16x32xf32>,
    %c4_234 = arith.constant 4 : index
    %c2_235 = arith.constant 2 : index
    %c0_236 = arith.constant 0 : index
    %158 = vector.load %arg7[%c4_234, %c2_235, %c0_236] : memref<6x18x32xf32, #tpu.memory_space<vmem>>, vector<1x16x32xf32>
    %159 = vector.shape_cast %158 : vector<1x16x32xf32> to vector<16x32xf32>
    %c32_237 = arith.constant 32 : index
    %c256_238 = arith.constant 256 : index
    %160 = vector.load %arg9[%c32_237, %c256_238] : memref<64x288xf32, #tpu.memory_space<vmem>>, vector<16x32xf32>
    tpu.vector_store %arg9[%c32_237, %c256_238], %159 {strides = array<i32>} : memref<64x288xf32, #tpu.memory_space<vmem>>, vector<16x32xf32>,
    %c5_239 = arith.constant 5 : index
    %c2_240 = arith.constant 2 : index
    %c0_241 = arith.constant 0 : index
    %161 = vector.load %arg7[%c5_239, %c2_240, %c0_241] : memref<6x18x32xf32, #tpu.memory_space<vmem>>, vector<1x16x32xf32>
    %162 = vector.shape_cast %161 : vector<1x16x32xf32> to vector<16x32xf32>
    %c48_242 = arith.constant 48 : index
    %c256_243 = arith.constant 256 : index
    %163 = vector.load %arg9[%c48_242, %c256_243] : memref<64x288xf32, #tpu.memory_space<vmem>>, vector<16x32xf32>
    tpu.vector_store %arg9[%c48_242, %c256_243], %162 {strides = array<i32>} : memref<64x288xf32, #tpu.memory_space<vmem>>, vector<16x32xf32>,
    %c0_244 = arith.constant 0 : index
    %c0_245 = arith.constant 0 : index
    %164 = vector.load %arg9[%c0_244, %c0_245] : memref<64x288xf32, #tpu.memory_space<vmem>>, vector<64x288xf32>
    %c0_246 = arith.constant 0 : index
    %c0_247 = arith.constant 0 : index
    %165 = vector.load %arg2[%c0_246, %c0_247] : memref<288x128xf32, #tpu.memory_space<vmem>>, vector<288x128xf32>
    %cst_248 = arith.constant dense<0.000000e+00> : vector<64x128xf32>
    %166 = tpu.matmul %164, %165, %cst_248 {dimension_numbers = #tpu.dot_dimension_numbers<[1], [0], [0], [1], [0, 0, 1, 1], [], []>} : vector<64x288xf32>, vector<288x128xf32>, vector<64x128xf32> -> vector<64x128xf32>
    %c0_249 = arith.constant 0 : index
    %c0_250 = arith.constant 0 : index
    %167 = vector.load %arg3[%c0_249, %c0_250] : memref<1x128xf32, #tpu.memory_space<vmem>>, vector<1x128xf32>
    %168 = vector.broadcast %167 : vector<1x128xf32> to vector<64x128xf32>
    %169 = arith.addf %166, %168 : vector<64x128xf32>
    %cst_251 = arith.constant 0.000000e+00 : f32
    %170 = vector.broadcast %cst_251 : f32 to vector<64x128xf32>
    %171 = arith.maximumf %169, %170 : vector<64x128xf32>
    %172 = vector.extract_strided_slice %171 {offsets = [0, 0], sizes = [16, 128], strides = [1, 1]} : vector<64x128xf32> to vector<16x128xf32>
    %c1_252 = arith.constant 1 : index
    %c1_253 = arith.constant 1 : index
    %c0_254 = arith.constant 0 : index
    %173 = vector.load %arg8[%c1_252, %c1_253, %c0_254] : memref<6x18x128xf32, #tpu.memory_space<vmem>>, vector<1x16x128xf32>
    %174 = vector.shape_cast %173 : vector<1x16x128xf32> to vector<16x128xf32>
    %175 = vector.shape_cast %172 : vector<16x128xf32> to vector<1x16x128xf32>
    tpu.vector_store %arg8[%c1_252, %c1_253, %c0_254], %175 {strides = array<i32>} : memref<6x18x128xf32, #tpu.memory_space<vmem>>, vector<1x16x128xf32>,
    %176 = vector.extract_strided_slice %171 {offsets = [16, 0], sizes = [16, 128], strides = [1, 1]} : vector<64x128xf32> to vector<16x128xf32>
    %c2_255 = arith.constant 2 : index
    %c1_256 = arith.constant 1 : index
    %c0_257 = arith.constant 0 : index
    %177 = vector.load %arg8[%c2_255, %c1_256, %c0_257] : memref<6x18x128xf32, #tpu.memory_space<vmem>>, vector<1x16x128xf32>
    %178 = vector.shape_cast %177 : vector<1x16x128xf32> to vector<16x128xf32>
    %179 = vector.shape_cast %176 : vector<16x128xf32> to vector<1x16x128xf32>
    tpu.vector_store %arg8[%c2_255, %c1_256, %c0_257], %179 {strides = array<i32>} : memref<6x18x128xf32, #tpu.memory_space<vmem>>, vector<1x16x128xf32>,
    %180 = vector.extract_strided_slice %171 {offsets = [32, 0], sizes = [16, 128], strides = [1, 1]} : vector<64x128xf32> to vector<16x128xf32>
    %c3_258 = arith.constant 3 : index
    %c1_259 = arith.constant 1 : index
    %c0_260 = arith.constant 0 : index
    %181 = vector.load %arg8[%c3_258, %c1_259, %c0_260] : memref<6x18x128xf32, #tpu.memory_space<vmem>>, vector<1x16x128xf32>
    %182 = vector.shape_cast %181 : vector<1x16x128xf32> to vector<16x128xf32>
    %183 = vector.shape_cast %180 : vector<16x128xf32> to vector<1x16x128xf32>
    tpu.vector_store %arg8[%c3_258, %c1_259, %c0_260], %183 {strides = array<i32>} : memref<6x18x128xf32, #tpu.memory_space<vmem>>, vector<1x16x128xf32>,
    %184 = vector.extract_strided_slice %171 {offsets = [48, 0], sizes = [16, 128], strides = [1, 1]} : vector<64x128xf32> to vector<16x128xf32>
    %c4_261 = arith.constant 4 : index
    %c1_262 = arith.constant 1 : index
    %c0_263 = arith.constant 0 : index
    %185 = vector.load %arg8[%c4_261, %c1_262, %c0_263] : memref<6x18x128xf32, #tpu.memory_space<vmem>>, vector<1x16x128xf32>
    %186 = vector.shape_cast %185 : vector<1x16x128xf32> to vector<16x128xf32>
    %187 = vector.shape_cast %184 : vector<16x128xf32> to vector<1x16x128xf32>
    tpu.vector_store %arg8[%c4_261, %c1_262, %c0_263], %187 {strides = array<i32>} : memref<6x18x128xf32, #tpu.memory_space<vmem>>, vector<1x16x128xf32>,
    %c0_264 = arith.constant 0 : index
    %c0_265 = arith.constant 0 : index
    %c0_266 = arith.constant 0 : index
    %188 = vector.load %arg8[%c0_264, %c0_265, %c0_266] : memref<6x18x128xf32, #tpu.memory_space<vmem>>, vector<1x16x128xf32>
    %189 = vector.shape_cast %188 : vector<1x16x128xf32> to vector<16x128xf32>
    %c0_267 = arith.constant 0 : index
    %c0_268 = arith.constant 0 : index
    %190 = vector.load %arg10[%c0_267, %c0_268] : memref<64x1184xf32, #tpu.memory_space<vmem>>, vector<16x128xf32>
    tpu.vector_store %arg10[%c0_267, %c0_268], %189 {strides = array<i32>} : memref<64x1184xf32, #tpu.memory_space<vmem>>, vector<16x128xf32>,
    %c1_269 = arith.constant 1 : index
    %c0_270 = arith.constant 0 : index
    %c0_271 = arith.constant 0 : index
    %191 = vector.load %arg8[%c1_269, %c0_270, %c0_271] : memref<6x18x128xf32, #tpu.memory_space<vmem>>, vector<1x16x128xf32>
    %192 = vector.shape_cast %191 : vector<1x16x128xf32> to vector<16x128xf32>
    %c16_272 = arith.constant 16 : index
    %c0_273 = arith.constant 0 : index
    %193 = vector.load %arg10[%c16_272, %c0_273] : memref<64x1184xf32, #tpu.memory_space<vmem>>, vector<16x128xf32>
    tpu.vector_store %arg10[%c16_272, %c0_273], %192 {strides = array<i32>} : memref<64x1184xf32, #tpu.memory_space<vmem>>, vector<16x128xf32>,
    %c2_274 = arith.constant 2 : index
    %c0_275 = arith.constant 0 : index
    %c0_276 = arith.constant 0 : index
    %194 = vector.load %arg8[%c2_274, %c0_275, %c0_276] : memref<6x18x128xf32, #tpu.memory_space<vmem>>, vector<1x16x128xf32>
    %195 = vector.shape_cast %194 : vector<1x16x128xf32> to vector<16x128xf32>
    %c32_277 = arith.constant 32 : index
    %c0_278 = arith.constant 0 : index
    %196 = vector.load %arg10[%c32_277, %c0_278] : memref<64x1184xf32, #tpu.memory_space<vmem>>, vector<16x128xf32>
    tpu.vector_store %arg10[%c32_277, %c0_278], %195 {strides = array<i32>} : memref<64x1184xf32, #tpu.memory_space<vmem>>, vector<16x128xf32>,
    %c3_279 = arith.constant 3 : index
    %c0_280 = arith.constant 0 : index
    %c0_281 = arith.constant 0 : index
    %197 = vector.load %arg8[%c3_279, %c0_280, %c0_281] : memref<6x18x128xf32, #tpu.memory_space<vmem>>, vector<1x16x128xf32>
    %198 = vector.shape_cast %197 : vector<1x16x128xf32> to vector<16x128xf32>
    %c48_282 = arith.constant 48 : index
    %c0_283 = arith.constant 0 : index
    %199 = vector.load %arg10[%c48_282, %c0_283] : memref<64x1184xf32, #tpu.memory_space<vmem>>, vector<16x128xf32>
    tpu.vector_store %arg10[%c48_282, %c0_283], %198 {strides = array<i32>} : memref<64x1184xf32, #tpu.memory_space<vmem>>, vector<16x128xf32>,
    %c0_284 = arith.constant 0 : index
    %c1_285 = arith.constant 1 : index
    %c0_286 = arith.constant 0 : index
    %200 = vector.load %arg8[%c0_284, %c1_285, %c0_286] : memref<6x18x128xf32, #tpu.memory_space<vmem>>, vector<1x16x128xf32>
    %201 = vector.shape_cast %200 : vector<1x16x128xf32> to vector<16x128xf32>
    %c0_287 = arith.constant 0 : index
    %c128_288 = arith.constant 128 : index
    %202 = vector.load %arg10[%c0_287, %c128_288] : memref<64x1184xf32, #tpu.memory_space<vmem>>, vector<16x128xf32>
    tpu.vector_store %arg10[%c0_287, %c128_288], %201 {strides = array<i32>} : memref<64x1184xf32, #tpu.memory_space<vmem>>, vector<16x128xf32>,
    %c1_289 = arith.constant 1 : index
    %c1_290 = arith.constant 1 : index
    %c0_291 = arith.constant 0 : index
    %203 = vector.load %arg8[%c1_289, %c1_290, %c0_291] : memref<6x18x128xf32, #tpu.memory_space<vmem>>, vector<1x16x128xf32>
    %204 = vector.shape_cast %203 : vector<1x16x128xf32> to vector<16x128xf32>
    %c16_292 = arith.constant 16 : index
    %c128_293 = arith.constant 128 : index
    %205 = vector.load %arg10[%c16_292, %c128_293] : memref<64x1184xf32, #tpu.memory_space<vmem>>, vector<16x128xf32>
    tpu.vector_store %arg10[%c16_292, %c128_293], %204 {strides = array<i32>} : memref<64x1184xf32, #tpu.memory_space<vmem>>, vector<16x128xf32>,
    %c2_294 = arith.constant 2 : index
    %c1_295 = arith.constant 1 : index
    %c0_296 = arith.constant 0 : index
    %206 = vector.load %arg8[%c2_294, %c1_295, %c0_296] : memref<6x18x128xf32, #tpu.memory_space<vmem>>, vector<1x16x128xf32>
    %207 = vector.shape_cast %206 : vector<1x16x128xf32> to vector<16x128xf32>
    %c32_297 = arith.constant 32 : index
    %c128_298 = arith.constant 128 : index
    %208 = vector.load %arg10[%c32_297, %c128_298] : memref<64x1184xf32, #tpu.memory_space<vmem>>, vector<16x128xf32>
    tpu.vector_store %arg10[%c32_297, %c128_298], %207 {strides = array<i32>} : memref<64x1184xf32, #tpu.memory_space<vmem>>, vector<16x128xf32>,
    %c3_299 = arith.constant 3 : index
    %c1_300 = arith.constant 1 : index
    %c0_301 = arith.constant 0 : index
    %209 = vector.load %arg8[%c3_299, %c1_300, %c0_301] : memref<6x18x128xf32, #tpu.memory_space<vmem>>, vector<1x16x128xf32>
    %210 = vector.shape_cast %209 : vector<1x16x128xf32> to vector<16x128xf32>
    %c48_302 = arith.constant 48 : index
    %c128_303 = arith.constant 128 : index
    %211 = vector.load %arg10[%c48_302, %c128_303] : memref<64x1184xf32, #tpu.memory_space<vmem>>, vector<16x128xf32>
    tpu.vector_store %arg10[%c48_302, %c128_303], %210 {strides = array<i32>} : memref<64x1184xf32, #tpu.memory_space<vmem>>, vector<16x128xf32>,
    %c0_304 = arith.constant 0 : index
    %c2_305 = arith.constant 2 : index
    %c0_306 = arith.constant 0 : index
    %212 = vector.load %arg8[%c0_304, %c2_305, %c0_306] : memref<6x18x128xf32, #tpu.memory_space<vmem>>, vector<1x16x128xf32>
    %213 = vector.shape_cast %212 : vector<1x16x128xf32> to vector<16x128xf32>
    %c0_307 = arith.constant 0 : index
    %c256_308 = arith.constant 256 : index
    %214 = vector.load %arg10[%c0_307, %c256_308] : memref<64x1184xf32, #tpu.memory_space<vmem>>, vector<16x128xf32>
    tpu.vector_store %arg10[%c0_307, %c256_308], %213 {strides = array<i32>} : memref<64x1184xf32, #tpu.memory_space<vmem>>, vector<16x128xf32>,
    %c1_309 = arith.constant 1 : index
    %c2_310 = arith.constant 2 : index
    %c0_311 = arith.constant 0 : index
    %215 = vector.load %arg8[%c1_309, %c2_310, %c0_311] : memref<6x18x128xf32, #tpu.memory_space<vmem>>, vector<1x16x128xf32>
    %216 = vector.shape_cast %215 : vector<1x16x128xf32> to vector<16x128xf32>
    %c16_312 = arith.constant 16 : index
    %c256_313 = arith.constant 256 : index
    %217 = vector.load %arg10[%c16_312, %c256_313] : memref<64x1184xf32, #tpu.memory_space<vmem>>, vector<16x128xf32>
    tpu.vector_store %arg10[%c16_312, %c256_313], %216 {strides = array<i32>} : memref<64x1184xf32, #tpu.memory_space<vmem>>, vector<16x128xf32>,
    %c2_314 = arith.constant 2 : index
    %c2_315 = arith.constant 2 : index
    %c0_316 = arith.constant 0 : index
    %218 = vector.load %arg8[%c2_314, %c2_315, %c0_316] : memref<6x18x128xf32, #tpu.memory_space<vmem>>, vector<1x16x128xf32>
    %219 = vector.shape_cast %218 : vector<1x16x128xf32> to vector<16x128xf32>
    %c32_317 = arith.constant 32 : index
    %c256_318 = arith.constant 256 : index
    %220 = vector.load %arg10[%c32_317, %c256_318] : memref<64x1184xf32, #tpu.memory_space<vmem>>, vector<16x128xf32>
    tpu.vector_store %arg10[%c32_317, %c256_318], %219 {strides = array<i32>} : memref<64x1184xf32, #tpu.memory_space<vmem>>, vector<16x128xf32>,
    %c3_319 = arith.constant 3 : index
    %c2_320 = arith.constant 2 : index
    %c0_321 = arith.constant 0 : index
    %221 = vector.load %arg8[%c3_319, %c2_320, %c0_321] : memref<6x18x128xf32, #tpu.memory_space<vmem>>, vector<1x16x128xf32>
    %222 = vector.shape_cast %221 : vector<1x16x128xf32> to vector<16x128xf32>
    %c48_322 = arith.constant 48 : index
    %c256_323 = arith.constant 256 : index
    %223 = vector.load %arg10[%c48_322, %c256_323] : memref<64x1184xf32, #tpu.memory_space<vmem>>, vector<16x128xf32>
    tpu.vector_store %arg10[%c48_322, %c256_323], %222 {strides = array<i32>} : memref<64x1184xf32, #tpu.memory_space<vmem>>, vector<16x128xf32>,
    %c1_324 = arith.constant 1 : index
    %c0_325 = arith.constant 0 : index
    %c0_326 = arith.constant 0 : index
    %224 = vector.load %arg8[%c1_324, %c0_325, %c0_326] : memref<6x18x128xf32, #tpu.memory_space<vmem>>, vector<1x16x128xf32>
    %225 = vector.shape_cast %224 : vector<1x16x128xf32> to vector<16x128xf32>
    %c0_327 = arith.constant 0 : index
    %c384 = arith.constant 384 : index
    %226 = vector.load %arg10[%c0_327, %c384] : memref<64x1184xf32, #tpu.memory_space<vmem>>, vector<16x128xf32>
    tpu.vector_store %arg10[%c0_327, %c384], %225 {strides = array<i32>} : memref<64x1184xf32, #tpu.memory_space<vmem>>, vector<16x128xf32>,
    %c2_328 = arith.constant 2 : index
    %c0_329 = arith.constant 0 : index
    %c0_330 = arith.constant 0 : index
    %227 = vector.load %arg8[%c2_328, %c0_329, %c0_330] : memref<6x18x128xf32, #tpu.memory_space<vmem>>, vector<1x16x128xf32>
    %228 = vector.shape_cast %227 : vector<1x16x128xf32> to vector<16x128xf32>
    %c16_331 = arith.constant 16 : index
    %c384_332 = arith.constant 384 : index
    %229 = vector.load %arg10[%c16_331, %c384_332] : memref<64x1184xf32, #tpu.memory_space<vmem>>, vector<16x128xf32>
    tpu.vector_store %arg10[%c16_331, %c384_332], %228 {strides = array<i32>} : memref<64x1184xf32, #tpu.memory_space<vmem>>, vector<16x128xf32>,
    %c3_333 = arith.constant 3 : index
    %c0_334 = arith.constant 0 : index
    %c0_335 = arith.constant 0 : index
    %230 = vector.load %arg8[%c3_333, %c0_334, %c0_335] : memref<6x18x128xf32, #tpu.memory_space<vmem>>, vector<1x16x128xf32>
    %231 = vector.shape_cast %230 : vector<1x16x128xf32> to vector<16x128xf32>
    %c32_336 = arith.constant 32 : index
    %c384_337 = arith.constant 384 : index
    %232 = vector.load %arg10[%c32_336, %c384_337] : memref<64x1184xf32, #tpu.memory_space<vmem>>, vector<16x128xf32>
    tpu.vector_store %arg10[%c32_336, %c384_337], %231 {strides = array<i32>} : memref<64x1184xf32, #tpu.memory_space<vmem>>, vector<16x128xf32>,
    %c4_338 = arith.constant 4 : index
    %c0_339 = arith.constant 0 : index
    %c0_340 = arith.constant 0 : index
    %233 = vector.load %arg8[%c4_338, %c0_339, %c0_340] : memref<6x18x128xf32, #tpu.memory_space<vmem>>, vector<1x16x128xf32>
    %234 = vector.shape_cast %233 : vector<1x16x128xf32> to vector<16x128xf32>
    %c48_341 = arith.constant 48 : index
    %c384_342 = arith.constant 384 : index
    %235 = vector.load %arg10[%c48_341, %c384_342] : memref<64x1184xf32, #tpu.memory_space<vmem>>, vector<16x128xf32>
    tpu.vector_store %arg10[%c48_341, %c384_342], %234 {strides = array<i32>} : memref<64x1184xf32, #tpu.memory_space<vmem>>, vector<16x128xf32>,
    %c1_343 = arith.constant 1 : index
    %c1_344 = arith.constant 1 : index
    %c0_345 = arith.constant 0 : index
    %236 = vector.load %arg8[%c1_343, %c1_344, %c0_345] : memref<6x18x128xf32, #tpu.memory_space<vmem>>, vector<1x16x128xf32>
    %237 = vector.shape_cast %236 : vector<1x16x128xf32> to vector<16x128xf32>
    %c0_346 = arith.constant 0 : index
    %c512 = arith.constant 512 : index
    %238 = vector.load %arg10[%c0_346, %c512] : memref<64x1184xf32, #tpu.memory_space<vmem>>, vector<16x128xf32>
    tpu.vector_store %arg10[%c0_346, %c512], %237 {strides = array<i32>} : memref<64x1184xf32, #tpu.memory_space<vmem>>, vector<16x128xf32>,
    %c2_347 = arith.constant 2 : index
    %c1_348 = arith.constant 1 : index
    %c0_349 = arith.constant 0 : index
    %239 = vector.load %arg8[%c2_347, %c1_348, %c0_349] : memref<6x18x128xf32, #tpu.memory_space<vmem>>, vector<1x16x128xf32>
    %240 = vector.shape_cast %239 : vector<1x16x128xf32> to vector<16x128xf32>
    %c16_350 = arith.constant 16 : index
    %c512_351 = arith.constant 512 : index
    %241 = vector.load %arg10[%c16_350, %c512_351] : memref<64x1184xf32, #tpu.memory_space<vmem>>, vector<16x128xf32>
    tpu.vector_store %arg10[%c16_350, %c512_351], %240 {strides = array<i32>} : memref<64x1184xf32, #tpu.memory_space<vmem>>, vector<16x128xf32>,
    %c3_352 = arith.constant 3 : index
    %c1_353 = arith.constant 1 : index
    %c0_354 = arith.constant 0 : index
    %242 = vector.load %arg8[%c3_352, %c1_353, %c0_354] : memref<6x18x128xf32, #tpu.memory_space<vmem>>, vector<1x16x128xf32>
    %243 = vector.shape_cast %242 : vector<1x16x128xf32> to vector<16x128xf32>
    %c32_355 = arith.constant 32 : index
    %c512_356 = arith.constant 512 : index
    %244 = vector.load %arg10[%c32_355, %c512_356] : memref<64x1184xf32, #tpu.memory_space<vmem>>, vector<16x128xf32>
    tpu.vector_store %arg10[%c32_355, %c512_356], %243 {strides = array<i32>} : memref<64x1184xf32, #tpu.memory_space<vmem>>, vector<16x128xf32>,
    %c4_357 = arith.constant 4 : index
    %c1_358 = arith.constant 1 : index
    %c0_359 = arith.constant 0 : index
    %245 = vector.load %arg8[%c4_357, %c1_358, %c0_359] : memref<6x18x128xf32, #tpu.memory_space<vmem>>, vector<1x16x128xf32>
    %246 = vector.shape_cast %245 : vector<1x16x128xf32> to vector<16x128xf32>
    %c48_360 = arith.constant 48 : index
    %c512_361 = arith.constant 512 : index
    %247 = vector.load %arg10[%c48_360, %c512_361] : memref<64x1184xf32, #tpu.memory_space<vmem>>, vector<16x128xf32>
    tpu.vector_store %arg10[%c48_360, %c512_361], %246 {strides = array<i32>} : memref<64x1184xf32, #tpu.memory_space<vmem>>, vector<16x128xf32>,
    %c1_362 = arith.constant 1 : index
    %c2_363 = arith.constant 2 : index
    %c0_364 = arith.constant 0 : index
    %248 = vector.load %arg8[%c1_362, %c2_363, %c0_364] : memref<6x18x128xf32, #tpu.memory_space<vmem>>, vector<1x16x128xf32>
    %249 = vector.shape_cast %248 : vector<1x16x128xf32> to vector<16x128xf32>
    %c0_365 = arith.constant 0 : index
    %c640 = arith.constant 640 : index
    %250 = vector.load %arg10[%c0_365, %c640] : memref<64x1184xf32, #tpu.memory_space<vmem>>, vector<16x128xf32>
    tpu.vector_store %arg10[%c0_365, %c640], %249 {strides = array<i32>} : memref<64x1184xf32, #tpu.memory_space<vmem>>, vector<16x128xf32>,
    %c2_366 = arith.constant 2 : index
    %c2_367 = arith.constant 2 : index
    %c0_368 = arith.constant 0 : index
    %251 = vector.load %arg8[%c2_366, %c2_367, %c0_368] : memref<6x18x128xf32, #tpu.memory_space<vmem>>, vector<1x16x128xf32>
    %252 = vector.shape_cast %251 : vector<1x16x128xf32> to vector<16x128xf32>
    %c16_369 = arith.constant 16 : index
    %c640_370 = arith.constant 640 : index
    %253 = vector.load %arg10[%c16_369, %c640_370] : memref<64x1184xf32, #tpu.memory_space<vmem>>, vector<16x128xf32>
    tpu.vector_store %arg10[%c16_369, %c640_370], %252 {strides = array<i32>} : memref<64x1184xf32, #tpu.memory_space<vmem>>, vector<16x128xf32>,
    %c3_371 = arith.constant 3 : index
    %c2_372 = arith.constant 2 : index
    %c0_373 = arith.constant 0 : index
    %254 = vector.load %arg8[%c3_371, %c2_372, %c0_373] : memref<6x18x128xf32, #tpu.memory_space<vmem>>, vector<1x16x128xf32>
    %255 = vector.shape_cast %254 : vector<1x16x128xf32> to vector<16x128xf32>
    %c32_374 = arith.constant 32 : index
    %c640_375 = arith.constant 640 : index
    %256 = vector.load %arg10[%c32_374, %c640_375] : memref<64x1184xf32, #tpu.memory_space<vmem>>, vector<16x128xf32>
    tpu.vector_store %arg10[%c32_374, %c640_375], %255 {strides = array<i32>} : memref<64x1184xf32, #tpu.memory_space<vmem>>, vector<16x128xf32>,
    %c4_376 = arith.constant 4 : index
    %c2_377 = arith.constant 2 : index
    %c0_378 = arith.constant 0 : index
    %257 = vector.load %arg8[%c4_376, %c2_377, %c0_378] : memref<6x18x128xf32, #tpu.memory_space<vmem>>, vector<1x16x128xf32>
    %258 = vector.shape_cast %257 : vector<1x16x128xf32> to vector<16x128xf32>
    %c48_379 = arith.constant 48 : index
    %c640_380 = arith.constant 640 : index
    %259 = vector.load %arg10[%c48_379, %c640_380] : memref<64x1184xf32, #tpu.memory_space<vmem>>, vector<16x128xf32>
    tpu.vector_store %arg10[%c48_379, %c640_380], %258 {strides = array<i32>} : memref<64x1184xf32, #tpu.memory_space<vmem>>, vector<16x128xf32>,
    %c2_381 = arith.constant 2 : index
    %c0_382 = arith.constant 0 : index
    %c0_383 = arith.constant 0 : index
    %260 = vector.load %arg8[%c2_381, %c0_382, %c0_383] : memref<6x18x128xf32, #tpu.memory_space<vmem>>, vector<1x16x128xf32>
    %261 = vector.shape_cast %260 : vector<1x16x128xf32> to vector<16x128xf32>
    %c0_384 = arith.constant 0 : index
    %c768 = arith.constant 768 : index
    %262 = vector.load %arg10[%c0_384, %c768] : memref<64x1184xf32, #tpu.memory_space<vmem>>, vector<16x128xf32>
    tpu.vector_store %arg10[%c0_384, %c768], %261 {strides = array<i32>} : memref<64x1184xf32, #tpu.memory_space<vmem>>, vector<16x128xf32>,
    %c3_385 = arith.constant 3 : index
    %c0_386 = arith.constant 0 : index
    %c0_387 = arith.constant 0 : index
    %263 = vector.load %arg8[%c3_385, %c0_386, %c0_387] : memref<6x18x128xf32, #tpu.memory_space<vmem>>, vector<1x16x128xf32>
    %264 = vector.shape_cast %263 : vector<1x16x128xf32> to vector<16x128xf32>
    %c16_388 = arith.constant 16 : index
    %c768_389 = arith.constant 768 : index
    %265 = vector.load %arg10[%c16_388, %c768_389] : memref<64x1184xf32, #tpu.memory_space<vmem>>, vector<16x128xf32>
    tpu.vector_store %arg10[%c16_388, %c768_389], %264 {strides = array<i32>} : memref<64x1184xf32, #tpu.memory_space<vmem>>, vector<16x128xf32>,
    %c4_390 = arith.constant 4 : index
    %c0_391 = arith.constant 0 : index
    %c0_392 = arith.constant 0 : index
    %266 = vector.load %arg8[%c4_390, %c0_391, %c0_392] : memref<6x18x128xf32, #tpu.memory_space<vmem>>, vector<1x16x128xf32>
    %267 = vector.shape_cast %266 : vector<1x16x128xf32> to vector<16x128xf32>
    %c32_393 = arith.constant 32 : index
    %c768_394 = arith.constant 768 : index
    %268 = vector.load %arg10[%c32_393, %c768_394] : memref<64x1184xf32, #tpu.memory_space<vmem>>, vector<16x128xf32>
    tpu.vector_store %arg10[%c32_393, %c768_394], %267 {strides = array<i32>} : memref<64x1184xf32, #tpu.memory_space<vmem>>, vector<16x128xf32>,
    %c5_395 = arith.constant 5 : index
    %c0_396 = arith.constant 0 : index
    %c0_397 = arith.constant 0 : index
    %269 = vector.load %arg8[%c5_395, %c0_396, %c0_397] : memref<6x18x128xf32, #tpu.memory_space<vmem>>, vector<1x16x128xf32>
    %270 = vector.shape_cast %269 : vector<1x16x128xf32> to vector<16x128xf32>
    %c48_398 = arith.constant 48 : index
    %c768_399 = arith.constant 768 : index
    %271 = vector.load %arg10[%c48_398, %c768_399] : memref<64x1184xf32, #tpu.memory_space<vmem>>, vector<16x128xf32>
    tpu.vector_store %arg10[%c48_398, %c768_399], %270 {strides = array<i32>} : memref<64x1184xf32, #tpu.memory_space<vmem>>, vector<16x128xf32>,
    %c2_400 = arith.constant 2 : index
    %c1_401 = arith.constant 1 : index
    %c0_402 = arith.constant 0 : index
    %272 = vector.load %arg8[%c2_400, %c1_401, %c0_402] : memref<6x18x128xf32, #tpu.memory_space<vmem>>, vector<1x16x128xf32>
    %273 = vector.shape_cast %272 : vector<1x16x128xf32> to vector<16x128xf32>
    %c0_403 = arith.constant 0 : index
    %c896 = arith.constant 896 : index
    %274 = vector.load %arg10[%c0_403, %c896] : memref<64x1184xf32, #tpu.memory_space<vmem>>, vector<16x128xf32>
    tpu.vector_store %arg10[%c0_403, %c896], %273 {strides = array<i32>} : memref<64x1184xf32, #tpu.memory_space<vmem>>, vector<16x128xf32>,
    %c3_404 = arith.constant 3 : index
    %c1_405 = arith.constant 1 : index
    %c0_406 = arith.constant 0 : index
    %275 = vector.load %arg8[%c3_404, %c1_405, %c0_406] : memref<6x18x128xf32, #tpu.memory_space<vmem>>, vector<1x16x128xf32>
    %276 = vector.shape_cast %275 : vector<1x16x128xf32> to vector<16x128xf32>
    %c16_407 = arith.constant 16 : index
    %c896_408 = arith.constant 896 : index
    %277 = vector.load %arg10[%c16_407, %c896_408] : memref<64x1184xf32, #tpu.memory_space<vmem>>, vector<16x128xf32>
    tpu.vector_store %arg10[%c16_407, %c896_408], %276 {strides = array<i32>} : memref<64x1184xf32, #tpu.memory_space<vmem>>, vector<16x128xf32>,
    %c4_409 = arith.constant 4 : index
    %c1_410 = arith.constant 1 : index
    %c0_411 = arith.constant 0 : index
    %278 = vector.load %arg8[%c4_409, %c1_410, %c0_411] : memref<6x18x128xf32, #tpu.memory_space<vmem>>, vector<1x16x128xf32>
    %279 = vector.shape_cast %278 : vector<1x16x128xf32> to vector<16x128xf32>
    %c32_412 = arith.constant 32 : index
    %c896_413 = arith.constant 896 : index
    %280 = vector.load %arg10[%c32_412, %c896_413] : memref<64x1184xf32, #tpu.memory_space<vmem>>, vector<16x128xf32>
    tpu.vector_store %arg10[%c32_412, %c896_413], %279 {strides = array<i32>} : memref<64x1184xf32, #tpu.memory_space<vmem>>, vector<16x128xf32>,
    %c5_414 = arith.constant 5 : index
    %c1_415 = arith.constant 1 : index
    %c0_416 = arith.constant 0 : index
    %281 = vector.load %arg8[%c5_414, %c1_415, %c0_416] : memref<6x18x128xf32, #tpu.memory_space<vmem>>, vector<1x16x128xf32>
    %282 = vector.shape_cast %281 : vector<1x16x128xf32> to vector<16x128xf32>
    %c48_417 = arith.constant 48 : index
    %c896_418 = arith.constant 896 : index
    %283 = vector.load %arg10[%c48_417, %c896_418] : memref<64x1184xf32, #tpu.memory_space<vmem>>, vector<16x128xf32>
    tpu.vector_store %arg10[%c48_417, %c896_418], %282 {strides = array<i32>} : memref<64x1184xf32, #tpu.memory_space<vmem>>, vector<16x128xf32>,
    %c2_419 = arith.constant 2 : index
    %c2_420 = arith.constant 2 : index
    %c0_421 = arith.constant 0 : index
    %284 = vector.load %arg8[%c2_419, %c2_420, %c0_421] : memref<6x18x128xf32, #tpu.memory_space<vmem>>, vector<1x16x128xf32>
    %285 = vector.shape_cast %284 : vector<1x16x128xf32> to vector<16x128xf32>
    %c0_422 = arith.constant 0 : index
    %c1024 = arith.constant 1024 : index
    %286 = vector.load %arg10[%c0_422, %c1024] : memref<64x1184xf32, #tpu.memory_space<vmem>>, vector<16x128xf32>
    tpu.vector_store %arg10[%c0_422, %c1024], %285 {strides = array<i32>} : memref<64x1184xf32, #tpu.memory_space<vmem>>, vector<16x128xf32>,
    %c3_423 = arith.constant 3 : index
    %c2_424 = arith.constant 2 : index
    %c0_425 = arith.constant 0 : index
    %287 = vector.load %arg8[%c3_423, %c2_424, %c0_425] : memref<6x18x128xf32, #tpu.memory_space<vmem>>, vector<1x16x128xf32>
    %288 = vector.shape_cast %287 : vector<1x16x128xf32> to vector<16x128xf32>
    %c16_426 = arith.constant 16 : index
    %c1024_427 = arith.constant 1024 : index
    %289 = vector.load %arg10[%c16_426, %c1024_427] : memref<64x1184xf32, #tpu.memory_space<vmem>>, vector<16x128xf32>
    tpu.vector_store %arg10[%c16_426, %c1024_427], %288 {strides = array<i32>} : memref<64x1184xf32, #tpu.memory_space<vmem>>, vector<16x128xf32>,
    %c4_428 = arith.constant 4 : index
    %c2_429 = arith.constant 2 : index
    %c0_430 = arith.constant 0 : index
    %290 = vector.load %arg8[%c4_428, %c2_429, %c0_430] : memref<6x18x128xf32, #tpu.memory_space<vmem>>, vector<1x16x128xf32>
    %291 = vector.shape_cast %290 : vector<1x16x128xf32> to vector<16x128xf32>
    %c32_431 = arith.constant 32 : index
    %c1024_432 = arith.constant 1024 : index
    %292 = vector.load %arg10[%c32_431, %c1024_432] : memref<64x1184xf32, #tpu.memory_space<vmem>>, vector<16x128xf32>
    tpu.vector_store %arg10[%c32_431, %c1024_432], %291 {strides = array<i32>} : memref<64x1184xf32, #tpu.memory_space<vmem>>, vector<16x128xf32>,
    %c5_433 = arith.constant 5 : index
    %c2_434 = arith.constant 2 : index
    %c0_435 = arith.constant 0 : index
    %293 = vector.load %arg8[%c5_433, %c2_434, %c0_435] : memref<6x18x128xf32, #tpu.memory_space<vmem>>, vector<1x16x128xf32>
    %294 = vector.shape_cast %293 : vector<1x16x128xf32> to vector<16x128xf32>
    %c48_436 = arith.constant 48 : index
    %c1024_437 = arith.constant 1024 : index
    %295 = vector.load %arg10[%c48_436, %c1024_437] : memref<64x1184xf32, #tpu.memory_space<vmem>>, vector<16x128xf32>
    tpu.vector_store %arg10[%c48_436, %c1024_437], %294 {strides = array<i32>} : memref<64x1184xf32, #tpu.memory_space<vmem>>, vector<16x128xf32>,
    %c1_438 = arith.constant 1 : index
    %c1_439 = arith.constant 1 : index
    %c0_440 = arith.constant 0 : index
    %296 = vector.load %arg7[%c1_438, %c1_439, %c0_440] : memref<6x18x32xf32, #tpu.memory_space<vmem>>, vector<1x16x32xf32>
    %297 = vector.shape_cast %296 : vector<1x16x32xf32> to vector<16x32xf32>
    %c0_441 = arith.constant 0 : index
    %c1152 = arith.constant 1152 : index
    %298 = vector.load %arg10[%c0_441, %c1152] : memref<64x1184xf32, #tpu.memory_space<vmem>>, vector<16x32xf32>
    tpu.vector_store %arg10[%c0_441, %c1152], %297 {strides = array<i32>} : memref<64x1184xf32, #tpu.memory_space<vmem>>, vector<16x32xf32>,
    %c2_442 = arith.constant 2 : index
    %c1_443 = arith.constant 1 : index
    %c0_444 = arith.constant 0 : index
    %299 = vector.load %arg7[%c2_442, %c1_443, %c0_444] : memref<6x18x32xf32, #tpu.memory_space<vmem>>, vector<1x16x32xf32>
    %300 = vector.shape_cast %299 : vector<1x16x32xf32> to vector<16x32xf32>
    %c16_445 = arith.constant 16 : index
    %c1152_446 = arith.constant 1152 : index
    %301 = vector.load %arg10[%c16_445, %c1152_446] : memref<64x1184xf32, #tpu.memory_space<vmem>>, vector<16x32xf32>
    tpu.vector_store %arg10[%c16_445, %c1152_446], %300 {strides = array<i32>} : memref<64x1184xf32, #tpu.memory_space<vmem>>, vector<16x32xf32>,
    %c3_447 = arith.constant 3 : index
    %c1_448 = arith.constant 1 : index
    %c0_449 = arith.constant 0 : index
    %302 = vector.load %arg7[%c3_447, %c1_448, %c0_449] : memref<6x18x32xf32, #tpu.memory_space<vmem>>, vector<1x16x32xf32>
    %303 = vector.shape_cast %302 : vector<1x16x32xf32> to vector<16x32xf32>
    %c32_450 = arith.constant 32 : index
    %c1152_451 = arith.constant 1152 : index
    %304 = vector.load %arg10[%c32_450, %c1152_451] : memref<64x1184xf32, #tpu.memory_space<vmem>>, vector<16x32xf32>
    tpu.vector_store %arg10[%c32_450, %c1152_451], %303 {strides = array<i32>} : memref<64x1184xf32, #tpu.memory_space<vmem>>, vector<16x32xf32>,
    %c4_452 = arith.constant 4 : index
    %c1_453 = arith.constant 1 : index
    %c0_454 = arith.constant 0 : index
    %305 = vector.load %arg7[%c4_452, %c1_453, %c0_454] : memref<6x18x32xf32, #tpu.memory_space<vmem>>, vector<1x16x32xf32>
    %306 = vector.shape_cast %305 : vector<1x16x32xf32> to vector<16x32xf32>
    %c48_455 = arith.constant 48 : index
    %c1152_456 = arith.constant 1152 : index
    %307 = vector.load %arg10[%c48_455, %c1152_456] : memref<64x1184xf32, #tpu.memory_space<vmem>>, vector<16x32xf32>
    tpu.vector_store %arg10[%c48_455, %c1152_456], %306 {strides = array<i32>} : memref<64x1184xf32, #tpu.memory_space<vmem>>, vector<16x32xf32>,
    %c0_457 = arith.constant 0 : index
    %c0_458 = arith.constant 0 : index
    %308 = vector.load %arg10[%c0_457, %c0_458] : memref<64x1184xf32, #tpu.memory_space<vmem>>, vector<64x1184xf32>
    %c0_459 = arith.constant 0 : index
    %c0_460 = arith.constant 0 : index
    %309 = vector.load %arg4[%c0_459, %c0_460] : memref<1184x128xf32, #tpu.memory_space<vmem>>, vector<1184x128xf32>
    %cst_461 = arith.constant dense<0.000000e+00> : vector<64x128xf32>
    %310 = tpu.matmul %308, %309, %cst_461 {dimension_numbers = #tpu.dot_dimension_numbers<[1], [0], [0], [1], [0, 0, 1, 1], [], []>} : vector<64x1184xf32>, vector<1184x128xf32>, vector<64x128xf32> -> vector<64x128xf32>
    %c0_462 = arith.constant 0 : index
    %c0_463 = arith.constant 0 : index
    %311 = vector.load %arg5[%c0_462, %c0_463] : memref<1x128xf32, #tpu.memory_space<vmem>>, vector<1x128xf32>
    %312 = vector.broadcast %311 : vector<1x128xf32> to vector<64x128xf32>
    %313 = arith.addf %310, %312 : vector<64x128xf32>
    %c0_464 = arith.constant 0 : index
    %c0_465 = arith.constant 0 : index
    %c0_466 = arith.constant 0 : index
    %314 = vector.load %arg6[%c0_464, %c0_465, %c0_466] : memref<1x64x128xf32, #tpu.memory_space<vmem>>, vector<1x64x128xf32>
    %315 = vector.shape_cast %314 : vector<1x64x128xf32> to vector<64x128xf32>
    %316 = vector.shape_cast %313 : vector<64x128xf32> to vector<1x64x128xf32>
    tpu.vector_store %arg6[%c0_464, %c0_465, %c0_466], %316 {strides = array<i32>} : memref<1x64x128xf32, #tpu.memory_space<vmem>>, vector<1x64x128xf32>,
    return
  }
  func.func @transform_0(%arg0: i32) -> (i32, i32, i32, i32) {
    %c0_i32 = arith.constant 0 : i32
    %c0_i32_0 = arith.constant 0 : i32
    %c0_i32_1 = arith.constant 0 : i32
    %c0_i32_2 = arith.constant 0 : i32
    return %arg0, %c0_i32, %c0_i32_0, %c0_i32_1 : i32, i32, i32, i32
  }
  func.func @transform_1(%arg0: i32) -> (i32, i32) {
    %c0_i32 = arith.constant 0 : i32
    %c0_i32_0 = arith.constant 0 : i32
    %c0_i32_1 = arith.constant 0 : i32
    return %c0_i32, %c0_i32_0 : i32, i32
  }
  func.func @transform_2(%arg0: i32) -> (i32, i32) {
    %c0_i32 = arith.constant 0 : i32
    %c0_i32_0 = arith.constant 0 : i32
    %c0_i32_1 = arith.constant 0 : i32
    return %c0_i32, %c0_i32_0 : i32, i32
  }
  func.func @transform_3(%arg0: i32) -> (i32, i32) {
    %c0_i32 = arith.constant 0 : i32
    %c0_i32_0 = arith.constant 0 : i32
    %c0_i32_1 = arith.constant 0 : i32
    return %c0_i32, %c0_i32_0 : i32, i32
  }
  func.func @transform_4(%arg0: i32) -> (i32, i32) {
    %c0_i32 = arith.constant 0 : i32
    %c0_i32_0 = arith.constant 0 : i32
    %c0_i32_1 = arith.constant 0 : i32
    return %c0_i32, %c0_i32_0 : i32, i32
  }
  func.func @transform_5(%arg0: i32) -> (i32, i32, i32) {
    %c0_i32 = arith.constant 0 : i32
    %c0_i32_0 = arith.constant 0 : i32
    %c0_i32_1 = arith.constant 0 : i32
    return %arg0, %c0_i32, %c0_i32_0 : i32, i32, i32
  }
}

</mosaic_0001>

<bundles_post_ra>
// kernel: tpu_custom_call.1
= control target key start
LH: loop header
LB: loop body
LE: loop exit
PB: predicated region body
PF: predicated region fallthrough
CT: control target
= control target key end

     0   :  { %10 = vsyncpa [#allocation7], 0  ;;  %s2921_s0 = inlined_call_operand.hbm [shape: f32[2,4,8,32], index: 0, kind: input, shape index: {}]   ;;  %s2922_s1 = inlined_call_operand.hbm [shape: f32[288,128], index: 1, kind: input, shape index: {}]   ;;  %s2923_s2 = inlined_call_operand.vmem [shape: f32[1,128], index: 2, kind: input, shape index: {}]   ;;  %s2924_s3 = inlined_call_operand.hbm [shape: f32[1184,128], index: 3, kind: input, shape index: {}]   ;;  %s2925_s4 = inlined_call_operand.vmem [shape: f32[1,128], index: 4, kind: input, shape index: {}]   ;;  %s2926_s5 = inlined_call_operand.hbm [shape: f32[2,64,128], index: 5, kind: output, shape index: {}]  }
   0x1   :  { %12 = vsyncpa [#allocation7 + $0x1], 0 }
   0x2   :  { %13 = vsyncpa [#allocation10], 0 }
   0x3   :  { %14 = vsyncpa [#allocation8], 0 }
   0x4   :  { %16 = vsyncpa [#allocation8 + $0x1], 0  ;;  %s2291_s18 = smov 0   ;;  %s2293_s19 = smov 0  }
   0x5   :  { %s2295_s20 = smov 0   ;;  %s2297_s21 = smov 0  }
   0x6 LB: > { %s2312_s22 = sadd.s32 4294967295, %s2249_s21   ;;  %s1931_s23 = sadd.s32 4294967294, %s2249_s21   ;;  %s2249_s21 = sphi %s2297_s21, %s2938_s21   ;;  %s2245_s20 = sphi %s2295_s20, %s2937_s20   ;;  %s2241_s19 = sphi %s2293_s19, %s2936_s19   ;;  %s2237_s18 = sphi %s2291_s18, %s2935_s18  }
   0x7   : > { %p42_p0 = scmp.ne.s32.totalorder %s2241_s19, %s2237_s18  ;;  %p43_p1 = scmp.eq.s32.totalorder %s2312_s22, 0 }
   0x8   : > { %p150_p2 = scmp.eq.s32.totalorder %s2312_s22, 1  ;;  %p156_p3 = scmp.eq.s32.totalorder %s1931_s23, 1 }
   0x9   : > { %p2321_p4 = por %p43_p1, %p42_p0  ;;  %p1932_p5 = scmp.ge.s32.totalorder %s2249_s21, 1 }
   0xa   : > { %p2326_p6 = por %p156_p3, %p42_p0  ;;  %p163_p7 = scmp.lt.s32.totalorder %s2249_s21, 3 }
   0xb   : > { %s174_s28 = sshll.u32 %s2922_s1, 4  ;;  %s2251_s30 = smov [#allocation9]   ;;  %s175_s28 = int_to_ptr.hbm [resolvable:$true] %s174_s28 }
   0xc   : > { %p2334_p8 = pnand %p1932_p5, %p163_p7  ;;  %s176_s6 = sshll.u32 %s2251_s30, 4  ;;  %s177_s6 = int_to_ptr.vmem [resolvable:$true] %s176_s6 }
   0xd   : > { %s191_s9 = sshll.u32 %s2924_s3, 4  ;;  %s2927_s10 = smov 128   ;;  %s192_s9 = int_to_ptr.hbm [resolvable:$true] %s191_s9 }
   0xe   : > { %p1991_p9 = pneg %p2334_p8  ;;  %s2253_s11 = smov 8  }
   0xf   : > { %s2254_s12 = smov [#allocation11]   ;;  %s2353_s14 = sadd.s32 1, %s2249_s21  }
  0x10   : > { %p1992_p10 = pnand %p1991_p9, %p43_p1  ;;  %s193_s13 = sshll.u32 %s2254_s12, 4  ;;  %s194_s13 = int_to_ptr.vmem [resolvable:$true] %s193_s13 }
  0x11   : > { %s29_s15 = sadd.s32 1, %s2245_s20  ;;  %s26_s16 = ssub.s32 %s2249_s21, %s2353_s14 }
  0x12   : > { %1994 = dma.hbm_to_vmem [thread:$0]  (!%p1992_p10), %s175_s28, 4608, %s177_s6, [#allocation10], %s2927_s10, %s2927_s10, %s2253_s11  }
  0x13   : > { %1997 = dma.hbm_to_vmem [thread:$0]  (!%p1992_p10), %s192_s9, 18944, %s194_s13, [#allocation10], %s2927_s10, %s2927_s10, %s2253_s11  }
  0x14   : > { %p36_p12 = scmp.ne.s32.totalorder %s2245_s20, %s2241_s19  ;;  %p27_p13 = scmp.eq.s32.totalorder %s26_s16, 0 }
  0x15   : > { %p37_p0 = scmp.eq.s32.totalorder %s2249_s21, 0  ;;  %p2008_p5 = scmp.lt.s32.totalorder %s2249_s21, 2 }
  0x16   : > { %p2363_p3 = por %p150_p2, %p36_p12  ;;  %s210_s26 = sand.u32 1, %s2245_s20  }
  0x17   : > { %s2369_s23 = scalar_select %p27_p13, %s2245_s20, %s29_s15  }
  0x18   : > { %p38_p7 = por %p37_p0, %p36_p12  ;;  %s1936_s27 = sshll.u32 %s210_s26, 5 }
  0x19   : > { %s1965_s28 = sshll.u32 %s2249_s21, 5  ;;  %s214_s8 = scalar_lea.vmem [#allocation6], %s1936_s27 }
  0x1a   : > { %s219_s7 = scalar_lea.hbm %s2921_s0, %s1965_s28  ;;  %s222_s9 = sshll.u32 %s214_s8, 4  ;;  %s223_s9 = int_to_ptr.vmem [resolvable:$true] %s222_s9 }
  0x1b   : > { %s220_s12 = sshll.u32 %s219_s7, 4  ;;  %p2376_p2 = pnand %p2008_p5, %p38_p7  ;;  %s221_s12 = int_to_ptr.hbm [resolvable:$true] %s220_s12 }
  0x1c   : > { %s211_s15 = scalar_lea.sflag [#allocation7], %s210_s26  ;;  %s2149_s16 = sshra.s32 %s221_s12, 4  ;;  %s2150_s16 = int_to_ptr.hbm [resolvable:$true] %s2149_s16 }
  0x1d   : > { %s2151_s10 = scalar_lea.hbm %s2150_s16, 32  ;;  %p2153_p10 = pneg %p2376_p2 }
  0x1e   : > { %p2152_p9 = scmp.ne.s32.totalorder %s2150_s16, %s2151_s10  ;;  %s2156_s30 = scalar_lea.hbm %s2921_s0, 64 }
  0x1f   : > { %p2157_p0 = scmp.lt.s32.totalorder %s2150_s16, %s2921_s0  ;;  %p2158_p5 = scmp.lt.s32.totalorder %s2156_s30, %s2151_s10 }
  0x20   : > { %p2154_p12 = pnand %p2153_p10, %p2152_p9 }
  0x21   : > { %p2159_p7 = por %p2158_p5, %p2157_p0 }
  0x22   : > { %p2155_p13 = pneg %p2154_p12 }
  0x24   : > { %p2160_p11 = pnand %p2159_p7, %p2155_p13 }
  0x26   : > { %2163 = shalt.err (!%p2160_p11)
}
  0x27   : > { %s2933_s26 = smov 128   ;;  %234 = sbr.rel (%p2334_p8) target bundleno = 713 (0x2c9), region = 40 }
  0x28   : > { %2001 = dma.hbm_to_vmem [thread:$0]  (!%p2376_p2), %s221_s12, 512, %s223_s9, %s211_s15, %s2933_s26, %s2933_s26, %s2253_s11  }
  0x29   : > { %s2396_s8 = sand.u32 (!%p2334_p8), 1, %s2241_s19  }
  0x2a   : > { %s1940_s16 = sshll.u32 (!%p2334_p8), %s2396_s8, 5  ;;  %s237_s10 = scalar_lea.sflag (!%p2334_p8), [#allocation7], %s2396_s8 }
  0x2b   : > { %s2400_s28 = scalar_lea.vmem (!%p2334_p8), [#allocation6], %s1940_s16 }
  0x2c   : > { %2224 = dma.done.wait (%p2321_p4), %s237_s10, 512  }
  0x2d   : > { %2226 = vsyncadd (%p2321_p4), %s237_s10, 4294966784 }
  0x2e   : > { %2228 = dma.done.wait (%p43_p1), [#allocation10], 23552  }
  0x2f   : > { %2230 = vsyncadd (%p43_p1), [#allocation10], 4294943744  ;;  %vm278_vm0 = vcmask 261120   ;;  %v2255_v0 = vmov 0.0   ;;  %vm287_vm1 = vcmask 253952   ;;  %s2256_s24 = smov 32  }
  0x30   : > { %279 = vst.msk [vmem:[#allocation2] sm:$0xff] %vm278_vm0, %v2255_v0  ;;  %s2257_s29 = smov 64   ;;  %vm281_vm2 = vcmask 254976   ;;  %v2054_v3 = vld [vmem:[%s2400_s28] ss:$0 sm:$0xff]  ;;  %s2258_s11 = smov 96  }
  0x31   : > { %280 = vst.msk [vmem:[#allocation2 + $0x8] sm:$0xff] %vm278_vm0, %v2255_v0  ;;  %v2055_v4 = vld [vmem:[%s2400_s28 + $0x1] ss:$0 sm:$0xff]  ;;  %v2056_v5 = vld [vmem:[%s2400_s28 + $0x2] ss:$0 sm:$0xff]  ;;  %v797_v56 = vld [vmem:[#allocation9 + $0x78] sm:$0xff] }
  0x32   : > { %288 = vst.msk [vmem:[#allocation2] sm:$0x1] %vm287_vm1, %v2255_v0  ;;  %v2057_v8 = vld [vmem:[%s2400_s28 + $0x3] ss:$0 sm:$0xff]  ;;  %v2058_v9 = vld [vmem:[%s2400_s28 + $0x4] ss:$0 sm:$0xff]  ;;  %846 = vmatpush.msra.mxu0 %v797_v56 }
  0x33   : > { %284 = vst.msk [vmem:[#allocation2 + $0x78] sm:$0xff] %vm278_vm0, %v2255_v0  ;;  %v2059_v10 = vld [vmem:[%s2400_s28 + $0x5] ss:$0 sm:$0xff]  ;;  %v2060_v11 = vld [vmem:[%s2400_s28 + $0x6] ss:$0 sm:$0xff]  ;;  %v796_v57 = vld [vmem:[#allocation9 + $0x70] sm:$0xff] }
  0x34   : > { %285 = vst.msk [vmem:[#allocation2 + $0x80] sm:$0xff] %vm278_vm0, %v2255_v0  ;;  %v2061_v12 = vld [vmem:[%s2400_s28 + $0x7] ss:$0 sm:$0xff]  ;;  %v2062_v13 = vld [vmem:[%s2400_s28 + $0xb] ss:$0 sm:$0xff]  ;;  %847 = vmatpush.msra.mxu0 %v796_v57  ;;  %v793_v62 = vld [vmem:[#allocation9 + $0x58] sm:$0xff] }
  0x35   : > { %289 = vst.msk [vmem:[#allocation2 + $0x18] sm:$0x1] %vm287_vm1, %v2255_v0  ;;  %v2063_v14 = vld [vmem:[%s2400_s28 + $0xc] ss:$0 sm:$0xff]  ;;  %v2064_v15 = vld [vmem:[%s2400_s28 + $0xd] ss:$0 sm:$0xff] }
  0x36   : > { %290 = vst.msk [vmem:[#allocation2 + $0x30] sm:$0x1] %vm287_vm1, %v2255_v0  ;;  %v2065_v16 = vld [vmem:[%s2400_s28 + $0xe] ss:$0 sm:$0xff]  ;;  %v2066_v17 = vld [vmem:[%s2400_s28 + $0xf] ss:$0 sm:$0xff] }
  0x37   : > { %291 = vst.msk [vmem:[#allocation2 + $0x48] sm:$0x1] %vm287_vm1, %v2255_v0  ;;  %v2067_v18 = vld [vmem:[%s2400_s28 + $0x8] ss:$0 sm:$0xff]  ;;  %v2068_v20 = vld [vmem:[%s2400_s28 + $0x9] ss:$0 sm:$0xff] }
  0x38   : > { %v434_v1 = vld [vmem:[#allocation2 + $0x1] sm:$0xff]  ;;  %292 = vst.msk [vmem:[#allocation2 + $0x60] sm:$0x1] %vm287_vm1, %v2255_v0  ;;  %v2069_v21 = vld [vmem:[%s2400_s28 + $0xa] ss:$0 sm:$0xff]  ;;  %v813_v63 = vld [vmem:[#allocation9 + $0xf8] sm:$0xff] }
  0x39   : > { %438 = vrot.lane.b32.xlu0 %v434_v1, %s2256_s24  ;;  %295 = vst.msk [vmem:[#allocation2 + $0x29] sm:$0x1] %vm287_vm1, %v2255_v0  ;;  %v483_v2 = vld [vmem:[#allocation2 + $0x2] sm:$0xff]  ;;  %v2070_v22 = vld [vmem:[%s2400_s28 + $0x10] ss:$0 sm:$0xff]  ;;  %887 = vmatpush.msra.mxu1 %v813_v63  ;;  %vm444_vm3 = vcmask 523520  }
  0x3a   : > { %296 = vst.msk [vmem:[#allocation2 + $0x41] sm:$0x1] %vm287_vm1, %v2255_v0  ;;  %v2071_v23 = vld [vmem:[%s2400_s28 + $0x11] ss:$0 sm:$0xff]  ;;  %v2072_v25 = vld [vmem:[%s2400_s28 + $0x12] ss:$0 sm:$0xff] }
  0x3b   : > { %297 = vst.msk [vmem:[#allocation2 + $0x59] sm:$0x1] %vm287_vm1, %v2255_v0  ;;  %v2073_v26 = vld [vmem:[%s2400_s28 + $0x13] ss:$0 sm:$0xff]  ;;  %v2074_v28 = vld [vmem:[%s2400_s28 + $0x14] ss:$0 sm:$0xff] }
  0x3c   : > { %298 = vst.msk [vmem:[#allocation2 + $0x71] sm:$0x1] %vm287_vm1, %v2255_v0  ;;  %v2075_v29 = vld [vmem:[%s2400_s28 + $0x15] ss:$0 sm:$0xff]  ;;  %v2076_v30 = vld [vmem:[%s2400_s28 + $0x16] ss:$0 sm:$0xff] }
  0x3d   : > { %300 = vst [vmem:[#allocation3] sm:$0xff] %v2255_v0  ;;  %v2077_v31 = vld [vmem:[%s2400_s28 + $0x17] ss:$0 sm:$0xff]  ;;  %v2078_v41 = vld [vmem:[%s2400_s28 + $0x18] ss:$0 sm:$0xff]  ;;  %v795_v59 = vld [vmem:[#allocation9 + $0x68] sm:$0xff] }
  0x3e   : > { %301 = vst [vmem:[#allocation3 + $0x8] sm:$0xff] %v2255_v0  ;;  %v2079_v42 = vld [vmem:[%s2400_s28 + $0x19] ss:$0 sm:$0xff]  ;;  %v2080_v43 = vld [vmem:[%s2400_s28 + $0x1a] ss:$0 sm:$0xff]  ;;  %848 = vmatpush.msra.mxu0 %v795_v59  ;;  %v794_v61 = vld [vmem:[#allocation9 + $0x60] sm:$0xff] }
  0x3f   : > { %302 = vst [vmem:[#allocation3 + $0x10] sm:$0x3] %v2255_v0  ;;  %v2081_v44 = vld [vmem:[%s2400_s28 + $0x1b] ss:$0 sm:$0xff]  ;;  %v2082_v49 = vld [vmem:[%s2400_s28 + $0x1c] ss:$0 sm:$0xff] }
  0x40   : > { %304 = vst [vmem:[#allocation3 + $0x78] sm:$0xff] %v2255_v0  ;;  %v2083_v50 = vld [vmem:[%s2400_s28 + $0x1d] ss:$0 sm:$0xff]  ;;  %v2084_v51 = vld [vmem:[%s2400_s28 + $0x1e] ss:$0 sm:$0xff]  ;;  %849 = vmatpush.msra.mxu0 %v794_v61  ;;  %v812_v1 = vld [vmem:[#allocation9 + $0xf0] sm:$0xff] }
  0x41   : > { %305 = vst [vmem:[#allocation3 + $0x80] sm:$0xff] %v2255_v0  ;;  %487 = vrot.lane.b32.xlu0 %v483_v2, %s2257_s29  ;;  %v2085_v52 = vld [vmem:[%s2400_s28 + $0x1f] ss:$0 sm:$0xff]  ;;  %v791_v2 = vld [vmem:[#allocation9 + $0x48] sm:$0xff]  ;;  %888 = vmatpush.msra.mxu1 %v812_v1  ;;  %vm493_vm4 = vcmask 785920   ;;  %vm542_vm5 = vcmask 1048320  }
  0x42   : > { %306 = vst [vmem:[#allocation3 + $0x88] sm:$0x3] %v2255_v0  ;;  %850 = vmatpush.msra.mxu0 %v793_v62  ;;  %s1943_s27 = sshll.u32 %s2396_s8, 6  ;;  %s1966_s6 = sshll.u32 %s2312_s22, 6 }
  0x43   : > { %308 = vst [vmem:[#allocation3 + $0x18] sm:$0x1] %v2255_v0  ;;  %s2868_s30 = scalar_lea.vmem [#allocation12], %s1943_s27  ;;  %s1835_s16 = scalar_lea.hbm %s2926_s5, %s1966_s6 }
  0x44   : > { %309 = vst [vmem:[#allocation3 + $0x30] sm:$0x1] %v2255_v0  ;;  %s1836_s10 = sshll.u32 %s2868_s30, 4  ;;  %s1838_s28 = sshll.u32 %s1835_s16, 4  ;;  %s1837_s10 = int_to_ptr.vmem [resolvable:$true] %s1836_s10  ;;  %s1839_s28 = int_to_ptr.hbm [resolvable:$true] %s1838_s28 }
  0x45   : > { %310 = vst [vmem:[#allocation3 + $0x48] sm:$0x1] %v2255_v0  ;;  %s2199_s12 = scalar_lea.hbm %s2926_s5, 128 }
  0x46   : > { %311 = vst [vmem:[#allocation3 + $0x60] sm:$0x1] %v2255_v0 }
  0x47   : > { %314 = vst [vmem:[#allocation3 + $0x29] sm:$0x1] %v2255_v0 }
  0x48   : > { %315 = vst [vmem:[#allocation3 + $0x41] sm:$0x1] %v2255_v0 }
  0x49   : > { %316 = vst [vmem:[#allocation3 + $0x59] sm:$0x1] %v2255_v0 }
  0x4a   : > { %317 = vst [vmem:[#allocation3 + $0x71] sm:$0x1] %v2255_v0 }
  0x4b   : > { %282 = vst.msk [vmem:[#allocation2 + $0x10] sm:$0x3] %vm281_vm2, %v2255_v0 }
  0x4c   : > { %294 = vst.msk [vmem:[#allocation2 + $0x11] sm:$0x1] %vm287_vm1, %v2255_v0 }
  0x4d   : > { %286 = vst.msk [vmem:[#allocation2 + $0x88] sm:$0x3] %vm281_vm2, %v2255_v0 }
  0x4e   : > { %293 = vst.msk [vmem:[#allocation2 + $0x78] sm:$0x1] %vm287_vm1, %v2255_v0 }
  0x4f   : > { %307 = vst [vmem:[#allocation3] sm:$0x1] %v2255_v0 }
  0x50   : > { %312 = vst [vmem:[#allocation3 + $0x78] sm:$0x1] %v2255_v0 }
  0x51   : > { %313 = vst [vmem:[#allocation3 + $0x11] sm:$0x1] %v2255_v0 }
  0x52   : > { %318 = vst [vmem:[#allocation3 + $0x89] sm:$0x1] %v2255_v0  ;;  %v435_v6 = vld [vmem:[#allocation2 + $0x9] sm:$0xff] }
  0x53   : > { %v484_v7 = vld [vmem:[#allocation2 + $0xa] sm:$0xff]  ;;  %299 = vst.msk [vmem:[#allocation2 + $0x89] sm:$0x1] %vm287_vm1, %v2255_v0  ;;  %440 = vrot.lane.b32.xlu0 %v435_v6, %s2256_s24 }
  0x54   : > { %489 = vrot.lane.b32.xlu1 %v484_v7, %s2257_s29  ;;  %328 = vst.msk [vmem:[#allocation2 + $0x19] sm:$0x3] %vm281_vm2, %v2054_v3  ;;  %v792_v0 = vld [vmem:[#allocation9 + $0x50] sm:$0xff]  ;;  %v416_v3 = vld [vmem:[#allocation2] sm:$0xff]  ;;  %v811_v6 = vld [vmem:[#allocation9 + $0xe8] sm:$0xff] }
  0x55   : > { %340 = vst.msk [vmem:[#allocation2 + $0x1b] sm:$0x3] %vm281_vm2, %v2055_v4  ;;  %851 = vmatpush.msra.mxu0 %v792_v0  ;;  %v790_v4 = vld [vmem:[#allocation9 + $0x40] sm:$0xff]  ;;  %v789_v7 = vld [vmem:[#allocation9 + $0x38] sm:$0xff]  ;;  %889 = vmatpush.msra.mxu1 %v811_v6 }
  0x56   : > { %352 = vst.msk [vmem:[#allocation2 + $0x1d] sm:$0x3] %vm281_vm2, %v2056_v5 }
  0x57   : > { %364 = vst.msk [vmem:[#allocation2 + $0x1f] sm:$0x3] %vm281_vm2, %v2057_v8  ;;  %852 = vmatpush.msra.mxu0 %v791_v2  ;;  %v810_v8 = vld [vmem:[#allocation9 + $0xe0] sm:$0xff] }
  0x58   : > { %376 = vst.msk [vmem:[#allocation2 + $0x21] sm:$0x3] %vm281_vm2, %v2058_v9  ;;  %v788_v9 = vld [vmem:[#allocation9 + $0x30] sm:$0xff]  ;;  %890 = vmatpush.msra.mxu1 %v810_v8 }
  0x59   : > { %388 = vst.msk [vmem:[#allocation2 + $0x23] sm:$0x3] %vm281_vm2, %v2059_v10  ;;  %853 = vmatpush.msra.mxu0 %v790_v4 }
  0x5a   : > { %400 = vst.msk [vmem:[#allocation2 + $0x25] sm:$0x3] %vm281_vm2, %v2060_v11 }
  0x5b   : > { %412 = vst.msk [vmem:[#allocation2 + $0x27] sm:$0x3] %vm281_vm2, %v2061_v12  ;;  %854 = vmatpush.msra.mxu0 %v789_v7  ;;  %v809_v12 = vld [vmem:[#allocation9 + $0xd8] sm:$0xff] }
  0x5c   : > { %365 = vst.msk [vmem:[#allocation2 + $0x37] sm:$0x3] %vm281_vm2, %v2062_v13  ;;  %v787_v13 = vld [vmem:[#allocation9 + $0x28] sm:$0xff]  ;;  %891 = vmatpush.msra.mxu1 %v809_v12 }
  0x5d   : > { %377 = vst.msk [vmem:[#allocation2 + $0x39] sm:$0x3] %vm281_vm2, %v2063_v14  ;;  %855 = vmatpush.msra.mxu0 %v788_v9 }
  0x5e   : > { %v532_v19 = vld [vmem:[#allocation2 + $0x18] sm:$0xff]  ;;  %389 = vst.msk [vmem:[#allocation2 + $0x3b] sm:$0x3] %vm281_vm2, %v2064_v15  ;;  %v808_v15 = vld [vmem:[#allocation9 + $0xd0] sm:$0xff] }
  0x5f   : > { %536 = vrot.lane.b32.xlu1 %v532_v19, %s2258_s11  ;;  %401 = vst.msk [vmem:[#allocation2 + $0x3d] sm:$0x3] %vm281_vm2, %v2065_v16  ;;  %v598_v27 = vld [vmem:[#allocation2 + $0x1a] sm:$0xff]  ;;  %856 = vmatpush.msra.mxu0 %v787_v13 }
  0x60   : > { %413 = vst.msk [vmem:[#allocation2 + $0x3f] sm:$0x3] %vm281_vm2, %v2066_v17  ;;  %v447_v32 = vld [vmem:[#allocation2 + $0x19] sm:$0xff]  ;;  %v807_v17 = vld [vmem:[#allocation9 + $0xc8] sm:$0xff]  ;;  %892 = vmatpush.msra.mxu1 %v808_v15 }
  0x61   : > { %329 = vst.msk [vmem:[#allocation2 + $0x31] sm:$0x3] %vm281_vm2, %v2067_v18  ;;  %v786_v16 = vld [vmem:[#allocation9 + $0x20] sm:$0xff]  ;;  %v785_v18 = vld [vmem:[#allocation9 + $0x18] sm:$0xff] }
  0x62   : > { %v2465_v24 = vld [vmem:[#allocation2 + $0x22] sm:$0xff]  ;;  %341 = vst.msk [vmem:[#allocation2 + $0x33] sm:$0x3] %vm281_vm2, %v2068_v20  ;;  %857 = vmatpush.msra.mxu0 %v786_v16  ;;  %893 = vmatpush.msra.mxu1 %v807_v17 }
  0x63   : > { %604 = vrot.lane.b32.xlu0 %v2465_v24, %s2256_s24  ;;  %353 = vst.msk [vmem:[#allocation2 + $0x35] sm:$0x3] %vm281_vm2, %v2069_v21  ;;  %v448_v36 = vld [vmem:[#allocation2 + $0x21] sm:$0xff]  ;;  %v784_v21 = vld [vmem:[#allocation9 + $0x10] sm:$0xff] }
  0x64   : > { %330 = vst.msk [vmem:[#allocation2 + $0x49] sm:$0x3] %vm281_vm2, %v2070_v22  ;;  %v533_v39 = vld [vmem:[#allocation2 + $0x20] sm:$0xff]  ;;  %v805_v22 = vld [vmem:[#allocation9 + $0xb8] sm:$0xff]  ;;  %858 = vmatpush.msra.mxu0 %v785_v18 }
  0x65   : > { %342 = vst.msk [vmem:[#allocation2 + $0x4b] sm:$0x3] %vm281_vm2, %v2071_v23  ;;  %v417_v23 = vld [vmem:[#allocation2 + $0x8] sm:$0xff] }
  0x66   : > { %354 = vst.msk [vmem:[#allocation2 + $0x4d] sm:$0x3] %vm281_vm2, %v2072_v25  ;;  %v804_v25 = vld [vmem:[#allocation9 + $0xb0] sm:$0xff]  ;;  %859 = vmatpush.msra.mxu0 %v784_v21 }
  0x67   : > { %602 = vrot.lane.b32.xlu1 %v598_v27, %s2256_s24  ;;  %366 = vst.msk [vmem:[#allocation2 + $0x4f] sm:$0x3] %vm281_vm2, %v2073_v26  ;;  %v2488_v34 = vld [vmem:[#allocation2 + $0x38] sm:$0xff] }
  0x68   : > { %378 = vst.msk [vmem:[#allocation2 + $0x51] sm:$0x3] %vm281_vm2, %v2074_v28  ;;  %v2492_v37 = vld [vmem:[#allocation2 + $0x3a] sm:$0xff]  ;;  %v803_v28 = vld [vmem:[#allocation9 + $0xa8] sm:$0xff] }
  0x69   : > { %390 = vst.msk [vmem:[#allocation2 + $0x53] sm:$0x3] %vm281_vm2, %v2075_v29  ;;  %v695_v40 = vld [vmem:[#allocation2 + $0x39] sm:$0xff] }
  0x6a   : > { %v646_v33 = vld [vmem:[#allocation2 + $0x30] sm:$0xff]  ;;  %402 = vst.msk [vmem:[#allocation2 + $0x55] sm:$0x3] %vm281_vm2, %v2076_v30  ;;  %v817_v26 = vld [vmem:[#allocation9 + $0x118] sm:$0xff]  ;;  %v802_v29 = vld [vmem:[#allocation9 + $0xa0] sm:$0xff] }
  0x6b   : > { %650 = vrot.lane.b32.xlu2 %v646_v33, %s2257_s29  ;;  %451 = vrot.lane.b32.xlu0 %v447_v32, %s2256_s24  ;;  %414 = vst.msk [vmem:[#allocation2 + $0x57] sm:$0x3] %vm281_vm2, %v2077_v31  ;;  %v610_v35 = vld [vmem:[#allocation2 + $0x32] sm:$0xff] }
  0x6c   : > { %584 = vst.msk [vmem:[#allocation4 + $0x8] sm:$0xff] %vm278_vm0, %v447_v32  ;;  %v694_v38 = vld [vmem:[#allocation2 + $0x31] sm:$0xff]  ;;  %940 = vmatpush.msra.mxu2 %v817_v26 }
  0x6d   : > { %744 = vst.msk [vmem:[#allocation4 + $0x10] sm:$0xff] %vm278_vm0, %v610_v35  ;;  %v816_v30 = vld [vmem:[#allocation9 + $0x110] sm:$0xff]  ;;  %v682_v31 = vld [vmem:[#allocation2 + $0x78] sm:$0xff] }
  0x6e   : > { %585 = vst.msk [vmem:[#allocation4 + $0x20] sm:$0xff] %vm278_vm0, %v448_v36  ;;  %v2521_v46 = vld [vmem:[#allocation2 + $0x49] sm:$0xff]  ;;  %941 = vmatpush.msra.mxu2 %v816_v30  ;;  %v801_v32 = vld [vmem:[#allocation9 + $0x98] sm:$0xff] }
  0x6f   : > { %652 = vrot.lane.b32.xlu1 %v2488_v34, %s2257_s29  ;;  %745 = vst.msk [vmem:[#allocation4 + $0x28] sm:$0xff] %vm278_vm0, %v2492_v37  ;;  %v2516_v45 = vld [vmem:[#allocation2 + $0x4a] sm:$0xff] }
  0x70   : > { %422 = vst.msk [vmem:[#allocation4 + $0x30] sm:$0xff] %vm278_vm0, %v532_v19  ;;  %v2525_v47 = vld [vmem:[#allocation2 + $0x48] sm:$0xff]  ;;  %v806_v19 = vld [vmem:[#allocation9 + $0xc0] sm:$0xff] }
  0x71   : > { %588 = vst.msk [vmem:[#allocation4 + $0x38] sm:$0xff] %vm278_vm0, %v694_v38  ;;  %894 = vmatpush.msra.mxu1 %v806_v19  ;;  %v754_v19 = vld [vmem:[#allocation2 + $0x7a] sm:$0xff] }
  0x72   : > { %423 = vst.msk [vmem:[#allocation4 + $0x48] sm:$0xff] %vm278_vm0, %v533_v39  ;;  %v2529_v48 = vld [vmem:[#allocation2 + $0x50] sm:$0xff] }
  0x73   : > { %698 = vrot.lane.b32.xlu2 %v694_v38, %s2258_s11  ;;  %614 = vrot.lane.b32.xlu0 %v610_v35, %s2256_s24  ;;  %589 = vst.msk [vmem:[#allocation4 + $0x50] sm:$0xff] %vm278_vm0, %v695_v40  ;;  %v2549_v53 = vld [vmem:[#allocation2 + $0x52] sm:$0xff] }
  0x74   : > { %427 = vst.msk [vmem:[#allocation4 + $0x60] sm:$0xff] %vm278_vm0, %v646_v33  ;;  %v2554_v54 = vld [vmem:[#allocation2 + $0x51] sm:$0xff]  ;;  %895 = vmatpush.msra.mxu1 %v805_v22 }
  0x75   : > { %428 = vst.msk [vmem:[#allocation4 + $0x78] sm:$0xff] %vm278_vm0, %v2488_v34 }
  0x76   : > { %331 = vst.msk [vmem:[#allocation2 + $0x61] sm:$0x3] %vm281_vm2, %v2078_v41  ;;  %896 = vmatpush.msra.mxu1 %v804_v25  ;;  %v1260_v25 = vld [vmem:[#allocation11 + $0xf8] sm:$0xff] }
  0x77   : > { %500 = vrot.lane.b32.xlu1 %v598_v27, %s2257_s29  ;;  %343 = vst.msk [vmem:[#allocation2 + $0x63] sm:$0x3] %vm281_vm2, %v2079_v42  ;;  %v782_v27 = vld [vmem:[#allocation9] sm:$0xff]  ;;  %v763_v42 = vld [vmem:[#allocation4 + $0x28] sm:$0xff] }
  0x78   : > { %355 = vst.msk [vmem:[#allocation2 + $0x65] sm:$0x3] %vm281_vm2, %v2080_v43  ;;  %897 = vmatpush.msra.mxu1 %v803_v28  ;;  %v683_v43 = vld [vmem:[#allocation2 + $0x80] sm:$0xff]  ;;  %v1259_v28 = vld [vmem:[#allocation11 + $0xf0] sm:$0xff] }
  0x79   : > { %367 = vst.msk [vmem:[#allocation2 + $0x67] sm:$0x3] %vm281_vm2, %v2081_v44 }
  0x7a   : > { %748 = vst.msk [vmem:[#allocation4 + $0x40] sm:$0xff] %vm278_vm0, %v2516_v45  ;;  %898 = vmatpush.msra.mxu1 %v802_v29  ;;  %v1258_v29 = vld [vmem:[#allocation11 + $0xe8] sm:$0xff] }
  0x7b   : > { %538 = vrot.lane.b32.xlu2 %v533_v39, %s2258_s11  ;;  %453 = vrot.lane.b32.xlu0 %v448_v36, %s2256_s24  ;;  %592 = vst.msk [vmem:[#allocation4 + $0x68] sm:$0xff] %vm278_vm0, %v2521_v46  ;;  %v760_v36 = vld [vmem:[#allocation4 + $0x10] sm:$0xff] }
  0x7c   : > { %432 = vst.msk [vmem:[#allocation4 + $0x90] sm:$0xff] %vm278_vm0, %v2525_v47  ;;  %899 = vmatpush.msra.mxu1 %v801_v32  ;;  %v755_v32 = vld [vmem:[#allocation2 + $0x82] sm:$0xff] }
  0x7d   : > { %433 = vst.msk [vmem:[#allocation4 + $0xa8] sm:$0xff] %vm278_vm0, %v2529_v48 }
  0x7e   : > { %379 = vst.msk [vmem:[#allocation2 + $0x69] sm:$0x3] %vm281_vm2, %v2082_v49 }
  0x7f   : > { %662 = vrot.lane.b32.xlu1 %v2525_v47, %s2257_s29  ;;  %391 = vst.msk [vmem:[#allocation2 + $0x6b] sm:$0x3] %vm281_vm2, %v2083_v50 }
  0x80   : > { %403 = vst.msk [vmem:[#allocation2 + $0x6d] sm:$0x3] %vm281_vm2, %v2084_v51  ;;  %v2567_v55 = vld [vmem:[#allocation2 + $0x61] sm:$0xff] }
  0x81   : > { %415 = vst.msk [vmem:[#allocation2 + $0x6f] sm:$0x3] %vm281_vm2, %v2085_v52  ;;  %v2575_v60 = vld [vmem:[#allocation2 + $0x60] sm:$0xff] }
  0x82   : > { %749 = vst.msk [vmem:[#allocation4 + $0x58] sm:$0xff] %vm278_vm0, %v2549_v53 }
  0x83   : > { %700 = vrot.lane.b32.xlu2 %v695_v40, %s2258_s11  ;;  %616 = vrot.lane.b32.xlu0 %v2492_v37, %s2256_s24  ;;  %593 = vst.msk [vmem:[#allocation4 + $0x80] sm:$0xff] %vm278_vm0, %v2554_v54 }
  0x84   : > { %596 = vst.msk [vmem:[#allocation4 + $0x98] sm:$0xff] %vm278_vm0, %v2567_v55 }
  0x85   : > { %v634_v58 = vld [vmem:[#allocation2 + $0x62] sm:$0xff]  ;;  %418 = vst.msk [vmem:[#allocation4] sm:$0xff] %vm278_vm0, %v416_v3 }
  0x86   : > { %752 = vst.msk [vmem:[#allocation4 + $0x70] sm:$0xff] %vm278_vm0, %v634_v58 }
  0x87   : > { %502 = vrot.lane.b32.xlu1 %v2465_v24, %s2257_s29  ;;  %v783_v24 = vld [vmem:[#allocation9 + $0x8] sm:$0xff]  ;;  %419 = vst.msk [vmem:[#allocation4 + $0x18] sm:$0xff] %vm278_vm0, %v417_v23 }
  0x88   : > { %v2585_v5 = vld [vmem:[#allocation2 + $0x69] sm:$0xff]  ;;  %860 = vmatpush.msra.mxu0 %v783_v24  ;;  %756 = vst.msk [vmem:[#allocation4 + $0xa0] sm:$0xff] %vm278_vm0, %v754_v19  ;;  %v1232_v19 = vld [vmem:[#allocation11 + $0x18] sm:$0xff] }
  0x89   : > { %v2588_v10 = vld [vmem:[#allocation2 + $0x6a] sm:$0xff]  ;;  %597 = vst.msk [vmem:[#allocation4 + $0xb0] sm:$0xff] %vm278_vm0, %v2585_v5 }
  0x8a   : > { %753 = vst.msk [vmem:[#allocation4 + $0x88] sm:$0xff] %vm278_vm0, %v2588_v10  ;;  %v2598_v14 = vld [vmem:[#allocation2 + $0x68] sm:$0xff]  ;;  %861 = vmatpush.msra.mxu0 %v782_v27 }
  0x8b   : > { %549 = vrot.lane.b32.xlu2 %v646_v33, %s2258_s11  ;;  %463 = vrot.lane.b32.xlu0 %v694_v38, %s2256_s24  ;;  %v815_v33 = vld [vmem:[#allocation9 + $0x108] sm:$0xff]  ;;  %v798_v38 = vld [vmem:[#allocation9 + $0x80] sm:$0xff]  ;;  %757 = vst.msk [vmem:[#allocation4 + $0xb8] sm:$0xff] %vm278_vm0, %v755_v32 }
  0x8c   : > { %942 = vmatpush.msra.mxu2 %v815_v33  ;;  %v1257_v33 = vld [vmem:[#allocation11 + $0xe0] sm:$0xff] }
  0x8d   : > { %v772_v3 = vld [vmem:[#allocation4 + $0x70] sm:$0xff]  ;;  %v1265_v32 = vld [vmem:[#allocation11 + $0x120] sm:$0xff] }
  0x8f   : > { %664 = vrot.lane.b32.xlu1 %v2529_v48, %s2257_s29  ;;  %v778_v24 = vld [vmem:[#allocation4 + $0xa0] sm:$0xff] }
  0x91   : > { %v775_v12 = vld [vmem:[#allocation4 + $0x88] sm:$0xff] }
  0x93   : > { %710 = vrot.lane.b32.xlu2 %v2521_v46, %s2258_s11  ;;  %626 = vrot.lane.b32.xlu0 %v2516_v45, %s2256_s24 }
  0x97   : > { %512 = vrot.lane.b32.xlu1 %v610_v35, %s2257_s29  ;;  %v814_v35 = vld [vmem:[#allocation9 + $0x100] sm:$0xff] }
  0x98   : > { %943 = vmatpush.msra.mxu2 %v814_v35  ;;  %v1256_v35 = vld [vmem:[#allocation11 + $0xd8] sm:$0xff] }
  0x99   : > { %1944 = vmatmul.msk.f32.vlgmr.msra.gmra.mxu2 %vm278_vm0, %v760_v36 }
  0x9a   : > { %1446 = vmatpush.msrb.mxu2 %v1260_v25  ;;  %v1231_v25 = vld [vmem:[#allocation11 + $0x10] sm:$0xff] }
  0x9b   : > { %551 = vrot.lane.b32.xlu2 %v2488_v34, %s2258_s11  ;;  %465 = vrot.lane.b32.xlu0 %v695_v40, %s2256_s24  ;;  %v800_v34 = vld [vmem:[#allocation9 + $0x90] sm:$0xff] }
  0x9c   : > { %900 = vmatpush.msra.mxu1 %v800_v34  ;;  %1447 = vmatpush.msrb.mxu2 %v1259_v28  ;;  %v1244_v34 = vld [vmem:[#allocation11 + $0x78] sm:$0xff]  ;;  %v1230_v28 = vld [vmem:[#allocation11 + $0x8] sm:$0xff] }
  0x9d   : > { %1405 = vmatpush.msra.mxu3 %v1244_v34  ;;  %v989_v34 = vld [vmem:[#allocation3] sm:$0xff] }
  0x9e   : > { %1448 = vmatpush.msrb.mxu2 %v1258_v29  ;;  %v1266_v29 = vld [vmem:[#allocation11 + $0x128] sm:$0xff] }
  0x9f   : > { %674 = vrot.lane.b32.xlu1 %v2575_v60, %s2257_s29 }
  0xa0   : > { %1449 = vmatpush.msrb.mxu2 %v1257_v33  ;;  %v1285_v33 = vld [vmem:[#allocation11 + $0x1c0] sm:$0xff] }
  0xa1   : > { %1945 = vmatmul.msk.f32.gmra.mxu2 %vm278_vm0, %v763_v42 }
  0xa2   : > { %1450 = vmatpush.msrb.mxu2 %v1256_v35 }
  0xa3   : > { %712 = vrot.lane.b32.xlu2 %v2554_v54, %s2258_s11  ;;  %628 = vrot.lane.b32.xlu0 %v2549_v53, %s2256_s24 }
  0xa7   : > { %514 = vrot.lane.b32.xlu1 %v2492_v37, %s2257_s29  ;;  %v799_v37 = vld [vmem:[#allocation9 + $0x88] sm:$0xff] }
  0xa8   : > { %901 = vmatpush.msra.mxu1 %v799_v37 }
  0xaa   : > { %902 = vmatpush.msra.mxu1 %v798_v38  ;;  %v1243_v38 = vld [vmem:[#allocation11 + $0x70] sm:$0xff] }
  0xab   : > { %561 = vrot.lane.b32.xlu2 %v2525_v47, %s2258_s11  ;;  %475 = vrot.lane.b32.xlu0 %v2521_v46, %s2256_s24  ;;  %v439_v11 = vpop.permute.xlu0 %438  ;;  %v766_v47 = vld [vmem:[#allocation4 + $0x40] sm:$0xff] }
  0xac   : > { %445 = vst.msk [vmem:[#allocation4] sm:$0xff] %vm444_vm3, %v439_v11  ;;  %1946 = vmatmul.msk.f32.gmra.mxu2 %vm278_vm0, %v766_v47  ;;  %1406 = vmatpush.msra.mxu3 %v1243_v38  ;;  %v1240_v47 = vld [vmem:[#allocation11 + $0x58] sm:$0xff] }
  0xad   : > { %v1006_v38 = vld [vmem:[#allocation3 + $0x9] sm:$0xff] }
  0xaf   : > { %676 = vrot.lane.b32.xlu1 %v2598_v14, %s2257_s29 }
  0xb3   : > { %722 = vrot.lane.b32.xlu2 %v2567_v55, %s2258_s11  ;;  %638 = vrot.lane.b32.xlu0 %v634_v58, %s2256_s24  ;;  %v488_v20 = vpop.permute.xlu0 %487  ;;  %v731_v55 = vld [vmem:[#allocation2 + $0x81] sm:$0xff]  ;;  %v769_v58 = vld [vmem:[#allocation4 + $0x58] sm:$0xff] }
  0xb4   : > { %494 = vst.msk [vmem:[#allocation4] sm:$0xff] %vm493_vm4, %v488_v20  ;;  %1947 = vmatmul.msk.f32.gmra.mxu2 %vm278_vm0, %v769_v58 }
  0xb7   : > { %524 = vrot.lane.b32.xlu1 %v2516_v45, %s2257_s29  ;;  %v730_v45 = vld [vmem:[#allocation2 + $0x79] sm:$0xff] }
  0xbb   : > { %563 = vrot.lane.b32.xlu2 %v2529_v48, %s2258_s11  ;;  %477 = vrot.lane.b32.xlu0 %v2554_v54, %s2256_s24 }
  0xbc   : > { %1948 = vmatmul.msk.f32.gmra.mxu2 %vm278_vm0, %v772_v3  ;;  %v1248_v3 = vld [vmem:[#allocation11 + $0x98] sm:$0xff] }
  0xbf   : > { %686 = vrot.lane.b32.xlu1 %v682_v31, %s2257_s29 }
  0xc3   : > { %724 = vrot.lane.b32.xlu2 %v2585_v5, %s2258_s11  ;;  %640 = vrot.lane.b32.xlu0 %v2588_v10, %s2256_s24  ;;  %s1824_s24 = scalar_lea.sflag [#allocation8], %s2396_s8 }
  0xc4   : > { %1949 = vmatmul.msk.f32.gmra.mxu2 %vm278_vm0, %v775_v12 }
  0xc5   : > { %v651_v39 = vpop.permute.xlu2 %650  ;;  %v441_v40 = vpop.permute.xlu0 %440 }
  0xc6   : > { %v490_v41 = vpop.permute.xlu1 %489  ;;  %446 = vst.msk [vmem:[#allocation4 + $0x18] sm:$0xff] %vm444_vm3, %v441_v40  ;;  %v1242_v40 = vld [vmem:[#allocation11 + $0x68] sm:$0xff] }
  0xc7   : > { %526 = vrot.lane.b32.xlu1 %v2549_v53, %s2257_s29  ;;  %495 = vst.msk [vmem:[#allocation4 + $0x18] sm:$0xff] %vm493_vm4, %v490_v41  ;;  %v1254_v41 = vld [vmem:[#allocation11 + $0xc8] sm:$0xff]  ;;  %1407 = vmatpush.msra.mxu3 %v1242_v40 }
  0xcb   : > { %574 = vrot.lane.b32.xlu2 %v2575_v60, %s2258_s11 }
  0xcc   : > { %1950 = vmatmul.msk.f32.gmra.mxu2 %vm278_vm0, %v778_v24 }
  0xcd   : > { %v699_v44 = vpop.permute.xlu2 %698 }
  0xcf   : > { %688 = vrot.lane.b32.xlu1 %v683_v43, %s2257_s29  ;;  %s2193_s29 = sshra.s32 %s1839_s28, 4  ;;  %s2194_s29 = int_to_ptr.hbm [resolvable:$true] %s2193_s29 }
  0xd0   : > { %s2195_s22 = scalar_lea.hbm %s2194_s29, 64  ;;  %p2200_p11 = scmp.lt.s32.totalorder %s2194_s29, %s2926_s5 }
  0xd1   : > { %v537_v46 = vpop.permute.xlu1 %536  ;;  %p2196_p1 = scmp.ne.s32.totalorder %s2194_s29, %s2195_s22  ;;  %p2201_p2 = scmp.lt.s32.totalorder %s2199_s12, %s2195_s22 }
  0xd2   : > { %543 = vst.msk [vmem:[#allocation4] sm:$0xff] %vm542_vm5, %v537_v46  ;;  %v1253_v46 = vld [vmem:[#allocation11 + $0xc0] sm:$0xff] }
  0xd3   : > { %734 = vrot.lane.b32.xlu2 %v730_v45, %s2258_s11  ;;  %v1241_v45 = vld [vmem:[#allocation11 + $0x60] sm:$0xff]  ;;  %p2197_p4 = pnand %p2196_p1, %p2363_p3  ;;  %p2202_p9 = por %p2201_p2, %p2200_p11 }
  0xd4   : > { %1408 = vmatpush.msra.mxu3 %v1241_v45  ;;  %v1261_v45 = vld [vmem:[#allocation11 + $0x100] sm:$0xff] }
  0xd5   : > { %v539_v48 = vpop.permute.xlu2 %538  ;;  %v605_v49 = vpop.permute.xlu0 %604  ;;  %p2198_p8 = pneg %p2197_p4 }
  0xd6   : > { %544 = vst.msk [vmem:[#allocation4 + $0x18] sm:$0xff] %vm542_vm5, %v539_v48  ;;  %v1276_v48 = vld [vmem:[#allocation11 + $0x178] sm:$0xff]  ;;  %1409 = vmatpush.msra.mxu3 %v1240_v47 }
  0xd7   : > { %609 = vst.msk [vmem:[#allocation4 + $0x20] sm:$0xff] %vm444_vm3, %v605_v49  ;;  %v1252_v49 = vld [vmem:[#allocation11 + $0xb8] sm:$0xff]  ;;  %1487 = vmatpush.msrb.mxu0 %v1276_v48  ;;  %p2203_p10 = pnand %p2202_p9, %p2198_p8 }
  0xd8   : > { %v1021_v47 = vld [vmem:[#allocation3 + $0x2] sm:$0xff] }
  0xd9   : > { %v603_v50 = vpop.permute.xlu1 %602  ;;  %v758_v51 = vld [vmem:[#allocation4] sm:$0xff]  ;;  %v1280_v48 = vld [vmem:[#allocation11 + $0x198] sm:$0xff] }
  0xda   : > { %608 = vst.msk [vmem:[#allocation4 + $0x8] sm:$0xff] %vm444_vm3, %v603_v50  ;;  %862 = vmatmul.f32.vlgmr.msra.gmra.mxu0 %v758_v51 }
  0xdb   : > { %656 = vst.msk [vmem:[#allocation4 + $0x8] sm:$0xff] %vm493_vm4, %v651_v39  ;;  %576 = vrot.lane.b32.xlu2 %v2598_v14, %s2258_s11  ;;  %v1255_v39 = vld [vmem:[#allocation11 + $0xd0] sm:$0xff] }
  0xdc   : > { %704 = vst.msk [vmem:[#allocation4 + $0x8] sm:$0xff] %vm542_vm5, %v699_v44  ;;  %1451 = vmatpush.msrb.mxu2 %v1255_v39  ;;  %v781_v44 = vld [vmem:[#allocation4 + $0xb8] sm:$0xff] }
  0xdd   : > { %v701_v52 = vpop.permute.xlu2 %700  ;;  %v452_v53 = vpop.permute.xlu0 %451  ;;  %v761_v54 = vld [vmem:[#allocation4 + $0x18] sm:$0xff]  ;;  %1951 = vmatmul.msk.f32.gmra.mxu2 %vm278_vm0, %v781_v44  ;;  %v1282_v44 = vld [vmem:[#allocation11 + $0x1a8] sm:$0xff] }
  0xde   : > { %457 = vst.msk [vmem:[#allocation4 + $0x30] sm:$0xff] %vm444_vm3, %v452_v53  ;;  %1452 = vmatpush.msrb.mxu2 %v1254_v41  ;;  %v1275_v53 = vld [vmem:[#allocation11 + $0x170] sm:$0xff] }
  0xdf   : > { %1488 = vmatpush.msrb.mxu0 %v1275_v53  ;;  %v1263_v41 = vld [vmem:[#allocation11 + $0x110] sm:$0xff]  ;;  %v1277_v53 = vld [vmem:[#allocation11 + $0x180] sm:$0xff] }
  0xe0   : > { %1453 = vmatpush.msrb.mxu2 %v1253_v46  ;;  %v1281_v46 = vld [vmem:[#allocation11 + $0x1a0] sm:$0xff] }
  0xe1   : > { %v653_v56 = vpop.permute.xlu1 %652 }
  0xe2   : > { %657 = vst.msk [vmem:[#allocation4 + $0x20] sm:$0xff] %vm493_vm4, %v653_v56  ;;  %865 = vmatmul.f32.gmra.mxu0 %v761_v54  ;;  %1454 = vmatpush.msrb.mxu2 %v1252_v49  ;;  %v1238_v54 = vld [vmem:[#allocation11 + $0x48] sm:$0xff]  ;;  %v1251_v56 = vld [vmem:[#allocation11 + $0xb0] sm:$0xff]  ;;  %v2684_v49 = vld [vmem:[#allocation3 + $0x8] sm:$0xff] }
  0xe3   : > { %705 = vst.msk [vmem:[#allocation4 + $0x20] sm:$0xff] %vm542_vm5, %v701_v52  ;;  %v759_v57 = vld [vmem:[#allocation4 + $0x8] sm:$0xff]  ;;  %736 = vrot.lane.b32.xlu2 %v731_v55, %s2258_s11  ;;  %v1239_v52 = vld [vmem:[#allocation11 + $0x50] sm:$0xff] }
  0xe4   : > { %903 = vmatmul.f32.vlgmr.msra.gmra.mxu1 %v759_v57  ;;  %1410 = vmatpush.msra.mxu3 %v1239_v52  ;;  %v1274_v55 = vld [vmem:[#allocation11 + $0x168] sm:$0xff] }
  0xe5   : > { %v550_v59 = vpop.permute.xlu2 %549  ;;  %v615_v60 = vpop.permute.xlu0 %614  ;;  %v1250_v57 = vld [vmem:[#allocation11 + $0xa8] sm:$0xff]  ;;  %1455 = vmatpush.msrb.mxu2 %v1251_v56  ;;  %1489 = vmatpush.msrb.mxu0 %v1274_v55  ;;  %v2690_v56 = vld [vmem:[%s2923_s2] ss:$0 sm:$0xff] }
  0xe6   : > { %620 = vst.msk [vmem:[#allocation4 + $0x38] sm:$0xff] %vm444_vm3, %v615_v60  ;;  %1411 = vmatpush.msra.mxu3 %v1238_v54  ;;  %v1237_v60 = vld [vmem:[#allocation11 + $0x40] sm:$0xff]  ;;  %v1278_v52 = vld [vmem:[#allocation11 + $0x188] sm:$0xff] }
  0xe7   : > { %1456 = vmatpush.msrb.mxu2 %v1250_v57  ;;  %v1022_v54 = vld [vmem:[#allocation3 + $0xa] sm:$0xff] }
  0xe8   : > { %1412 = vmatpush.msra.mxu3 %v1237_v60 }
  0xe9   : > { %v501_v61 = vpop.permute.xlu1 %500 }
  0xea   : > { %506 = vst.msk [vmem:[#allocation4 + $0x30] sm:$0xff] %vm493_vm4, %v501_v61  ;;  %v762_v62 = vld [vmem:[#allocation4 + $0x20] sm:$0xff] }
  0xeb   : > { %555 = vst.msk [vmem:[#allocation4 + $0x30] sm:$0xff] %vm542_vm5, %v550_v59  ;;  %v1273_v61 = vld [vmem:[#allocation11 + $0x160] sm:$0xff] }
  0xec   : > { %906 = vmatmul.f32.gmra.mxu1 %v762_v62  ;;  %v1249_v62 = vld [vmem:[#allocation11 + $0xa0] sm:$0xff]  ;;  %1490 = vmatpush.msrb.mxu0 %v1273_v61 }
  0xed   : > { %v711_v63 = vpop.permute.xlu2 %710  ;;  %v454_v0 = vpop.permute.xlu0 %453  ;;  %1457 = vmatpush.msrb.mxu2 %v1249_v62 }
  0xee   : > { %458 = vst.msk [vmem:[#allocation4 + $0x48] sm:$0xff] %vm444_vm3, %v454_v0  ;;  %v1272_v0 = vld [vmem:[#allocation11 + $0x158] sm:$0xff] }
  0xef   : > { %1491 = vmatpush.msrb.mxu0 %v1272_v0  ;;  %1458 = vmatpush.msrb.mxu2 %v1248_v3  ;;  %v1308_v0 = vld [vmem:[#allocation11 + $0x278] sm:$0xff] }
  0xf1   : > { %v663_v1 = vpop.permute.xlu1 %662 }
  0xf2   : > { %668 = vst.msk [vmem:[#allocation4 + $0x38] sm:$0xff] %vm493_vm4, %v663_v1  ;;  %v764_v2 = vld [vmem:[#allocation4 + $0x30] sm:$0xff]  ;;  %v1292_v1 = vld [vmem:[#allocation11 + $0x1f8] sm:$0xff] }
  0xf3   : > { %716 = vst.msk [vmem:[#allocation4 + $0x38] sm:$0xff] %vm542_vm5, %v711_v63  ;;  %868 = vmatmul.f32.gmra.mxu0 %v764_v2  ;;  %v1236_v63 = vld [vmem:[#allocation11 + $0x38] sm:$0xff]  ;;  %1528 = vmatpush.msrb.mxu1 %v1292_v1 }
  0xf4   : > { %1413 = vmatpush.msra.mxu3 %v1236_v63 }
  0xf5   : > { %v552_v4 = vpop.permute.xlu2 %551  ;;  %v617_v5 = vpop.permute.xlu0 %616 }
  0xf6   : > { %621 = vst.msk [vmem:[#allocation4 + $0x50] sm:$0xff] %vm444_vm3, %v617_v5  ;;  %v1235_v5 = vld [vmem:[#allocation11 + $0x30] sm:$0xff] }
  0xf7   : > { %1414 = vmatpush.msra.mxu3 %v1235_v5 }
  0xf9   : > { %v503_v6 = vpop.permute.xlu1 %502 }
  0xfa   : > { %507 = vst.msk [vmem:[#allocation4 + $0x48] sm:$0xff] %vm493_vm4, %v503_v6  ;;  %v765_v7 = vld [vmem:[#allocation4 + $0x38] sm:$0xff]  ;;  %v1271_v6 = vld [vmem:[#allocation11 + $0x150] sm:$0xff] }
  0xfb   : > { %556 = vst.msk [vmem:[#allocation4 + $0x48] sm:$0xff] %vm542_vm5, %v552_v4  ;;  %909 = vmatmul.f32.gmra.mxu1 %v765_v7  ;;  %v1291_v7 = vld [vmem:[#allocation11 + $0x1f0] sm:$0xff]  ;;  %1492 = vmatpush.msrb.mxu0 %v1271_v6 }
  0xfc   : > { %1529 = vmatpush.msrb.mxu1 %v1291_v7 }
  0xfd   : > { %v713_v8 = vpop.permute.xlu2 %712  ;;  %v464_v9 = vpop.permute.xlu0 %463 }
  0xfe   : > { %469 = vst.msk [vmem:[#allocation4 + $0x60] sm:$0xff] %vm444_vm3, %v464_v9  ;;  %v1234_v9 = vld [vmem:[#allocation11 + $0x28] sm:$0xff] }
  0xff   : > { %1415 = vmatpush.msra.mxu3 %v1234_v9 }
 0x101   : > { %v665_v10 = vpop.permute.xlu1 %664 }
 0x102   : > { %669 = vst.msk [vmem:[#allocation4 + $0x50] sm:$0xff] %vm493_vm4, %v665_v10  ;;  %v767_v11 = vld [vmem:[#allocation4 + $0x48] sm:$0xff] }
 0x103   : > { %717 = vst.msk [vmem:[#allocation4 + $0x50] sm:$0xff] %vm542_vm5, %v713_v8  ;;  %871 = vmatmul.f32.gmra.mxu0 %v767_v11  ;;  %v1247_v8 = vld [vmem:[#allocation11 + $0x90] sm:$0xff]  ;;  %v1270_v10 = vld [vmem:[#allocation11 + $0x148] sm:$0xff] }
 0x104   : > { %v1290_v11 = vld [vmem:[#allocation11 + $0x1e8] sm:$0xff]  ;;  %1493 = vmatpush.msrb.mxu0 %v1270_v10  ;;  %1459 = vmatpush.msrb.mxu2 %v1247_v8 }
 0x105   : > { %v562_v13 = vpop.permute.xlu2 %561  ;;  %v627_v14 = vpop.permute.xlu0 %626  ;;  %1530 = vmatpush.msrb.mxu1 %v1290_v11 }
 0x106   : > { %632 = vst.msk [vmem:[#allocation4 + $0x68] sm:$0xff] %vm444_vm3, %v627_v14 }
 0x109   : > { %v513_v15 = vpop.permute.xlu1 %512 }
 0x10a   : > { %518 = vst.msk [vmem:[#allocation4 + $0x60] sm:$0xff] %vm493_vm4, %v513_v15  ;;  %v768_v16 = vld [vmem:[#allocation4 + $0x50] sm:$0xff]  ;;  %v1233_v15 = vld [vmem:[#allocation11 + $0x20] sm:$0xff] }
 0x10b   : > { %567 = vst.msk [vmem:[#allocation4 + $0x60] sm:$0xff] %vm542_vm5, %v562_v13  ;;  %912 = vmatmul.f32.gmra.mxu1 %v768_v16  ;;  %v1246_v13 = vld [vmem:[#allocation11 + $0x88] sm:$0xff]  ;;  %v1269_v16 = vld [vmem:[#allocation11 + $0x140] sm:$0xff]  ;;  %1416 = vmatpush.msra.mxu3 %v1233_v15 }
 0x10c   : > { %1494 = vmatpush.msrb.mxu0 %v1269_v16  ;;  %1460 = vmatpush.msrb.mxu2 %v1246_v13  ;;  %v1306_v15 = vld [vmem:[#allocation11 + $0x268] sm:$0xff] }
 0x10d   : > { %v723_v17 = vpop.permute.xlu2 %722  ;;  %v466_v18 = vpop.permute.xlu0 %465  ;;  %1417 = vmatpush.msra.mxu3 %v1232_v19 }
 0x10e   : > { %470 = vst.msk [vmem:[#allocation4 + $0x78] sm:$0xff] %vm444_vm3, %v466_v18  ;;  %v1005_v18 = vld [vmem:[#allocation3 + $0x1] sm:$0xff] }
 0x10f   : > { %1418 = vmatpush.msra.mxu3 %v1231_v25  ;;  %v1322_v25 = vld [vmem:[#allocation11 + $0x2e8] sm:$0xff] }
 0x111   : > { %v675_v20 = vpop.permute.xlu1 %674  ;;  %1419 = vmatpush.msra.mxu3 %v1230_v28  ;;  %v1301_v28 = vld [vmem:[#allocation11 + $0x240] sm:$0xff] }
 0x112   : > { %680 = vst.msk [vmem:[#allocation4 + $0x68] sm:$0xff] %vm493_vm4, %v675_v20  ;;  %v770_v21 = vld [vmem:[#allocation4 + $0x60] sm:$0xff]  ;;  %v1268_v20 = vld [vmem:[#allocation11 + $0x138] sm:$0xff] }
 0x113   : > { %728 = vst.msk [vmem:[#allocation4 + $0x68] sm:$0xff] %vm542_vm5, %v723_v17  ;;  %874 = vmatmul.f32.gmra.mxu0 %v770_v21  ;;  %v1289_v17 = vld [vmem:[#allocation11 + $0x1e0] sm:$0xff]  ;;  %v1288_v21 = vld [vmem:[#allocation11 + $0x1d8] sm:$0xff] }
 0x114   : > { %1531 = vmatpush.msrb.mxu1 %v1289_v17  ;;  %1495 = vmatpush.msrb.mxu0 %v1268_v20  ;;  %v1324_v20 = vld [vmem:[#allocation11 + $0x2f8] sm:$0xff] }
 0x115   : > { %v564_v22 = vpop.permute.xlu2 %563  ;;  %v629_v23 = vpop.permute.xlu0 %628 }
 0x116   : > { %633 = vst.msk [vmem:[#allocation4 + $0x80] sm:$0xff] %vm444_vm3, %v629_v23  ;;  %v1245_v23 = vld [vmem:[#allocation11 + $0x80] sm:$0xff]  ;;  %1532 = vmatpush.msrb.mxu1 %v1288_v21  ;;  %v1304_v21 = vld [vmem:[#allocation11 + $0x258] sm:$0xff] }
 0x117   : > { %1461 = vmatpush.msrb.mxu2 %v1245_v23  ;;  %v1323_v23 = vld [vmem:[#allocation11 + $0x2f0] sm:$0xff] }
 0x118   : > { %1462 = vmatmul.f32.vlgmr.msrb.gmra.mxu2 %v1005_v18  ;;  %v1305_v18 = vld [vmem:[#allocation11 + $0x260] sm:$0xff] }
 0x119   : > { %v515_v26 = vpop.permute.xlu1 %514  ;;  %1610 = vmatpush.msra.mxu2 %v1324_v20  ;;  %v1329_v20 = vld [vmem:[#allocation11 + $0x320] sm:$0xff] }
 0x11a   : > { %519 = vst.msk [vmem:[#allocation4 + $0x78] sm:$0xff] %vm493_vm4, %v515_v26  ;;  %v771_v27 = vld [vmem:[#allocation4 + $0x68] sm:$0xff]  ;;  %v1267_v26 = vld [vmem:[#allocation11 + $0x130] sm:$0xff] }
 0x11b   : > { %568 = vst.msk [vmem:[#allocation4 + $0x78] sm:$0xff] %vm542_vm5, %v564_v22  ;;  %915 = vmatmul.f32.gmra.mxu1 %v771_v27  ;;  %v1287_v27 = vld [vmem:[#allocation11 + $0x1d0] sm:$0xff]  ;;  %1496 = vmatpush.msrb.mxu0 %v1267_v26  ;;  %v1302_v26 = vld [vmem:[#allocation11 + $0x248] sm:$0xff] }
 0x11c   : > { %1533 = vmatpush.msrb.mxu1 %v1287_v27  ;;  %v945_v57 = vpop.f32.mrf.mxu2  ;;  %1611 = vmatpush.msra.mxu2 %v1323_v23  ;;  %v1321_v27 = vld [vmem:[#allocation11 + $0x2e0] sm:$0xff]  ;;  %v1328_v23 = vld [vmem:[#allocation11 + $0x318] sm:$0xff] }
 0x11d   : > { %v725_v30 = vpop.permute.xlu2 %724  ;;  %v476_v31 = vpop.permute.xlu0 %475  ;;  %1497 = vmatpush.msrb.mxu0 %v1266_v29  ;;  %v1320_v29 = vld [vmem:[#allocation11 + $0x2d8] sm:$0xff] }
 0x11e   : > { %481 = vst.msk [vmem:[#allocation4 + $0x90] sm:$0xff] %vm444_vm3, %v476_v31  ;;  %v1229_v31 = vld [vmem:[#allocation11] sm:$0xff]  ;;  %1612 = vmatpush.msra.mxu2 %v1322_v25 }
 0x11f   : > { %1420 = vmatpush.msra.mxu3 %v1229_v31  ;;  %1498 = vmatpush.msrb.mxu0 %v1265_v32  ;;  %v1300_v31 = vld [vmem:[#allocation11 + $0x238] sm:$0xff]  ;;  %v1319_v32 = vld [vmem:[#allocation11 + $0x2d0] sm:$0xff] }
 0x120   : > { %1421 = vmatmul.f32.vlgmr.msra.gmra.mxu3 %v989_v34  ;;  %1465 = vmatmul.f32.gmra.mxu2 %v1006_v38 }
 0x121   : > { %v677_v36 = vpop.permute.xlu1 %676  ;;  %1569 = vmatpush.msrb.mxu3 %v1308_v0  ;;  %1613 = vmatpush.msra.mxu2 %v1321_v27  ;;  %v1355_v27 = vld [vmem:[#allocation11 + $0x3f0] sm:$0xff] }
 0x122   : > { %681 = vst.msk [vmem:[#allocation4 + $0x80] sm:$0xff] %vm493_vm4, %v677_v36  ;;  %v773_v37 = vld [vmem:[#allocation4 + $0x78] sm:$0xff] }
 0x123   : > { %729 = vst.msk [vmem:[#allocation4 + $0x80] sm:$0xff] %vm542_vm5, %v725_v30  ;;  %877 = vmatmul.f32.gmra.mxu0 %v773_v37  ;;  %v1286_v30 = vld [vmem:[#allocation11 + $0x1c8] sm:$0xff]  ;;  %v1264_v36 = vld [vmem:[#allocation11 + $0x118] sm:$0xff]  ;;  %1614 = vmatpush.msra.mxu2 %v1320_v29 }
 0x124   : > { %1534 = vmatpush.msrb.mxu1 %v1286_v30  ;;  %v1284_v37 = vld [vmem:[#allocation11 + $0x1b8] sm:$0xff]  ;;  %1499 = vmatpush.msrb.mxu0 %v1264_v36  ;;  %v948_v3 = vpop.f32.mrf.mxu2 }
 0x125   : > { %v575_v42 = vpop.permute.xlu2 %574  ;;  %v639_v43 = vpop.permute.xlu0 %638  ;;  %1615 = vmatpush.msra.mxu2 %v1319_v32 }
 0x126   : > { %644 = vst.msk [vmem:[#allocation4 + $0x98] sm:$0xff] %vm444_vm3, %v639_v43  ;;  %1535 = vmatpush.msrb.mxu1 %v1285_v33  ;;  %1500 = vmatpush.msrb.mxu0 %v1263_v41  ;;  %v1262_v43 = vld [vmem:[#allocation11 + $0x108] sm:$0xff]  ;;  %v1340_v41 = vld [vmem:[#allocation11 + $0x378] sm:$0xff] }
 0x128   : > { %1536 = vmatpush.msrb.mxu1 %v1284_v37  ;;  %1501 = vmatpush.msrb.mxu0 %v1262_v43 }
 0x129   : > { %v525_v50 = vpop.permute.xlu1 %524  ;;  %1424 = vmatmul.f32.gmra.mxu3 %v2684_v49 }
 0x12a   : > { %530 = vst.msk [vmem:[#allocation4 + $0x90] sm:$0xff] %vm493_vm4, %v525_v50  ;;  %v774_v51 = vld [vmem:[#allocation4 + $0x80] sm:$0xff]  ;;  %1502 = vmatpush.msrb.mxu0 %v1261_v45  ;;  %v1315_v45 = vld [vmem:[#allocation11 + $0x2b0] sm:$0xff] }
 0x12b   : > { %580 = vst.msk [vmem:[#allocation4 + $0x90] sm:$0xff] %vm542_vm5, %v575_v42  ;;  %918 = vmatmul.f32.gmra.mxu1 %v774_v51  ;;  %v1283_v42 = vld [vmem:[#allocation11 + $0x1b0] sm:$0xff] }
 0x12c   : > { %1537 = vmatpush.msrb.mxu1 %v1283_v42  ;;  %v1279_v51 = vld [vmem:[#allocation11 + $0x190] sm:$0xff]  ;;  %v1316_v42 = vld [vmem:[#allocation11 + $0x2b8] sm:$0xff]  ;;  %1651 = vmatpush.msra.mxu0 %v1340_v41 }
 0x12d   : > { %v735_v58 = vpop.permute.xlu2 %734  ;;  %v478_v59 = vpop.permute.xlu0 %477  ;;  %v1351_v41 = vld [vmem:[#allocation11 + $0x3d0] sm:$0xff] }
 0x12e   : > { %482 = vst.msk [vmem:[#allocation4 + $0xa8] sm:$0xff] %vm444_vm3, %v478_v59  ;;  %1538 = vmatpush.msrb.mxu1 %v1282_v44  ;;  %v1339_v44 = vld [vmem:[#allocation11 + $0x370] sm:$0xff] }
 0x12f   : > { %v951_v13 = vpop.f32.mrf.mxu2  ;;  %1652 = vmatpush.msra.mxu0 %v1339_v44  ;;  %v1370_v44 = vld [vmem:[#allocation11 + $0x468] sm:$0xff] }
 0x130   : > { %1539 = vmatpush.msrb.mxu1 %v1281_v46  ;;  %v1299_v46 = vld [vmem:[#allocation11 + $0x230] sm:$0xff] }
 0x131   : > { %v687_v2 = vpop.permute.xlu1 %686 }
 0x132   : > { %692 = vst.msk [vmem:[#allocation4 + $0x98] sm:$0xff] %vm493_vm4, %v687_v2  ;;  %v776_v4 = vld [vmem:[#allocation4 + $0x90] sm:$0xff]  ;;  %1540 = vmatpush.msrb.mxu1 %v1280_v48  ;;  %v1338_v48 = vld [vmem:[#allocation11 + $0x368] sm:$0xff] }
 0x133   : > { %740 = vst.msk [vmem:[#allocation4 + $0x98] sm:$0xff] %vm542_vm5, %v735_v58  ;;  %880 = vmatmul.f32.gmra.mxu0 %v776_v4 }
 0x134   : > { %1541 = vmatpush.msrb.mxu1 %v1279_v51  ;;  %v1297_v51 = vld [vmem:[#allocation11 + $0x220] sm:$0xff]  ;;  %1653 = vmatpush.msra.mxu0 %v1338_v48 }
 0x135   : > { %v641_v12 = vpop.permute.xlu0 %640  ;;  %v577_v14 = vpop.permute.xlu2 %576 }
 0x136   : > { %645 = vst.msk [vmem:[#allocation4 + $0xb0] sm:$0xff] %vm444_vm3, %v641_v12  ;;  %1542 = vmatpush.msrb.mxu1 %v1278_v52  ;;  %v1337_v52 = vld [vmem:[#allocation11 + $0x360] sm:$0xff] }
 0x137   : > { %v954_v37 = vpop.f32.mrf.mxu2  ;;  %1654 = vmatpush.msra.mxu0 %v1337_v52 }
 0x138   : > { %1543 = vmatpush.msrb.mxu1 %v1277_v53  ;;  %v1313_v53 = vld [vmem:[#allocation11 + $0x2a0] sm:$0xff] }
 0x139   : > { %v527_v22 = vpop.permute.xlu1 %526 }
 0x13a   : > { %531 = vst.msk [vmem:[#allocation4 + $0xa8] sm:$0xff] %vm493_vm4, %v527_v22  ;;  %v777_v24 = vld [vmem:[#allocation4 + $0x98] sm:$0xff] }
 0x13b   : > { %581 = vst.msk [vmem:[#allocation4 + $0xa8] sm:$0xff] %vm542_vm5, %v577_v14  ;;  %921 = vmatmul.f32.gmra.mxu1 %v777_v24  ;;  %v1307_v14 = vld [vmem:[#allocation11 + $0x270] sm:$0xff] }
 0x13c   : > { %1570 = vmatpush.msrb.mxu3 %v1307_v14  ;;  %v1303_v24 = vld [vmem:[#allocation11 + $0x250] sm:$0xff] }
 0x13d   : > { %v737_v35 = vpop.permute.xlu2 %736  ;;  %v1295_v14 = vld [vmem:[#allocation11 + $0x210] sm:$0xff] }
 0x13e   : > { %1571 = vmatpush.msrb.mxu3 %v1306_v15  ;;  %v1331_v15 = vld [vmem:[#allocation11 + $0x330] sm:$0xff] }
 0x140   : > { %1572 = vmatpush.msrb.mxu3 %v1305_v18  ;;  %v1293_v18 = vld [vmem:[#allocation11 + $0x200] sm:$0xff] }
 0x141   : > { %v689_v39 = vpop.permute.xlu1 %688 }
 0x142   : > { %693 = vst.msk [vmem:[#allocation4 + $0xb0] sm:$0xff] %vm493_vm4, %v689_v39  ;;  %v779_v40 = vld [vmem:[#allocation4 + $0xa8] sm:$0xff]  ;;  %1573 = vmatpush.msrb.mxu3 %v1304_v21  ;;  %v1317_v39 = vld [vmem:[#allocation11 + $0x2c0] sm:$0xff]  ;;  %v1372_v21 = vld [vmem:[#allocation11 + $0x478] sm:$0xff] }
 0x143   : > { %741 = vst.msk [vmem:[#allocation4 + $0xb0] sm:$0xff] %vm542_vm5, %v737_v35  ;;  %883 = vmatmul.f32.gmra.mxu0 %v779_v40  ;;  %v1318_v35 = vld [vmem:[#allocation11 + $0x2c8] sm:$0xff] }
 0x144   : > { %1574 = vmatpush.msrb.mxu3 %v1303_v24  ;;  %1616 = vmatpush.msra.mxu2 %v1318_v35  ;;  %v1356_v24 = vld [vmem:[#allocation11 + $0x3f8] sm:$0xff] }
 0x145   : > { %1692 = vmatpush.msra.mxu1 %v1356_v24 }
 0x146   : > { %1575 = vmatpush.msrb.mxu3 %v1302_v26  ;;  %1617 = vmatpush.msra.mxu2 %v1317_v39  ;;  %v1327_v26 = vld [vmem:[#allocation11 + $0x310] sm:$0xff]  ;;  %v1352_v39 = vld [vmem:[#allocation11 + $0x3d8] sm:$0xff] }
 0x147   : > { %1693 = vmatpush.msra.mxu1 %v1355_v27 }
 0x148   : > { %1576 = vmatpush.msrb.mxu3 %v1301_v28  ;;  %1618 = vmatpush.msra.mxu2 %v1316_v42  ;;  %v1371_v42 = vld [vmem:[#allocation11 + $0x470] sm:$0xff] }
 0x14a   : > { %v780_v50 = vld [vmem:[#allocation4 + $0xb0] sm:$0xff]  ;;  %1577 = vmatpush.msrb.mxu3 %v1300_v31  ;;  %1619 = vmatpush.msra.mxu2 %v1315_v45  ;;  %v1354_v31 = vld [vmem:[#allocation11 + $0x3e8] sm:$0xff] }
 0x14b   : > { %924 = vmatmul.f32.gmra.mxu1 %v780_v50  ;;  %1503 = vmatmul.f32.vlgmr.msrb.gmra.mxu0 %v1021_v47  ;;  %v1298_v47 = vld [vmem:[#allocation11 + $0x228] sm:$0xff] }
 0x14c   : > { %1578 = vmatpush.msrb.mxu3 %v1299_v46  ;;  %v1314_v50 = vld [vmem:[#allocation11 + $0x2a8] sm:$0xff]  ;;  %1694 = vmatpush.msra.mxu1 %v1354_v31  ;;  %v1349_v46 = vld [vmem:[#allocation11 + $0x3c0] sm:$0xff] }
 0x14d   : > { %1620 = vmatpush.msra.mxu2 %v1314_v50  ;;  %v1350_v45 = vld [vmem:[#allocation11 + $0x3c8] sm:$0xff]  ;;  %v1348_v50 = vld [vmem:[#allocation11 + $0x3b8] sm:$0xff] }
 0x14e   : > { %1579 = vmatpush.msrb.mxu3 %v1298_v47  ;;  %v1369_v47 = vld [vmem:[#allocation11 + $0x460] sm:$0xff] }
 0x14f   : > { %1621 = vmatpush.msra.mxu2 %v1313_v53 }
 0x150   : > { %1580 = vmatpush.msrb.mxu3 %v1297_v51  ;;  %v1368_v51 = vld [vmem:[#allocation11 + $0x458] sm:$0xff] }
 0x153   : > { %1506 = vmatmul.f32.gmra.mxu0 %v1022_v54  ;;  %v1296_v54 = vld [vmem:[#allocation11 + $0x218] sm:$0xff] }
 0x154   : > { %1581 = vmatpush.msrb.mxu3 %v1296_v54  ;;  %v1347_v54 = vld [vmem:[#allocation11 + $0x3b0] sm:$0xff] }
 0x156   : > { %1582 = vmatpush.msrb.mxu3 %v1295_v14  ;;  %v1364_v14 = vld [vmem:[#allocation11 + $0x438] sm:$0xff] }
 0x157   : > { %v863_v55 = vpop.f32.mrf.mxu0 }
 0x158   : > { %v864_v58 = vadd.f32 %v2690_v56, %v863_v55  ;;  %v1336_v55 = vld [vmem:[#allocation11 + $0x358] sm:$0xff] }
 0x159   : > { %1655 = vmatpush.msra.mxu0 %v1336_v55 }
 0x15f   : > { %v866_v62 = vpop.f32.mrf.mxu0 }
 0x160   : > { %v867_v1 = vadd.f32 %v2690_v56, %v866_v62  ;;  %v1311_v62 = vld [vmem:[#allocation11 + $0x290] sm:$0xff] }
 0x161   : > { %v904_v59 = vpop.f32.mrf.mxu1 }
 0x162   : > { %v905_v60 = vadd.f32 %v904_v59, %v864_v58  ;;  %v1335_v59 = vld [vmem:[#allocation11 + $0x350] sm:$0xff] }
 0x163   : > { %1656 = vmatpush.msra.mxu0 %v1335_v59 }
 0x164   : > { %v946_v61 = vadd.f32 %v945_v57, %v905_v60  ;;  %v1312_v57 = vld [vmem:[#allocation11 + $0x298] sm:$0xff] }
 0x165   : > { %1622 = vmatpush.msra.mxu2 %v1312_v57 }
 0x166   : > { %v2693_v63 = vmax.f32 %v946_v61, 0.0 }
 0x167   : > { %1623 = vmatpush.msra.mxu2 %v1311_v62 }
 0x168   : > { %978 = vst [vmem:[#allocation3 + $0x19] sm:$0xff] %v2693_v63  ;;  %1468 = vmatmul.f32.gmra.mxu2 %v2693_v63 }
 0x169   : > { %v907_v2 = vpop.f32.mrf.mxu1 }
 0x16a   : > { %v908_v4 = vadd.f32 %v907_v2, %v867_v1  ;;  %v1334_v1 = vld [vmem:[#allocation11 + $0x348] sm:$0xff] }
 0x16b   : > { %1657 = vmatpush.msra.mxu0 %v1334_v1  ;;  %v1366_v1 = vld [vmem:[#allocation11 + $0x448] sm:$0xff] }
 0x16c   : > { %v949_v5 = vadd.f32 %v948_v3, %v908_v4  ;;  %v957_v3 = vpop.f32.mrf.mxu2 }
 0x16e   : > { %v2698_v6 = vmax.f32 %v949_v5, 0.0  ;;  %v1310_v5 = vld [vmem:[#allocation11 + $0x288] sm:$0xff] }
 0x16f   : > { %v993_v7 = vld [vmem:[#allocation3 + $0x18] sm:$0xff]  ;;  %1624 = vmatpush.msra.mxu2 %v1310_v5  ;;  %v1365_v5 = vld [vmem:[#allocation11 + $0x440] sm:$0xff] }
 0x170   : > { %979 = vst [vmem:[#allocation3 + $0x21] sm:$0xff] %v2698_v6  ;;  %1427 = vmatmul.f32.gmra.mxu3 %v993_v7  ;;  %1544 = vmatmul.f32.vlgmr.msrb.gmra.mxu1 %v993_v7  ;;  %v869_v8 = vpop.f32.mrf.mxu0 }
 0x171   : > { %1471 = vmatmul.f32.gmra.mxu2 %v2698_v6  ;;  %v870_v10 = vadd.f32 %v2690_v56, %v869_v8  ;;  %v1333_v8 = vld [vmem:[#allocation11 + $0x340] sm:$0xff] }
 0x172   : > { %1658 = vmatpush.msra.mxu0 %v1333_v8 }
 0x177   : > { %v2702_v9 = vld [vmem:[#allocation3 + $0x1a] sm:$0xff]  ;;  %v2706_v17 = vld [vmem:[#allocation3 + $0x22] sm:$0xff] }
 0x178   : > { %v994_v11 = vld [vmem:[#allocation3 + $0x20] sm:$0xff]  ;;  %v910_v12 = vpop.f32.mrf.mxu1  ;;  %1509 = vmatmul.f32.gmra.mxu0 %v2702_v9 }
 0x179   : > { %1430 = vmatmul.f32.gmra.mxu3 %v994_v11  ;;  %v911_v16 = vadd.f32 %v910_v12, %v870_v10  ;;  %1547 = vmatmul.f32.gmra.mxu1 %v994_v11  ;;  %v1309_v10 = vld [vmem:[#allocation11 + $0x280] sm:$0xff]  ;;  %v1332_v12 = vld [vmem:[#allocation11 + $0x338] sm:$0xff] }
 0x17a   : > { %1625 = vmatpush.msra.mxu2 %v1309_v10  ;;  %1659 = vmatpush.msra.mxu0 %v1332_v12 }
 0x17b   : > { %v952_v19 = vadd.f32 %v951_v13, %v911_v16  ;;  %v1294_v16 = vld [vmem:[#allocation11 + $0x208] sm:$0xff] }
 0x17c   : > { %1583 = vmatpush.msrb.mxu3 %v1294_v16  ;;  %1660 = vmatpush.msra.mxu0 %v1331_v15  ;;  %v2763_v15 = vld [vmem:[#allocation11 + $0x498] sm:$0xff]  ;;  %v1342_v16 = vld [vmem:[#allocation11 + $0x388] sm:$0xff] }
 0x17d   : > { %v2708_v22 = vmax.f32 %v952_v19, 0.0  ;;  %v1330_v19 = vld [vmem:[#allocation11 + $0x328] sm:$0xff]  ;;  %1968 = vmatpush.msrb.mxu2 %v2763_v15 }
 0x17e   : > { %1584 = vmatpush.msrb.mxu3 %v1293_v18  ;;  %1661 = vmatpush.msra.mxu0 %v1330_v19  ;;  %v2769_v18 = vld [vmem:[%s2925_s4] ss:$0 sm:$0xff]  ;;  %v1363_v19 = vld [vmem:[#allocation11 + $0x430] sm:$0xff] }
 0x17f   : > { %981 = vst [vmem:[#allocation3 + $0x31] sm:$0xff] %v2708_v22  ;;  %1474 = vmatmul.f32.gmra.mxu2 %v2708_v22 }
 0x180   : > { %1512 = vmatmul.f32.gmra.mxu0 %v2706_v17  ;;  %v872_v30 = vpop.f32.mrf.mxu0  ;;  %1733 = vmatpush.msra.mxu3 %v1372_v21 }
 0x181   : > { %v873_v34 = vadd.f32 %v2690_v56, %v872_v30  ;;  %1662 = vmatpush.msra.mxu0 %v1329_v20  ;;  %v1326_v30 = vld [vmem:[#allocation11 + $0x308] sm:$0xff] }
 0x182   : > { %1734 = vmatpush.msra.mxu3 %v1371_v42 }
 0x183   : > { %1663 = vmatpush.msra.mxu0 %v1328_v23 }
 0x184   : > { %1735 = vmatpush.msra.mxu3 %v1370_v44 }
 0x185   : > { %1664 = vmatpush.msra.mxu0 %v1327_v26 }
 0x186   : > { %v2713_v33 = vld [vmem:[#allocation3 + $0x30] sm:$0xff]  ;;  %1736 = vmatpush.msra.mxu3 %v1369_v47  ;;  %v1097_v47 = vld [vmem:[#allocation3 + $0x78] sm:$0xff] }
 0x187   : > { %1433 = vmatmul.f32.gmra.mxu3 %v2713_v33  ;;  %1550 = vmatmul.f32.gmra.mxu1 %v2713_v33 }
 0x188   : > { %v913_v36 = vpop.f32.mrf.mxu1  ;;  %1665 = vmatpush.msra.mxu0 %v1326_v30  ;;  %1737 = vmatpush.msra.mxu3 %v1368_v51  ;;  %v1361_v30 = vld [vmem:[#allocation11 + $0x420] sm:$0xff] }
 0x189   : > { %v914_v38 = vadd.f32 %v913_v36, %v873_v34  ;;  %v960_v34 = vpop.f32.mrf.mxu2  ;;  %v1325_v36 = vld [vmem:[#allocation11 + $0x300] sm:$0xff] }
 0x18a   : > { %1666 = vmatpush.msra.mxu0 %v1325_v36 }
 0x18b   : > { %v955_v40 = vadd.f32 %v954_v37, %v914_v38  ;;  %v1353_v37 = vld [vmem:[#allocation11 + $0x3e0] sm:$0xff] }
 0x18c   : > { %1695 = vmatpush.msra.mxu1 %v1353_v37  ;;  %1786 = vmatpush.msrb.mxu0 %v2763_v15 }
 0x18d   : > { %v2718_v43 = vmax.f32 %v955_v40, 0.0 }
 0x18e   : > { %1696 = vmatpush.msra.mxu1 %v1352_v39  ;;  %v1375_v39 = vld [vmem:[#allocation11 + $0x490] sm:$0xff] }
 0x18f   : > { %982 = vst [vmem:[#allocation3 + $0x39] sm:$0xff] %v2718_v43  ;;  %1477 = vmatmul.f32.gmra.mxu2 %v2718_v43  ;;  %1787 = vmatpush.msrb.mxu0 %v1375_v39 }
 0x190   : > { %v875_v58 = vpop.f32.mrf.mxu0  ;;  %1697 = vmatpush.msra.mxu1 %v1351_v41  ;;  %1971 = vmatpush.msrb.mxu2 %v1375_v39 }
 0x191   : > { %v876_v0 = vadd.f32 %v2690_v56, %v875_v58  ;;  %v963_v52 = vpop.f32.mrf.mxu2  ;;  %v1367_v58 = vld [vmem:[#allocation11 + $0x450] sm:$0xff] }
 0x192   : > { %1698 = vmatpush.msra.mxu1 %v1350_v45  ;;  %1738 = vmatpush.msra.mxu3 %v1367_v58  ;;  %v1359_v45 = vld [vmem:[#allocation11 + $0x410] sm:$0xff] }
 0x194   : > { %1699 = vmatpush.msra.mxu1 %v1349_v46  ;;  %1739 = vmatpush.msra.mxu3 %v1366_v1  ;;  %v1358_v46 = vld [vmem:[#allocation11 + $0x408] sm:$0xff] }
 0x196   : > { %v2722_v60 = vld [vmem:[#allocation3 + $0x32] sm:$0xff]  ;;  %v2730_v4 = vld [vmem:[#allocation3 + $0x3a] sm:$0xff]  ;;  %1700 = vmatpush.msra.mxu1 %v1348_v50  ;;  %1740 = vmatpush.msra.mxu3 %v1365_v5  ;;  %v1138_v5 = vld [vmem:[#allocation2 + $0x39] sm:$0xff] }
 0x197   : > { %v2724_v61 = vld [vmem:[#allocation3 + $0x38] sm:$0xff]  ;;  %1515 = vmatmul.f32.gmra.mxu0 %v2722_v60  ;;  %1140 = vst.msk [vmem:[#allocation5 + $0x138] sm:$0xff] %vm278_vm0, %v1138_v5 }
 0x198   : > { %1436 = vmatmul.f32.gmra.mxu3 %v2724_v61  ;;  %v916_v2 = vpop.f32.mrf.mxu1  ;;  %1553 = vmatmul.f32.gmra.mxu1 %v2724_v61  ;;  %v1374_v50 = vld [vmem:[#allocation11 + $0x488] sm:$0xff] }
 0x199   : > { %v917_v7 = vadd.f32 %v916_v2, %v876_v0  ;;  %v1346_v0 = vld [vmem:[#allocation11 + $0x3a8] sm:$0xff]  ;;  %1701 = vmatpush.msra.mxu1 %v1347_v54  ;;  %v966_v8 = vpop.f32.mrf.mxu2  ;;  %1741 = vmatpush.msra.mxu3 %v1364_v14  ;;  %v1137_v54 = vld [vmem:[#allocation2 + $0x31] sm:$0xff] }
 0x19a   : > { %1974 = vmatpush.msrb.mxu2 %v1374_v50  ;;  %1788 = vmatpush.msrb.mxu0 %v1374_v50  ;;  %1139 = vst.msk [vmem:[#allocation5 + $0xe8] sm:$0xff] %vm278_vm0, %v1137_v54 }
 0x19b   : > { %v958_v11 = vadd.f32 %v957_v3, %v917_v7  ;;  %v1345_v3 = vld [vmem:[#allocation11 + $0x3a0] sm:$0xff]  ;;  %1702 = vmatpush.msra.mxu1 %v1346_v0  ;;  %1742 = vmatpush.msra.mxu3 %v1363_v19 }
 0x19d   : > { %v2732_v13 = vmax.f32 %v958_v11, 0.0  ;;  %1703 = vmatpush.msra.mxu1 %v1345_v3  ;;  %v1344_v11 = vld [vmem:[#allocation11 + $0x398] sm:$0xff] }
 0x19f   : > { %984 = vst [vmem:[#allocation3 + $0x49] sm:$0xff] %v2732_v13  ;;  %1518 = vmatmul.f32.gmra.mxu0 %v2730_v4  ;;  %1480 = vmatmul.f32.gmra.mxu2 %v2732_v13 }
 0x1a0   : > { %v878_v25 = vpop.f32.mrf.mxu0  ;;  %1704 = vmatpush.msra.mxu1 %v1344_v11 }
 0x1a1   : > { %v879_v29 = vadd.f32 %v2690_v56, %v878_v25  ;;  %v1463_v20 = vpop.f32.mrf.mxu2 }
 0x1a6   : > { %v2737_v28 = vld [vmem:[#allocation3 + $0x48] sm:$0xff] }
 0x1a7   : > { %1439 = vmatmul.f32.gmra.mxu3 %v2737_v28  ;;  %1556 = vmatmul.f32.gmra.mxu1 %v2737_v28 }
 0x1a8   : > { %v919_v32 = vpop.f32.mrf.mxu1 }
 0x1a9   : > { %v920_v35 = vadd.f32 %v919_v32, %v879_v29  ;;  %v1362_v29 = vld [vmem:[#allocation11 + $0x428] sm:$0xff]  ;;  %v1466_v36 = vpop.f32.mrf.mxu2 }
 0x1aa   : > { %1743 = vmatpush.msra.mxu3 %v1362_v29 }
 0x1ab   : > { %v961_v38 = vadd.f32 %v960_v34, %v920_v35 }
 0x1ac   : > { %1744 = vmatpush.msra.mxu3 %v1361_v30 }
 0x1ad   : > { %v2742_v40 = vmax.f32 %v961_v38, 0.0  ;;  %v1360_v38 = vld [vmem:[#allocation11 + $0x418] sm:$0xff] }
 0x1ae   : > { %1745 = vmatpush.msra.mxu3 %v1360_v38  ;;  %v1146_v38 = vld [vmem:[#allocation2 + $0x69] sm:$0xff] }
 0x1af   : > { %985 = vst [vmem:[#allocation3 + $0x51] sm:$0xff] %v2742_v40  ;;  %1483 = vmatmul.f32.gmra.mxu2 %v2742_v40 }
 0x1b0   : > { %v881_v48 = vpop.f32.mrf.mxu0  ;;  %1746 = vmatpush.msra.mxu3 %v1359_v45  ;;  %1148 = vst.msk [vmem:[#allocation5 + $0x278] sm:$0xff] %vm278_vm0, %v1146_v38 }
 0x1b1   : > { %v882_v53 = vadd.f32 %v2690_v56, %v881_v48  ;;  %v1357_v48 = vld [vmem:[#allocation11 + $0x400] sm:$0xff] }
 0x1b2   : > { %1747 = vmatpush.msra.mxu3 %v1358_v46 }
 0x1b4   : > { %1748 = vmatpush.msra.mxu3 %v1357_v48 }
 0x1b6   : > { %v2747_v55 = vld [vmem:[#allocation3 + $0x50] sm:$0xff] }
 0x1b7   : > { %v2749_v57 = vld [vmem:[#allocation3 + $0x4a] sm:$0xff]  ;;  %1442 = vmatmul.f32.gmra.mxu3 %v2747_v55  ;;  %v2753_v59 = vld [vmem:[#allocation3 + $0x52] sm:$0xff]  ;;  %1559 = vmatmul.f32.gmra.mxu1 %v2747_v55 }
 0x1b8   : > { %1521 = vmatmul.f32.gmra.mxu0 %v2749_v57  ;;  %v922_v62 = vpop.f32.mrf.mxu1  ;;  %1626 = vmatmul.f32.vlgmr.msra.gmra.mxu2 %v2702_v9  ;;  %v1343_v9 = vld [vmem:[#allocation11 + $0x390] sm:$0xff]  ;;  %v1228_v54 = vld [vmem:[#allocation5 + $0x278] sm:$0xff] }
 0x1b9   : > { %v923_v2 = vadd.f32 %v922_v62, %v882_v53  ;;  %1705 = vmatpush.msra.mxu1 %v1343_v9 }
 0x1bb   : > { %v964_v7 = vadd.f32 %v963_v52, %v923_v2  ;;  %1706 = vmatpush.msra.mxu1 %v1342_v16  ;;  %v1113_v52 = vld [vmem:[#allocation3 + $0x79] sm:$0xff]  ;;  %v1114_v2 = vld [vmem:[#allocation3 + $0x81] sm:$0xff] }
 0x1bc   : > { %v1141_v16 = vld [vmem:[#allocation2 + $0x49] sm:$0xff] }
 0x1bd   : > { %v2757_v10 = vmax.f32 %v964_v7, 0.0  ;;  %1143 = vst.msk [vmem:[#allocation5 + $0x188] sm:$0xff] %vm278_vm0, %v1141_v16 }
 0x1bf   : > { %987 = vst [vmem:[#allocation3 + $0x61] sm:$0xff] %v2757_v10  ;;  %1585 = vmatmul.f32.vlgmr.msrb.gmra.mxu3 %v2693_v63  ;;  %v1341_v63 = vld [vmem:[#allocation11 + $0x380] sm:$0xff] }
 0x1c0   : > { %1524 = vmatmul.f32.gmra.mxu0 %v2753_v59  ;;  %v884_v12 = vpop.f32.mrf.mxu0  ;;  %1629 = vmatmul.f32.gmra.mxu2 %v2706_v17  ;;  %v1422_v17 = vpop.f32.mrf.mxu3 }
 0x1c1   : > { %v885_v21 = vadd.f32 %v2690_v56, %v884_v12  ;;  %v1423_v23 = vadd.f32 %v2769_v18, %v1422_v17  ;;  %1707 = vmatpush.msra.mxu1 %v1341_v63  ;;  %1969 = vmatpush.msrb.mxu3 %v2763_v15 }
 0x1c3   : > { %v1464_v25 = vadd.f32 %v1463_v20, %v1423_v23  ;;  %1967 = vmatpush.msrb.mxu1 %v2763_v15  ;;  %1972 = vmatpush.msrb.mxu3 %v1375_v39  ;;  %v1188_v15 = vld [vmem:[#allocation5 + $0x138] sm:$0xff] }
 0x1c5   : > { %1970 = vmatpush.msrb.mxu1 %v1375_v39  ;;  %1975 = vmatpush.msrb.mxu3 %v1374_v50 }
 0x1c6   : > { %v2774_v24 = vld [vmem:[#allocation3 + $0x60] sm:$0xff] }
 0x1c7   : > { %1562 = vmatmul.f32.gmra.mxu1 %v2774_v24  ;;  %1588 = vmatmul.f32.gmra.mxu3 %v2698_v6 }
 0x1c8   : > { %v925_v26 = vpop.f32.mrf.mxu1  ;;  %1667 = vmatmul.f32.vlgmr.msra.gmra.mxu0 %v2713_v33  ;;  %1632 = vmatmul.f32.gmra.mxu2 %v2722_v60  ;;  %v1504_v27 = vpop.f32.mrf.mxu0 }
 0x1c9   : > { %v926_v31 = vadd.f32 %v925_v26, %v885_v21  ;;  %v1505_v56 = vadd.f32 %v1504_v27, %v1464_v25  ;;  %v1425_v34 = vpop.f32.mrf.mxu3  ;;  %1973 = vmatpush.msrb.mxu1 %v1374_v50  ;;  %v1129_v25 = vld [vmem:[#allocation3 + $0x7a] sm:$0xff]  ;;  %v1145_v27 = vld [vmem:[#allocation2 + $0x61] sm:$0xff] }
 0x1ca   : > { %v1426_v6 = vadd.f32 %v2769_v18, %v1425_v34  ;;  %1147 = vst.msk [vmem:[#allocation5 + $0x228] sm:$0xff] %vm278_vm0, %v1145_v27 }
 0x1cb   : > { %v967_v32 = vadd.f32 %v966_v8, %v926_v31 }
 0x1cc   : > { %v1467_v33 = vadd.f32 %v1466_v36, %v1426_v6 }
 0x1cd   : > { %v2781_v35 = vmax.f32 %v967_v32, 0.0 }
 0x1cf   : > { %988 = vst [vmem:[#allocation3 + $0x69] sm:$0xff] %v2781_v35  ;;  %1591 = vmatmul.f32.gmra.mxu3 %v2708_v22 }
 0x1d0   : > { %1670 = vmatmul.f32.gmra.mxu0 %v2724_v61  ;;  %1635 = vmatmul.f32.gmra.mxu2 %v2730_v4  ;;  %v1507_v37 = vpop.f32.mrf.mxu0 }
 0x1d1   : > { %v1508_v41 = vadd.f32 %v1507_v37, %v1467_v33  ;;  %v1218_v32 = vld [vmem:[#allocation5 + $0x228] sm:$0xff] }
 0x1d6   : > { %v1050_v42 = vld [vmem:[#allocation3 + $0x68] sm:$0xff] }
 0x1d7   : > { %v2788_v44 = vld [vmem:[#allocation3 + $0x62] sm:$0xff]  ;;  %1565 = vmatmul.f32.gmra.mxu1 %v1050_v42  ;;  %1594 = vmatmul.f32.gmra.mxu3 %v2718_v43  ;;  %v2793_v61 = vld [vmem:[#allocation3 + $0x6a] sm:$0xff] }
 0x1d8   : > { %1673 = vmatmul.f32.gmra.mxu0 %v2737_v28  ;;  %1638 = vmatmul.f32.gmra.mxu2 %v2749_v57  ;;  %v1373_v28 = vld [vmem:[#allocation11 + $0x480] sm:$0xff] }
 0x1d9   : > { %1789 = vmatpush.msrb.mxu0 %v1373_v28  ;;  %1977 = vmatpush.msrb.mxu2 %v1373_v28 }
 0x1da   : > { %1976 = vmatpush.msrb.mxu1 %v1373_v28  ;;  %1978 = vmatpush.msrb.mxu3 %v1373_v28 }
 0x1df   : > { %1597 = vmatmul.f32.gmra.mxu3 %v2732_v13  ;;  %1708 = vmatmul.f32.vlgmr.msra.gmra.mxu1 %v2708_v22  ;;  %v1133_v22 = vld [vmem:[#allocation2 + $0x19] sm:$0xff] }
 0x1e0   : > { %1676 = vmatmul.f32.gmra.mxu0 %v2747_v55  ;;  %1641 = vmatmul.f32.gmra.mxu2 %v2753_v59  ;;  %1135 = vst.msk [vmem:[#allocation5 + $0x48] sm:$0xff] %vm278_vm0, %v1133_v22 }
 0x1e7   : > { %1600 = vmatmul.f32.gmra.mxu3 %v2742_v40  ;;  %1711 = vmatmul.f32.gmra.mxu1 %v2718_v43  ;;  %v1158_v20 = vld [vmem:[#allocation5 + $0x48] sm:$0xff] }
 0x1e8   : > { %1679 = vmatmul.f32.gmra.mxu0 %v2774_v24  ;;  %1644 = vmatmul.f32.gmra.mxu2 %v2788_v44 }
 0x1eb   : > { %v1469_v55 = vpop.f32.mrf.mxu2 }
 0x1ed   : > { %v1545_v51 = vpop.f32.mrf.mxu1 }
 0x1ee   : > { %v2805_v53 = vadd.f32 %v1545_v51, %v1505_v56  ;;  %v1130_v56 = vld [vmem:[#allocation3 + $0x82] sm:$0xff] }
 0x1ef   : > { %1603 = vmatmul.f32.gmra.mxu3 %v2757_v10  ;;  %1714 = vmatmul.f32.gmra.mxu1 %v2732_v13  ;;  %v1178_v13 = vld [vmem:[#allocation5 + $0xe8] sm:$0xff] }
 0x1f0   : > { %1682 = vmatmul.f32.gmra.mxu0 %v1050_v42  ;;  %1647 = vmatmul.f32.gmra.mxu2 %v2793_v61 }
 0x1f3   : > { %v1428_v43 = vpop.f32.mrf.mxu3 }
 0x1f4   : > { %v1429_v58 = vadd.f32 %v2769_v18, %v1428_v43  ;;  %v1472_v9 = vpop.f32.mrf.mxu2 }
 0x1f5   : > { %v1510_v62 = vpop.f32.mrf.mxu0 }
 0x1f6   : > { %v1470_v0 = vadd.f32 %v1469_v55, %v1429_v58  ;;  %v1548_v1 = vpop.f32.mrf.mxu1 }
 0x1f7   : > { %v2812_v3 = vadd.f32 %v1548_v1, %v1508_v41  ;;  %1606 = vmatmul.f32.gmra.mxu3 %v2781_v35  ;;  %1717 = vmatmul.f32.gmra.mxu1 %v2742_v40  ;;  %v1134_v40 = vld [vmem:[#allocation2 + $0x21] sm:$0xff] }
 0x1f8   : > { %v1511_v7 = vadd.f32 %v1510_v62, %v1470_v0  ;;  %1685 = vmatmul.f32.gmra.mxu0 %v1097_v47  ;;  %1954 = vmatmul.msk.f32.vlgmr.msrb.gmra.mxu2 %vm278_vm0, %v1178_v13  ;;  %1136 = vst.msk [vmem:[#allocation5 + $0x98] sm:$0xff] %vm278_vm0, %v1134_v40 }
 0x1fc   : > { %v1431_v8 = vpop.f32.mrf.mxu3 }
 0x1fd   : > { %v1432_v11 = vadd.f32 %v2769_v18, %v1431_v8  ;;  %v1513_v14 = vpop.f32.mrf.mxu0 }
 0x1ff   : > { %v1473_v12 = vadd.f32 %v1472_v9, %v1432_v11  ;;  %1720 = vmatmul.f32.gmra.mxu1 %v2757_v10  ;;  %1749 = vmatmul.f32.vlgmr.msra.gmra.mxu3 %v2722_v60  ;;  %v1142_v60 = vld [vmem:[#allocation2 + $0x51] sm:$0xff]  ;;  %v1198_v10 = vld [vmem:[#allocation5 + $0x188] sm:$0xff] }
 0x200   : > { %1688 = vmatmul.f32.gmra.mxu0 %v2684_v49  ;;  %1955 = vmatmul.msk.f32.gmra.mxu2 %vm278_vm0, %v1188_v15  ;;  %1144 = vst.msk [vmem:[#allocation5 + $0x1d8] sm:$0xff] %vm278_vm0, %v1142_v60  ;;  %v1168_v6 = vld [vmem:[#allocation5 + $0x98] sm:$0xff] }
 0x201   : > { %v1514_v19 = vadd.f32 %v1513_v14, %v1473_v12 }
 0x202   : > { %v1475_v23 = vpop.f32.mrf.mxu2 }
 0x204   : > { %v1551_v63 = vpop.f32.mrf.mxu1 }
 0x205   : > { %v2825_v17 = vadd.f32 %v1551_v63, %v1511_v7 }
 0x207   : > { %1723 = vmatmul.f32.gmra.mxu1 %v2781_v35  ;;  %1752 = vmatmul.f32.gmra.mxu3 %v2730_v4  ;;  %v1208_v26 = vld [vmem:[#allocation5 + $0x1d8] sm:$0xff] }
 0x208   : > { %1952 = vmatmul.msk.f32.vlgmr.msrb.gmra.mxu0 %vm278_vm0, %v1158_v20  ;;  %1956 = vmatmul.msk.f32.gmra.mxu2 %vm278_vm0, %v1198_v10 }
 0x20a   : > { %v1434_v49 = vpop.f32.mrf.mxu3 }
 0x20b   : > { %v1435_v21 = vadd.f32 %v2769_v18, %v1434_v49 }
 0x20d   : > { %v1476_v24 = vadd.f32 %v1475_v23, %v1435_v21 }
 0x20f   : > { %1726 = vmatmul.f32.gmra.mxu1 %v1113_v52  ;;  %1755 = vmatmul.f32.gmra.mxu3 %v2749_v57 }
 0x210   : > { %1957 = vmatmul.msk.f32.gmra.mxu2 %vm278_vm0, %v1208_v26 }
 0x212   : > { %v1478_v35 = vpop.f32.mrf.mxu2 }
 0x214   : > { %v1516_v4 = vpop.f32.mrf.mxu0 }
 0x215   : > { %v1517_v29 = vadd.f32 %v1516_v4, %v1476_v24  ;;  %v1554_v30 = vpop.f32.mrf.mxu1 }
 0x216   : > { %v2836_v31 = vadd.f32 %v1554_v30, %v1514_v19 }
 0x217   : > { %1729 = vmatmul.f32.gmra.mxu1 %v1114_v2  ;;  %1758 = vmatmul.f32.gmra.mxu3 %v2753_v59 }
 0x218   : > { %1958 = vmatmul.msk.f32.gmra.mxu2 %vm278_vm0, %v1218_v32 }
 0x21b   : > { %v1437_v34 = vpop.f32.mrf.mxu3 }
 0x21c   : > { %v1438_v57 = vadd.f32 %v2769_v18, %v1437_v34  ;;  %v1519_v33 = vpop.f32.mrf.mxu0 }
 0x21e   : > { %v1479_v36 = vadd.f32 %v1478_v35, %v1438_v57 }
 0x21f   : > { %1761 = vmatmul.f32.gmra.mxu3 %v2788_v44  ;;  %1953 = vmatmul.msk.f32.vlgmr.msrb.gmra.mxu1 %vm278_vm0, %v1168_v6 }
 0x220   : > { %v1520_v37 = vadd.f32 %v1519_v33, %v1479_v36 }
 0x222   : > { %v1481_v45 = vpop.f32.mrf.mxu2 }
 0x224   : > { %v1557_v39 = vpop.f32.mrf.mxu1 }
 0x225   : > { %v2844_v59 = vadd.f32 %v1557_v39, %v1517_v29 }
 0x227   : > { %1764 = vmatmul.f32.gmra.mxu3 %v2793_v61 }
 0x22a   : > { %v1440_v41 = vpop.f32.mrf.mxu3 }
 0x22b   : > { %v1441_v42 = vadd.f32 %v2769_v18, %v1440_v41 }
 0x22d   : > { %v1482_v46 = vadd.f32 %v1481_v45, %v1441_v42 }
 0x22f   : > { %1767 = vmatmul.f32.gmra.mxu3 %v1129_v25 }
 0x232   : > { %v1484_v48 = vpop.f32.mrf.mxu2 }
 0x234   : > { %v1560_v44 = vpop.f32.mrf.mxu1 }
 0x235   : > { %v1522_v47 = vpop.f32.mrf.mxu0  ;;  %v2848_v28 = vadd.f32 %v1560_v44, %v1520_v37 }
 0x236   : > { %v1523_v50 = vadd.f32 %v1522_v47, %v1482_v46 }
 0x237   : > { %1770 = vmatmul.f32.gmra.mxu3 %v1130_v56 }
 0x23a   : > { %v1443_v22 = vpop.f32.mrf.mxu3 }
 0x23b   : > { %v1444_v51 = vadd.f32 %v2769_v18, %v1443_v22  ;;  %v1627_v61 = vpop.f32.mrf.mxu2 }
 0x23d   : > { %v1525_v52 = vpop.f32.mrf.mxu0  ;;  %v1485_v43 = vadd.f32 %v1484_v48, %v1444_v51 }
 0x23f   : > { %v1526_v55 = vadd.f32 %v1525_v52, %v1485_v43  ;;  %1959 = vmatmul.msk.f32.vlgmr.msrb.gmra.mxu3 %vm278_vm0, %v1228_v54 }
 0x242   : > { %v1586_v58 = vpop.f32.mrf.mxu3 }
 0x243   : > { %v1630_v2 = vpop.f32.mrf.mxu2  ;;  %v1587_v4 = vadd.f32 %v1586_v58, %v2805_v53 }
 0x244   : > { %v1563_v62 = vpop.f32.mrf.mxu1 }
 0x245   : > { %v2852_v0 = vadd.f32 %v1563_v62, %v1523_v50  ;;  %v1668_v1 = vpop.f32.mrf.mxu0  ;;  %v1628_v56 = vadd.f32 %v1627_v61, %v1587_v4 }
 0x247   : > { %v1669_v57 = vadd.f32 %v1668_v1, %v1628_v56 }
 0x24a   : > { %v1589_v13 = vpop.f32.mrf.mxu3 }
 0x24b   : > { %v1590_v5 = vadd.f32 %v1589_v13, %v2812_v3  ;;  %v1633_v9 = vpop.f32.mrf.mxu2 }
 0x24d   : > { %v1631_v7 = vadd.f32 %v1630_v2, %v1590_v5  ;;  %v1671_v8 = vpop.f32.mrf.mxu0 }
 0x24f   : > { %v1672_v11 = vadd.f32 %v1671_v8, %v1631_v7 }
 0x252   : > { %v1592_v18 = vpop.f32.mrf.mxu3 }
 0x253   : > { %v1636_v16 = vpop.f32.mrf.mxu2  ;;  %v1593_v41 = vadd.f32 %v1592_v18, %v2825_v17 }
 0x254   : > { %v1566_v12 = vpop.f32.mrf.mxu1 }
 0x255   : > { %v2855_v14 = vadd.f32 %v1566_v12, %v1526_v55  ;;  %v1674_v15 = vpop.f32.mrf.mxu0  ;;  %v1634_v45 = vadd.f32 %v1633_v9, %v1593_v41 }
 0x257   : > { %v1675_v47 = vadd.f32 %v1674_v15, %v1634_v45 }
 0x25a   : > { %v1595_v40 = vpop.f32.mrf.mxu3 }
 0x25b   : > { %v1639_v49 = vpop.f32.mrf.mxu2  ;;  %v1596_v48 = vadd.f32 %v1595_v40, %v2836_v31 }
 0x25c   : > { %v1709_v19 = vpop.f32.mrf.mxu1 }
 0x25d   : > { %v1677_v63 = vpop.f32.mrf.mxu0  ;;  %v1710_v35 = vadd.f32 %v1709_v19, %v1669_v57  ;;  %v1637_v22 = vadd.f32 %v1636_v16, %v1596_v48 }
 0x25f   : > { %v1678_v17 = vadd.f32 %v1677_v63, %v1637_v22 }
 0x262   : > { %v1598_v20 = vpop.f32.mrf.mxu3 }
 0x263   : > { %v1642_v24 = vpop.f32.mrf.mxu2  ;;  %v1599_v61 = vadd.f32 %v1598_v20, %v2844_v59 }
 0x264   : > { %v1712_v60 = vpop.f32.mrf.mxu1 }
 0x265   : > { %v1680_v10 = vpop.f32.mrf.mxu0  ;;  %v1713_v55 = vadd.f32 %v1712_v60, %v1672_v11  ;;  %v1640_v1 = vadd.f32 %v1639_v49, %v1599_v61 }
 0x267   : > { %v1681_v18 = vadd.f32 %v1680_v10, %v1640_v1 }
 0x26a   : > { %v1601_v21 = vpop.f32.mrf.mxu3 }
 0x26b   : > { %v1645_v29 = vpop.f32.mrf.mxu2  ;;  %v1602_v9 = vadd.f32 %v1601_v21, %v2848_v28 }
 0x26c   : > { %v1715_v23 = vpop.f32.mrf.mxu1 }
 0x26d   : > { %v1683_v3 = vpop.f32.mrf.mxu0  ;;  %v1716_v50 = vadd.f32 %v1715_v23, %v1675_v47  ;;  %v1643_v15 = vadd.f32 %v1642_v24, %v1602_v9 }
 0x26f   : > { %v1684_v16 = vadd.f32 %v1683_v3, %v1643_v15 }
 0x272   : > { %v1604_v25 = vpop.f32.mrf.mxu3 }
 0x273   : > { %v2864_v6 = vpop.f32.mrf.mxu2  ;;  %v1605_v19 = vadd.f32 %v1604_v25, %v2852_v0 }
 0x274   : > { %v1718_v26 = vpop.f32.mrf.mxu1 }
 0x275   : > { %v2857_v27 = vpop.f32.mrf.mxu0  ;;  %v1719_v58 = vadd.f32 %v1718_v26, %v1678_v17  ;;  %v1646_v10 = vadd.f32 %v1645_v29, %v1605_v19 }
 0x277   : > { %v1687_v21 = vadd.f32 %v2857_v27, %v1646_v10 }
 0x27a   : > { %v2860_v30 = vpop.f32.mrf.mxu3 }
 0x27b   : > { %v1797_v42 = vpop.f32.mrf.mxu2  ;;  %v1608_v0 = vadd.f32 %v2860_v30, %v2855_v14 }
 0x27c   : > { %v1721_v32 = vpop.f32.mrf.mxu1 }
 0x27d   : > { %v2862_v34 = vpop.f32.mrf.mxu0  ;;  %v1722_v12 = vadd.f32 %v1721_v32, %v1681_v18  ;;  %v1649_v25 = vadd.f32 %v2864_v6, %v1608_v0 }
 0x27f   : > { %v1690_v56 = vadd.f32 %v2862_v34, %v1649_v25 }
 0x282   : > { %v1750_v36 = vpop.f32.mrf.mxu3 }
 0x283   : > { %v1751_v33 = vadd.f32 %v1750_v36, %v1710_v35  ;;  %v1800_v54 = vpop.f32.mrf.mxu2 }
 0x284   : > { %v1724_v37 = vpop.f32.mrf.mxu1 }
 0x285   : > { %v1791_v38 = vpop.f32.mrf.mxu0  ;;  %v1725_v20 = vadd.f32 %v1724_v37, %v1684_v16 }
 0x286   : > { %v1792_v39 = vadd.f32 %v1791_v38, %v1751_v33 }
 0x288   : > { %1815 = vst [vmem:[%s2868_s30] sm:$0xff] %v1792_v39 }
 0x28a   : > { %v1753_v53 = vpop.f32.mrf.mxu3 }
 0x28b   : > { %v1754_v2 = vadd.f32 %v1753_v53, %v1713_v55  ;;  %v1803_v8 = vpop.f32.mrf.mxu2 }
 0x28c   : > { %v1727_v46 = vpop.f32.mrf.mxu1 }
 0x28d   : > { %v1728_v23 = vadd.f32 %v1727_v46, %v1687_v21 }
 0x292   : > { %v1756_v44 = vpop.f32.mrf.mxu3 }
 0x293   : > { %v1757_v51 = vadd.f32 %v1756_v44, %v1716_v50  ;;  %v1806_v63 = vpop.f32.mrf.mxu2 }
 0x294   : > { %v1730_v52 = vpop.f32.mrf.mxu1 }
 0x295   : > { %v1798_v43 = vadd.f32 %v1797_v42, %v1757_v51  ;;  %v1731_v27 = vadd.f32 %v1730_v52, %v1690_v56 }
 0x297   : > { %1817 = vst [vmem:[%s2868_s30 + $0x10] sm:$0xff] %v1798_v43 }
 0x29a   : > { %v1759_v62 = vpop.f32.mrf.mxu3 }
 0x29b   : > { %v1760_v13 = vadd.f32 %v1759_v62, %v1719_v58  ;;  %v1809_v26 = vpop.f32.mrf.mxu2 }
 0x29c   : > { %v1794_v31 = vpop.f32.mrf.mxu1 }
 0x29d   : > { %v1795_v5 = vadd.f32 %v1794_v31, %v1754_v2  ;;  %v1801_v7 = vadd.f32 %v1800_v54, %v1760_v13 }
 0x29f   : > { %1816 = vst [vmem:[%s2868_s30 + $0x8] sm:$0xff] %v1795_v5 }
 0x2a0   : > { %1818 = vst [vmem:[%s2868_s30 + $0x18] sm:$0xff] %v1801_v7 }
 0x2a2   : > { %v1762_v59 = vpop.f32.mrf.mxu3 }
 0x2a3   : > { %v1763_v11 = vadd.f32 %v1762_v59, %v1722_v12 }
 0x2a5   : > { %v1804_v40 = vadd.f32 %v1803_v8, %v1763_v11 }
 0x2a7   : > { %1819 = vst [vmem:[%s2868_s30 + $0x20] sm:$0xff] %v1804_v40 }
 0x2aa   : > { %v1765_v60 = vpop.f32.mrf.mxu3 }
 0x2ab   : > { %v1766_v49 = vadd.f32 %v1765_v60, %v1725_v20 }
 0x2ad   : > { %v1807_v28 = vadd.f32 %v1806_v63, %v1766_v49 }
 0x2af   : > { %1820 = vst [vmem:[%s2868_s30 + $0x28] sm:$0xff] %v1807_v28 }
 0x2b2   : > { %v1768_v24 = vpop.f32.mrf.mxu3 }
 0x2b3   : > { %v1769_v4 = vadd.f32 %v1768_v24, %v1728_v23 }
 0x2b5   : > { %v1810_v3 = vadd.f32 %v1809_v26, %v1769_v4 }
 0x2b7   : > { %1821 = vst [vmem:[%s2868_s30 + $0x30] sm:$0xff] %v1810_v3 }
 0x2ba   : > { %v1771_v29 = vpop.f32.mrf.mxu3 }
 0x2bb   : > { %v1772_v14 = vadd.f32 %v1771_v29, %v1731_v27 }
 0x2c2   : > { %v1812_v30 = vpop.f32.mrf.mxu3 }
 0x2c3   : > { %v1813_v32 = vadd.f32 %v1812_v30, %v1772_v14 }
 0x2c5   : > { %1822 = vst [vmem:[%s2868_s30 + $0x38] sm:$0xff] %v1813_v32 }
 0x2c6   : > { %2206 = shalt.err (!%p2203_p10)
}
 0x2c7   : > { %s2259_s8 = smov 128   ;;  %s2260_s27 = smov 8  }
 0x2c8   : > { %1989 = dma.vmem_to_hbm [thread:$0]  (%p2363_p3), %s1837_s10, 1024, %s1839_s28, %s1824_s24, %s2259_s8, %s2259_s8, %s2260_s27  }
 0x2c9 PF: > { %s1853_s30 = sand.u32 1, %s2237_s18   ;;  %p2934_p12 = scmp.ge.s32.totalorder %s2249_s21, 2 }
 0x2ca   : > { %s1854_s6 = scalar_lea.sflag [#allocation8], %s1853_s30 }
 0x2cb   : > { %p2003_p13 = pnand %p2934_p12, %p2326_p6 }
 0x2cd   : > { %p2004_p0 = pneg %p2003_p13 }
 0x2cf   : > { %2232 = dma.done.wait (%p2004_p0), %s1854_s6, 1024  }
 0x2d0   : > { %2234 = vsyncadd (%p2004_p0), %s1854_s6, 4294966272  ;;  %p19_p5 = scmp.ge.s32.totalorder %s2353_s14, 4   ;;  %s2935_s18 = smov %s2241_s19 }
 0x2d1   : > { %s2936_s19 = smov %s2245_s20  ;;  %s2937_s20 = smov %s2369_s23 }
 0x2d2   : > { %s2938_s21 = smov %s2353_s14  ;;  %21 = sbr.rel (!%p19_p5) target bundleno = 6 (0x6), region = 103 }
 0x2d7   :  { %1860 = vsyncpa [#allocation7], 1 }
 0x2d8   :  { %1862 = vsyncpa [#allocation7 + $0x1], 1 }
 0x2d9   :  { %1863 = vsyncpa [#allocation10], 1 }
 0x2da   :  { %1864 = vsyncpa [#allocation8], 1 }
 0x2db   :  { %1866 = vsyncpa [#allocation8 + $0x1], 1 }

</bundles_post_ra>
